<compile_context>
chip_gen: v7x
topology: tpu7x:2x2x1
jax: 0.10.0
libtpu: 0.0.40
codegen_flags: <defaults>
</compile_context>

<pallas_src>
import functools

import jax
import jax.numpy as jnp
from jax import lax
from jax.experimental import pallas as pl
from jax.experimental.pallas import tpu as pltpu

HIDDEN = 768       # self.hidden_size
EMBED = 200        # self.embedding_size
LN_EPS = 1e-5      # torch.nn.LayerNorm default eps


def _round_up(x, m):
    return (x + m - 1) // m * m


def _cdiv(a, b):
    return -(-a // b)


def _choose_tiles(B, L, rows_target):
    """Pick a (TB, TL) row tile with TB*TL ~= rows_target."""
    if L >= rows_target:
        tb = 1
        nl0 = _cdiv(L, rows_target)
        tl = _round_up(_cdiv(L, nl0), 16)       # bf16-friendly sublane multiple
    else:
        tb = max(1, min(B, rows_target // max(L, 1)))
        tl = L                                   # full seq dim -> always legal
    nb = _cdiv(B, tb)
    nl = _cdiv(L, tl)
    return tb, tl, nb, nl


# -----------------------------------------------------------------------------
# Pass A: per-tile lane-partial ||H||^2 and ||roberta||^2
# -----------------------------------------------------------------------------
def _norm_kernel(rob_ref, e1_ref, e2_ref, w1_ref, ssq_ref,
                 *, tb, tl, b_total, l_total, need_mask):
    rob = rob_ref[...]                                        # (tb, tl, 768) f32
    lhs = rob.reshape(tb * tl, HIDDEN).astype(jnp.bfloat16)   # cast in-kernel
    z = jnp.dot(lhs, w1_ref[...], preferred_element_type=jnp.float32)
    z = z.reshape(tb, tl, HIDDEN)
    g = jnp.maximum(z + e1_ref[...], 0.0)                     # e1: (tb, 1, 768)
    h = g * e2_ref[...]                                       # H tile, f32

    if need_mask:
        # Boundary (clipped) blocks carry stale VMEM rows; keep them out of the
        # Frobenius norms.  Only the norm pass needs this.
        row = pl.program_id(1) * tl + lax.broadcasted_iota(jnp.int32, (tb, tl, 1), 1)
        bat = pl.program_id(0) * tb + lax.broadcasted_iota(jnp.int32, (tb, tl, 1), 0)
        valid = (row < l_total) & (bat < b_total)
        h = jnp.where(valid, h, 0.0)
        rob = jnp.where(valid, rob, 0.0)

    # Row-axis (sublane) reduce only; the final cross-lane reduce is a tiny XLA
    # op between the two pallas_calls.
    ph = jnp.sum((h * h).reshape(tb * tl, HIDDEN), axis=0, keepdims=True)      # (1, 768)
    pr = jnp.sum((rob * rob).reshape(tb * tl, HIDDEN), axis=0, keepdims=True)  # (1, 768)
    ssq_ref[...] = jnp.concatenate([ph, pr], axis=0)[None, None]               # (1,1,2,768)


# -----------------------------------------------------------------------------
# Pass B: E = relu(rob@W1r + e1) * (alfa*e2) + rob ; LayerNorm
# -----------------------------------------------------------------------------
def _apply_kernel(rob_ref, e1_ref, e2s_ref, w1_ref, gamma_ref, beta_ref, out_ref,
                  *, tb, tl):
    rob = rob_ref[...]                                        # (tb, tl, 768) f32
    lhs = rob.reshape(tb * tl, HIDDEN).astype(jnp.bfloat16)
    z = jnp.dot(lhs, w1_ref[...], preferred_element_type=jnp.float32)
    z = z.reshape(tb, tl, HIDDEN)
    g = jnp.maximum(z + e1_ref[...], 0.0)
    e = g * e2s_ref[...] + rob                                # alfa folded into e2s

    inv_n = 1.0 / HIDDEN
    mean = jnp.sum(e, axis=-1, keepdims=True) * inv_n
    ex2 = jnp.sum(e * e, axis=-1, keepdims=True) * inv_n
    var = ex2 - mean * mean                                   # biased, like torch LN
    x = (e - mean) * lax.rsqrt(var + LN_EPS)
    out_ref[...] = (x * gamma_ref[...] + beta_ref[...]).astype(out_ref.dtype)


# -----------------------------------------------------------------------------
# Wrapper
# -----------------------------------------------------------------------------
@functools.partial(jax.jit, static_argnames=("beta_conf", "rows_target"))
def attn_gating_forward(params, embeddings_roberta, linguistic_feature,
                        *, beta_conf=0.5, rows_target=512):
    B, L, H = embeddings_roberta.shape
    assert H == HIDDEN
    rob = embeddings_roberta.astype(jnp.float32)              # no extra cast/pad pass

    # --- tiny per-batch glue in XLA (hoisted out of the per-row loop) ----------
    ling = linguistic_feature.astype(jnp.float32)
    emo = ling @ params["w_lin"].T + params["b_lin"]           # (B, 200)
    w1e = params["w1"][:EMBED].astype(jnp.float32)             # (200, 768)
    w1r = params["w1"][EMBED:].astype(jnp.bfloat16)            # (768, 768) MXU weight
    w2 = params["w2"].astype(jnp.float32)                      # (200, 768)
    e1 = (emo @ w1e)[:, None, :]                               # (B, 1, 768) relu bias
    e2 = (emo @ w2)[:, None, :]                                # (B, 1, 768) gate
    gamma = params["gamma"].reshape(1, HIDDEN).astype(jnp.float32)
    betap = params["beta"].reshape(1, HIDDEN).astype(jnp.float32)

    # --- tiling ----------------------------------------------------------------
    tb, tl, nb, nl = _choose_tiles(B, L, rows_target)
    need_mask = (tb * nb != B) or (tl * nl != L)

    rob_spec = pl.BlockSpec((tb, tl, HIDDEN), lambda bi, li: (bi, li, 0))
    e_spec = pl.BlockSpec((tb, 1, HIDDEN), lambda bi, li: (bi, 0, 0))
    w_spec = pl.BlockSpec((HIDDEN, HIDDEN), lambda bi, li: (0, 0))   # resident
    v_spec = pl.BlockSpec((1, HIDDEN), lambda bi, li: (0, 0))        # resident
    par = pltpu.CompilerParams(dimension_semantics=("parallel", "parallel"))

    # --- pass A: partial sums of squares ---------------------------------------
    norm_kernel = functools.partial(_norm_kernel, tb=tb, tl=tl,
                                    b_total=B, l_total=L, need_mask=need_mask)
    partials = pl.pallas_call(
        norm_kernel,
        out_shape=jax.ShapeDtypeStruct((nb, nl, 2, HIDDEN), jnp.float32),
        grid=(nb, nl),
        in_specs=[rob_spec, e_spec, e_spec, w_spec],
        out_specs=pl.BlockSpec((1, 1, 2, HIDDEN), lambda bi, li: (bi, li, 0, 0)),
        compiler_params=par,
    )(rob, e1, e2, w1r)

    # --- tiny XLA reduce: alfa, folded into the per-batch gate -----------------
    sh = jnp.sum(partials[:, :, 0, :])                        # ||H||_F^2
    sr = jnp.sum(partials[:, :, 1, :])                        # ||roberta||_F^2
    alfa = jnp.minimum(beta_conf * jnp.sqrt(sr / sh), 1.0)
    e2s = alfa * e2                                           # (B, 1, 768)

    # --- pass B: alfa*H + roberta, LayerNorm ------------------------------------
    apply_kernel = functools.partial(_apply_kernel, tb=tb, tl=tl)
    out = pl.pallas_call(
        apply_kernel,
        out_shape=jax.ShapeDtypeStruct((B, L, HIDDEN), jnp.float32),
        grid=(nb, nl),
        in_specs=[rob_spec, e_spec, e_spec, w_spec, v_spec, v_spec],
        out_specs=rob_spec,
        compiler_params=par,
    )(rob, e1, e2s, w1r, gamma, betap)

    return out


def init_params(key, ling_dim):
    k1, k2, k3, k4 = jax.random.split(key, 4)
    return {
        # nn.Linear(ling_dim, 200): weight (200, ling_dim), bias (200,)
        "w_lin": jax.random.uniform(k1, (EMBED, ling_dim), jnp.float32, -0.1, 0.1),
        "b_lin": jax.random.uniform(k2, (EMBED,), jnp.float32, -0.1, 0.1),
        # weight_emotion_W1 ~ U(-0.1, 0.1): (hidden+embed, hidden)
        "w1": jax.random.uniform(k3, (HIDDEN + EMBED, HIDDEN), jnp.float32, -0.1, 0.1),
        # weight_emotion_W2 ~ U(-0.1, 0.1): (embed, hidden)
        "w2": jax.random.uniform(k4, (EMBED, HIDDEN), jnp.float32, -0.1, 0.1),
        # LayerNorm(768)
        "gamma": jnp.ones((HIDDEN,), jnp.float32),
        "beta": jnp.zeros((HIDDEN,), jnp.float32),
    }


def _reference(params, rob, ling, beta):
    """Pure-JAX f32 mirror of the PyTorch forward (eval-mode dropout)."""
    B, L, _ = rob.shape
    emo = ling @ params["w_lin"].T + params["b_lin"]
    emo_t = jnp.broadcast_to(emo[:, None, :], (B, L, EMBED))
    comb = jnp.concatenate([emo_t, rob], axis=-1)
    g = jnp.maximum(comb @ params["w1"], 0.0)
    Hm = g * (emo_t @ params["w2"])
    alfa = jnp.minimum(
        beta * jnp.sqrt(jnp.sum(rob * rob)) / jnp.sqrt(jnp.sum(Hm * Hm)), 1.0)
    E = alfa * Hm + rob
    mean = jnp.mean(E, axis=-1, keepdims=True)
    var = jnp.mean((E - mean) ** 2, axis=-1, keepdims=True)
    x = (E - mean) / jnp.sqrt(var + LN_EPS)
    return x * params["gamma"] + params["beta"]


if __name__ == "__main__":
    # conf: LingFeature='NRC' (linear_input_dim=10), MAXLENGTH=8, Beta=0.5
    B, MAXLENGTH, LING_DIM, BETA = 2, 8, 10, 0.5

    key = jax.random.PRNGKey(0)
    kp, kx, kl = jax.random.split(key, 3)
    params = init_params(kp, LING_DIM)

    embeddings_roberta = jax.random.normal(kx, (B, MAXLENGTH, HIDDEN), jnp.float32)
    linguistic_feature = jax.random.normal(kl, (B, LING_DIM), jnp.float32)

    out = attn_gating_forward(params, embeddings_roberta, linguistic_feature,
                              beta_conf=BETA)
    out = jax.block_until_ready(out)
    assert out.shape == (B, MAXLENGTH, HIDDEN)
    assert bool(jnp.all(jnp.isfinite(out)))

    ref = _reference(params, embeddings_roberta, linguistic_feature, BETA)
    err = float(jnp.max(jnp.abs(out - ref)))
    assert err < 5e-2, f"max abs error vs f32 reference: {err}"
    print("KERNEL_OK")
</pallas_src>

<mosaic_0001>
module attributes {stable_mosaic.version = 11 : i64} {
  func.func @_norm_kernel(%arg0: i32, %arg1: i32, %arg2: memref<2x8x768xf32, #tpu.memory_space<vmem>>, %arg3: memref<2x1x768xf32, #tpu.memory_space<vmem>>, %arg4: memref<2x1x768xf32, #tpu.memory_space<vmem>>, %arg5: memref<768x768xbf16, #tpu.memory_space<vmem>>, %arg6: memref<1x1x2x768xf32, #tpu.memory_space<vmem>>) attributes {dimension_semantics = [#tpu.dimension_semantics<parallel>, #tpu.dimension_semantics<parallel>], iteration_bounds = array<i64: 1, 1>, scalar_prefetch = 0 : i64, scratch_operands = 0 : i64, tpu.core_type = #tpu.core_type<tc>, window_params = [{transform_indices = @transform_0, window_bounds = array<i64: 2, 8, 768>}, {transform_indices = @transform_1, window_bounds = array<i64: 2, 1, 768>}, {transform_indices = @transform_2, window_bounds = array<i64: 2, 1, 768>}, {pipeline_mode = #tpu.pipeline_mode<synchronous>, transform_indices = @transform_3, window_bounds = array<i64: 768, 768>}, {transform_indices = @transform_4, window_bounds = array<i64: 1, 1, 2, 768>}]} {
    %c0 = arith.constant 0 : index
    %c0_0 = arith.constant 0 : index
    %c0_1 = arith.constant 0 : index
    %0 = vector.load %arg2[%c0, %c0_0, %c0_1] : memref<2x8x768xf32, #tpu.memory_space<vmem>>, vector<2x8x768xf32>
    %1 = vector.shape_cast %0 : vector<2x8x768xf32> to vector<16x768xf32>
    %2 = arith.truncf %1 : vector<16x768xf32> to vector<16x768xbf16>
    %c0_2 = arith.constant 0 : index
    %c0_3 = arith.constant 0 : index
    %3 = vector.load %arg5[%c0_2, %c0_3] : memref<768x768xbf16, #tpu.memory_space<vmem>>, vector<768x768xbf16>
    %cst = arith.constant dense<0.000000e+00> : vector<16x768xf32>
    %4 = tpu.matmul %2, %3, %cst {dimension_numbers = #tpu.dot_dimension_numbers<[1], [0], [0], [1], [0, 0, 1, 1], [], []>} : vector<16x768xbf16>, vector<768x768xbf16>, vector<16x768xf32> -> vector<16x768xf32>
    %5 = vector.shape_cast %4 : vector<16x768xf32> to vector<2x8x768xf32>
    %c0_4 = arith.constant 0 : index
    %c0_5 = arith.constant 0 : index
    %c0_6 = arith.constant 0 : index
    %6 = vector.load %arg3[%c0_4, %c0_5, %c0_6] : memref<2x1x768xf32, #tpu.memory_space<vmem>>, vector<2x1x768xf32>
    %7 = vector.broadcast %6 : vector<2x1x768xf32> to vector<2x8x768xf32>
    %8 = arith.addf %5, %7 : vector<2x8x768xf32>
    %cst_7 = arith.constant 0.000000e+00 : f32
    %9 = vector.broadcast %cst_7 : f32 to vector<2x8x768xf32>
    %10 = arith.maximumf %8, %9 : vector<2x8x768xf32>
    %c0_8 = arith.constant 0 : index
    %c0_9 = arith.constant 0 : index
    %c0_10 = arith.constant 0 : index
    %11 = vector.load %arg4[%c0_8, %c0_9, %c0_10] : memref<2x1x768xf32, #tpu.memory_space<vmem>>, vector<2x1x768xf32>
    %12 = vector.broadcast %11 : vector<2x1x768xf32> to vector<2x8x768xf32>
    %13 = arith.mulf %10, %12 : vector<2x8x768xf32>
    %14 = arith.mulf %13, %13 : vector<2x8x768xf32>
    %15 = vector.shape_cast %14 : vector<2x8x768xf32> to vector<16x768xf32>
    %cst_11 = arith.constant dense<0.000000e+00> : vector<768xf32>
    %16 = vector.multi_reduction <add>, %15, %cst_11 [0] : vector<16x768xf32> to vector<768xf32>
    %17 = vector.shape_cast %16 : vector<768xf32> to vector<1x768xf32>
    %18 = arith.mulf %0, %0 : vector<2x8x768xf32>
    %19 = vector.shape_cast %18 : vector<2x8x768xf32> to vector<16x768xf32>
    %cst_12 = arith.constant dense<0.000000e+00> : vector<768xf32>
    %20 = vector.multi_reduction <add>, %19, %cst_12 [0] : vector<16x768xf32> to vector<768xf32>
    %21 = vector.shape_cast %20 : vector<768xf32> to vector<1x768xf32>
    %22 = tpu.concatenate %17, %21 in 0 : vector<1x768xf32>, vector<1x768xf32> -> vector<2x768xf32>
    %23 = vector.shape_cast %22 : vector<2x768xf32> to vector<1x1x2x768xf32>
    %c0_13 = arith.constant 0 : index
    %c0_14 = arith.constant 0 : index
    %c0_15 = arith.constant 0 : index
    %c0_16 = arith.constant 0 : index
    %24 = vector.load %arg6[%c0_13, %c0_14, %c0_15, %c0_16] : memref<1x1x2x768xf32, #tpu.memory_space<vmem>>, vector<1x1x2x768xf32>
    tpu.vector_store %arg6[%c0_13, %c0_14, %c0_15, %c0_16], %23 {strides = array<i32>} : memref<1x1x2x768xf32, #tpu.memory_space<vmem>>, vector<1x1x2x768xf32>,
    return
  }
  func.func @transform_0(%arg0: i32, %arg1: i32) -> (i32, i32, i32) {
    %c0_i32 = arith.constant 0 : i32
    %c0_i32_0 = arith.constant 0 : i32
    return %arg0, %arg1, %c0_i32 : i32, i32, i32
  }
  func.func @transform_1(%arg0: i32, %arg1: i32) -> (i32, i32, i32) {
    %c0_i32 = arith.constant 0 : i32
    %c0_i32_0 = arith.constant 0 : i32
    %c0_i32_1 = arith.constant 0 : i32
    return %arg0, %c0_i32, %c0_i32_0 : i32, i32, i32
  }
  func.func @transform_2(%arg0: i32, %arg1: i32) -> (i32, i32, i32) {
    %c0_i32 = arith.constant 0 : i32
    %c0_i32_0 = arith.constant 0 : i32
    %c0_i32_1 = arith.constant 0 : i32
    return %arg0, %c0_i32, %c0_i32_0 : i32, i32, i32
  }
  func.func @transform_3(%arg0: i32, %arg1: i32) -> (i32, i32) {
    %c0_i32 = arith.constant 0 : i32
    %c0_i32_0 = arith.constant 0 : i32
    %c0_i32_1 = arith.constant 0 : i32
    return %c0_i32, %c0_i32_0 : i32, i32
  }
  func.func @transform_4(%arg0: i32, %arg1: i32) -> (i32, i32, i32, i32) {
    %c0_i32 = arith.constant 0 : i32
    %c0_i32_0 = arith.constant 0 : i32
    %c0_i32_1 = arith.constant 0 : i32
    return %arg0, %arg1, %c0_i32, %c0_i32_0 : i32, i32, i32, i32
  }
}

module attributes {stable_mosaic.version = 11 : i64} {
  func.func @_apply_kernel(%arg0: i32, %arg1: i32, %arg2: memref<2x8x768xf32, #tpu.memory_space<vmem>>, %arg3: memref<2x1x768xf32, #tpu.memory_space<vmem>>, %arg4: memref<2x1x768xf32, #tpu.memory_space<vmem>>, %arg5: memref<768x768xbf16, #tpu.memory_space<vmem>>, %arg6: memref<1x768xf32, #tpu.memory_space<vmem>>, %arg7: memref<1x768xf32, #tpu.memory_space<vmem>>, %arg8: memref<2x8x768xf32, #tpu.memory_space<vmem>>) attributes {dimension_semantics = [#tpu.dimension_semantics<parallel>, #tpu.dimension_semantics<parallel>], iteration_bounds = array<i64: 1, 1>, scalar_prefetch = 0 : i64, scratch_operands = 0 : i64, tpu.core_type = #tpu.core_type<tc>, window_params = [{transform_indices = @transform_0, window_bounds = array<i64: 2, 8, 768>}, {transform_indices = @transform_1, window_bounds = array<i64: 2, 1, 768>}, {transform_indices = @transform_2, window_bounds = array<i64: 2, 1, 768>}, {pipeline_mode = #tpu.pipeline_mode<synchronous>, transform_indices = @transform_3, window_bounds = array<i64: 768, 768>}, {pipeline_mode = #tpu.pipeline_mode<synchronous>, transform_indices = @transform_4, window_bounds = array<i64: 1, 768>}, {pipeline_mode = #tpu.pipeline_mode<synchronous>, transform_indices = @transform_5, window_bounds = array<i64: 1, 768>}, {transform_indices = @transform_6, window_bounds = array<i64: 2, 8, 768>}]} {
    %c0 = arith.constant 0 : index
    %c0_0 = arith.constant 0 : index
    %c0_1 = arith.constant 0 : index
    %0 = vector.load %arg2[%c0, %c0_0, %c0_1] : memref<2x8x768xf32, #tpu.memory_space<vmem>>, vector<2x8x768xf32>
    %1 = vector.shape_cast %0 : vector<2x8x768xf32> to vector<16x768xf32>
    %2 = arith.truncf %1 : vector<16x768xf32> to vector<16x768xbf16>
    %c0_2 = arith.constant 0 : index
    %c0_3 = arith.constant 0 : index
    %3 = vector.load %arg5[%c0_2, %c0_3] : memref<768x768xbf16, #tpu.memory_space<vmem>>, vector<768x768xbf16>
    %cst = arith.constant dense<0.000000e+00> : vector<16x768xf32>
    %4 = tpu.matmul %2, %3, %cst {dimension_numbers = #tpu.dot_dimension_numbers<[1], [0], [0], [1], [0, 0, 1, 1], [], []>} : vector<16x768xbf16>, vector<768x768xbf16>, vector<16x768xf32> -> vector<16x768xf32>
    %5 = vector.shape_cast %4 : vector<16x768xf32> to vector<2x8x768xf32>
    %c0_4 = arith.constant 0 : index
    %c0_5 = arith.constant 0 : index
    %c0_6 = arith.constant 0 : index
    %6 = vector.load %arg3[%c0_4, %c0_5, %c0_6] : memref<2x1x768xf32, #tpu.memory_space<vmem>>, vector<2x1x768xf32>
    %7 = vector.broadcast %6 : vector<2x1x768xf32> to vector<2x8x768xf32>
    %8 = arith.addf %5, %7 : vector<2x8x768xf32>
    %cst_7 = arith.constant 0.000000e+00 : f32
    %9 = vector.broadcast %cst_7 : f32 to vector<2x8x768xf32>
    %10 = arith.maximumf %8, %9 : vector<2x8x768xf32>
    %c0_8 = arith.constant 0 : index
    %c0_9 = arith.constant 0 : index
    %c0_10 = arith.constant 0 : index
    %11 = vector.load %arg4[%c0_8, %c0_9, %c0_10] : memref<2x1x768xf32, #tpu.memory_space<vmem>>, vector<2x1x768xf32>
    %12 = vector.broadcast %11 : vector<2x1x768xf32> to vector<2x8x768xf32>
    %13 = arith.mulf %10, %12 : vector<2x8x768xf32>
    %14 = arith.addf %13, %0 : vector<2x8x768xf32>
    %cst_11 = arith.constant dense<0.000000e+00> : vector<2x8xf32>
    %15 = vector.multi_reduction <add>, %14, %cst_11 [2] : vector<2x8x768xf32> to vector<2x8xf32>
    %16 = vector.shape_cast %15 : vector<2x8xf32> to vector<2x8x1xf32>
    %cst_12 = arith.constant 0.00130208337 : f32
    %17 = vector.broadcast %cst_12 : f32 to vector<2x8x1xf32>
    %18 = arith.mulf %16, %17 : vector<2x8x1xf32>
    %19 = arith.mulf %14, %14 : vector<2x8x768xf32>
    %cst_13 = arith.constant dense<0.000000e+00> : vector<2x8xf32>
    %20 = vector.multi_reduction <add>, %19, %cst_13 [2] : vector<2x8x768xf32> to vector<2x8xf32>
    %21 = vector.shape_cast %20 : vector<2x8xf32> to vector<2x8x1xf32>
    %cst_14 = arith.constant 0.00130208337 : f32
    %22 = vector.broadcast %cst_14 : f32 to vector<2x8x1xf32>
    %23 = arith.mulf %21, %22 : vector<2x8x1xf32>
    %24 = arith.mulf %18, %18 : vector<2x8x1xf32>
    %25 = arith.subf %23, %24 : vector<2x8x1xf32>
    %26 = vector.broadcast %18 : vector<2x8x1xf32> to vector<2x8x768xf32>
    %27 = arith.subf %14, %26 : vector<2x8x768xf32>
    %cst_15 = arith.constant 9.99999974E-6 : f32
    %28 = vector.broadcast %cst_15 : f32 to vector<2x8x1xf32>
    %29 = arith.addf %25, %28 : vector<2x8x1xf32>
    %30 = math.rsqrt %29 : vector<2x8x1xf32>
    %31 = vector.broadcast %30 : vector<2x8x1xf32> to vector<2x8x768xf32>
    %32 = arith.mulf %27, %31 : vector<2x8x768xf32>
    %c0_16 = arith.constant 0 : index
    %c0_17 = arith.constant 0 : index
    %33 = vector.load %arg6[%c0_16, %c0_17] : memref<1x768xf32, #tpu.memory_space<vmem>>, vector<1x768xf32>
    %34 = vector.shape_cast %33 : vector<1x768xf32> to vector<1x1x768xf32>
    %35 = vector.broadcast %34 : vector<1x1x768xf32> to vector<2x8x768xf32>
    %36 = arith.mulf %32, %35 : vector<2x8x768xf32>
    %c0_18 = arith.constant 0 : index
    %c0_19 = arith.constant 0 : index
    %37 = vector.load %arg7[%c0_18, %c0_19] : memref<1x768xf32, #tpu.memory_space<vmem>>, vector<1x768xf32>
    %38 = vector.shape_cast %37 : vector<1x768xf32> to vector<1x1x768xf32>
    %39 = vector.broadcast %38 : vector<1x1x768xf32> to vector<2x8x768xf32>
    %40 = arith.addf %36, %39 : vector<2x8x768xf32>
    %c0_20 = arith.constant 0 : index
    %c0_21 = arith.constant 0 : index
    %c0_22 = arith.constant 0 : index
    %41 = vector.load %arg8[%c0_20, %c0_21, %c0_22] : memref<2x8x768xf32, #tpu.memory_space<vmem>>, vector<2x8x768xf32>
    tpu.vector_store %arg8[%c0_20, %c0_21, %c0_22], %40 {strides = array<i32>} : memref<2x8x768xf32, #tpu.memory_space<vmem>>, vector<2x8x768xf32>,
    return
  }
  func.func @transform_0(%arg0: i32, %arg1: i32) -> (i32, i32, i32) {
    %c0_i32 = arith.constant 0 : i32
    %c0_i32_0 = arith.constant 0 : i32
    return %arg0, %arg1, %c0_i32 : i32, i32, i32
  }
  func.func @transform_1(%arg0: i32, %arg1: i32) -> (i32, i32, i32) {
    %c0_i32 = arith.constant 0 : i32
    %c0_i32_0 = arith.constant 0 : i32
    %c0_i32_1 = arith.constant 0 : i32
    return %arg0, %c0_i32, %c0_i32_0 : i32, i32, i32
  }
  func.func @transform_2(%arg0: i32, %arg1: i32) -> (i32, i32, i32) {
    %c0_i32 = arith.constant 0 : i32
    %c0_i32_0 = arith.constant 0 : i32
    %c0_i32_1 = arith.constant 0 : i32
    return %arg0, %c0_i32, %c0_i32_0 : i32, i32, i32
  }
  func.func @transform_3(%arg0: i32, %arg1: i32) -> (i32, i32) {
    %c0_i32 = arith.constant 0 : i32
    %c0_i32_0 = arith.constant 0 : i32
    %c0_i32_1 = arith.constant 0 : i32
    return %c0_i32, %c0_i32_0 : i32, i32
  }
  func.func @transform_4(%arg0: i32, %arg1: i32) -> (i32, i32) {
    %c0_i32 = arith.constant 0 : i32
    %c0_i32_0 = arith.constant 0 : i32
    %c0_i32_1 = arith.constant 0 : i32
    return %c0_i32, %c0_i32_0 : i32, i32
  }
  func.func @transform_5(%arg0: i32, %arg1: i32) -> (i32, i32) {
    %c0_i32 = arith.constant 0 : i32
    %c0_i32_0 = arith.constant 0 : i32
    %c0_i32_1 = arith.constant 0 : i32
    return %c0_i32, %c0_i32_0 : i32, i32
  }
  func.func @transform_6(%arg0: i32, %arg1: i32) -> (i32, i32, i32) {
    %c0_i32 = arith.constant 0 : i32
    %c0_i32_0 = arith.constant 0 : i32
    return %arg0, %arg1, %c0_i32 : i32, i32, i32
  }
}

</mosaic_0001>

<bundles_post_ra>
// kernel: attn_gating_forward.3
= control target key start
LH: loop header
LB: loop body
LE: loop exit
PB: predicated region body
PF: predicated region fallthrough
CT: control target
= control target key end

     0   :  { %s4502_s0 = inlined_call_operand.vmem [shape: f32[2,8,768], index: 0, kind: input, shape index: {}]   ;;  %s4503_s1 = inlined_call_operand.vmem [shape: f32[2,1,768], index: 1, kind: input, shape index: {}]   ;;  %s4504_s2 = inlined_call_operand.vmem [shape: f32[2,1,768], index: 2, kind: input, shape index: {}]   ;;  %s4505_s3 = inlined_call_operand.vmem [shape: bf16[768,768], index: 3, kind: input, shape index: {}]   ;;  %s4506_s4 = inlined_call_operand.vmem [shape: f32[1,768], index: 4, kind: input, shape index: {}]   ;;  %s4507_s5 = inlined_call_operand.vmem [shape: f32[1,768], index: 5, kind: input, shape index: {}]   ;;  %s4508_s6 = inlined_call_operand.hbm [shape: f32[2,8,768], index: 6, kind: output, shape index: {}]  }
   0x1   :  { %v2840_v0 = vld [vmem:[%s4505_s3 + $0x4] ss:$24 sps:$4 sm:$0xff]   ;;  %v2844_v2 = vld [vmem:[%s4505_s3] ss:$24 sps:$4 sm:$0xff]   ;;  %v2846_v4 = vld [vmem:[%s4505_s3 + $0x34] ss:$24 sps:$4 sm:$0xff]  }
   0x2   :  { %v2842_v1 = vld [vmem:[%s4505_s3 + $0x304] ss:$24 sps:$4 sm:$0xff]   ;;  %1770 = vmatprep.subr.bf16.mxu1 %v2840_v0  ;;  %v2845_v3 = vld [vmem:[%s4505_s3 + $0x300] ss:$24 sps:$4 sm:$0xff]   ;;  %v2848_v5 = vld [vmem:[%s4505_s3 + $0x334] ss:$24 sps:$4 sm:$0xff]  }
   0x3   :  { %1813 = vmatprep.subr.bf16.mxu0 %v2842_v1  ;;  %1771 = vmatpush1.bf16.msra.mxu1 %v2844_v2  ;;  %v2850_v6 = vld [vmem:[%s4505_s3 + $0x30] ss:$24 sps:$4 sm:$0xff]   ;;  %v2852_v8 = vld [vmem:[%s4505_s3 + $0x64] ss:$24 sps:$4 sm:$0xff]   ;;  %v2856_v10 = vld [vmem:[%s4505_s3 + $0x60] ss:$24 sps:$4 sm:$0xff]  }
   0x4   :  { %1814 = vmatpush1.bf16.msra.mxu0 %v2845_v3  ;;  %1772 = vmatprep.subr.bf16.mxu1 %v2846_v4  ;;  %v2851_v7 = vld [vmem:[%s4505_s3 + $0x330] ss:$24 sps:$4 sm:$0xff]   ;;  %v2854_v9 = vld [vmem:[%s4505_s3 + $0x364] ss:$24 sps:$4 sm:$0xff]   ;;  %v2857_v11 = vld [vmem:[%s4505_s3 + $0x360] ss:$24 sps:$4 sm:$0xff]  }
   0x5   :  { %1815 = vmatprep.subr.bf16.mxu0 %v2848_v5  ;;  %v2858_v12 = vld [vmem:[%s4505_s3 + $0x94] ss:$24 sps:$4 sm:$0xff]   ;;  %v2862_v14 = vld [vmem:[%s4505_s3 + $0x90] ss:$24 sps:$4 sm:$0xff]   ;;  %v2864_v16 = vld [vmem:[%s4505_s3 + $0xc4] ss:$24 sps:$4 sm:$0xff]  }
   0x6   :  { %v2860_v13 = vld [vmem:[%s4505_s3 + $0x394] ss:$24 sps:$4 sm:$0xff]   ;;  %v2863_v15 = vld [vmem:[%s4505_s3 + $0x390] ss:$24 sps:$4 sm:$0xff]   ;;  %v2866_v17 = vld [vmem:[%s4505_s3 + $0x3c4] ss:$24 sps:$4 sm:$0xff]  }
   0x7   :  { %1773 = vmatpush1.bf16.msra.mxu1 %v2850_v6  ;;  %v2868_v18 = vld [vmem:[%s4505_s3 + $0xc0] ss:$24 sps:$4 sm:$0xff]   ;;  %v2870_v20 = vld [vmem:[%s4505_s3 + $0xf4] ss:$24 sps:$4 sm:$0xff]   ;;  %v2874_v22 = vld [vmem:[%s4505_s3 + $0xf0] ss:$24 sps:$4 sm:$0xff]  }
   0x8   :  { %1816 = vmatpush1.bf16.msra.mxu0 %v2851_v7  ;;  %1774 = vmatprep.subr.bf16.mxu1 %v2852_v8  ;;  %v2869_v19 = vld [vmem:[%s4505_s3 + $0x3c0] ss:$24 sps:$4 sm:$0xff]   ;;  %v2872_v21 = vld [vmem:[%s4505_s3 + $0x3f4] ss:$24 sps:$4 sm:$0xff]   ;;  %v2875_v23 = vld [vmem:[%s4505_s3 + $0x3f0] ss:$24 sps:$4 sm:$0xff]  }
   0x9   :  { %1817 = vmatprep.subr.bf16.mxu0 %v2854_v9  ;;  %v2876_v24 = vld [vmem:[%s4505_s3 + $0x124] ss:$24 sps:$4 sm:$0xff]   ;;  %v2880_v26 = vld [vmem:[%s4505_s3 + $0x120] ss:$24 sps:$4 sm:$0xff]   ;;  %v2882_v28 = vld [vmem:[%s4505_s3 + $0x154] ss:$24 sps:$4 sm:$0xff]  }
   0xa   :  { %v2878_v25 = vld [vmem:[%s4505_s3 + $0x424] ss:$24 sps:$4 sm:$0xff]   ;;  %v2881_v27 = vld [vmem:[%s4505_s3 + $0x420] ss:$24 sps:$4 sm:$0xff]   ;;  %v2884_v29 = vld [vmem:[%s4505_s3 + $0x454] ss:$24 sps:$4 sm:$0xff]  }
   0xb   :  { %1775 = vmatpush1.bf16.msra.mxu1 %v2856_v10  ;;  %v2886_v30 = vld [vmem:[%s4505_s3 + $0x150] ss:$24 sps:$4 sm:$0xff]   ;;  %v2888_v32 = vld [vmem:[%s4505_s3 + $0x184] ss:$24 sps:$4 sm:$0xff]   ;;  %v2892_v34 = vld [vmem:[%s4505_s3 + $0x180] ss:$24 sps:$4 sm:$0xff]  }
   0xc   :  { %1818 = vmatpush1.bf16.msra.mxu0 %v2857_v11  ;;  %1776 = vmatprep.subr.bf16.mxu1 %v2858_v12  ;;  %v2887_v31 = vld [vmem:[%s4505_s3 + $0x450] ss:$24 sps:$4 sm:$0xff]   ;;  %v2890_v33 = vld [vmem:[%s4505_s3 + $0x484] ss:$24 sps:$4 sm:$0xff]   ;;  %v2893_v35 = vld [vmem:[%s4505_s3 + $0x480] ss:$24 sps:$4 sm:$0xff]  }
   0xd   :  { %1819 = vmatprep.subr.bf16.mxu0 %v2860_v13  ;;  %v2894_v36 = vld [vmem:[%s4505_s3 + $0x1b4] ss:$24 sps:$4 sm:$0xff]   ;;  %v2898_v38 = vld [vmem:[%s4505_s3 + $0x1b0] ss:$24 sps:$4 sm:$0xff]   ;;  %v2900_v40 = vld [vmem:[%s4505_s3 + $0x1e4] ss:$24 sps:$4 sm:$0xff]  }
   0xe   :  { %v2896_v37 = vld [vmem:[%s4505_s3 + $0x4b4] ss:$24 sps:$4 sm:$0xff]   ;;  %v2899_v39 = vld [vmem:[%s4505_s3 + $0x4b0] ss:$24 sps:$4 sm:$0xff]   ;;  %v2902_v41 = vld [vmem:[%s4505_s3 + $0x4e4] ss:$24 sps:$4 sm:$0xff]  }
   0xf   :  { %1777 = vmatpush1.bf16.msra.mxu1 %v2862_v14  ;;  %v2904_v42 = vld [vmem:[%s4505_s3 + $0x1e0] ss:$24 sps:$4 sm:$0xff]   ;;  %v2906_v44 = vld [vmem:[%s4505_s3 + $0x214] ss:$24 sps:$4 sm:$0xff]   ;;  %v2910_v46 = vld [vmem:[%s4505_s3 + $0x210] ss:$24 sps:$4 sm:$0xff]  }
  0x10   :  { %1820 = vmatpush1.bf16.msra.mxu0 %v2863_v15  ;;  %1778 = vmatprep.subr.bf16.mxu1 %v2864_v16  ;;  %v2905_v43 = vld [vmem:[%s4505_s3 + $0x4e0] ss:$24 sps:$4 sm:$0xff]   ;;  %v2908_v45 = vld [vmem:[%s4505_s3 + $0x514] ss:$24 sps:$4 sm:$0xff]   ;;  %v2911_v47 = vld [vmem:[%s4505_s3 + $0x510] ss:$24 sps:$4 sm:$0xff]  }
  0x11   :  { %1821 = vmatprep.subr.bf16.mxu0 %v2866_v17  ;;  %v25_v48 = vld [vmem:[%s4502_s0 + $0x8] sm:$0xff]  ;;  %v31_v49 = vld [vmem:[%s4502_s0 + $0x38] sm:$0xff]  ;;  %v24_v6 = vld [vmem:[%s4502_s0] sm:$0xff] }
  0x12   :  { %v27_v50 = vld [vmem:[%s4502_s0 + $0x18] sm:$0xff]  ;;  %v33_v51 = vld [vmem:[%s4502_s0 + $0x48] sm:$0xff]  ;;  %v3509_v53 = vpack.c.bf16 %v31_v49, %v25_v48  ;;  %v30_v8 = vld [vmem:[%s4502_s0 + $0x30] sm:$0xff] }
  0x13   :  { %1779 = vmatpush1.bf16.msra.mxu1 %v2868_v18  ;;  %v2912_v52 = vld [vmem:[%s4505_s3 + $0x244] ss:$24 sps:$4 sm:$0xff]   ;;  %v3511_v54 = vpack.c.bf16 %v33_v51, %v27_v50  ;;  %v2916_v56 = vld [vmem:[%s4505_s3 + $0x240] ss:$24 sps:$4 sm:$0xff]   ;;  %v2918_v58 = vld [vmem:[%s4505_s3 + $0x274] ss:$24 sps:$4 sm:$0xff]   ;;  %v3584_v14 = vpack.c.bf16 %v30_v8, %v24_v6 }
  0x14   :  { %1822 = vmatpush1.bf16.msra.mxu0 %v2869_v19  ;;  %1780 = vmatprep.subr.bf16.mxu1 %v2870_v20  ;;  %v2914_v55 = vld [vmem:[%s4505_s3 + $0x544] ss:$24 sps:$4 sm:$0xff]   ;;  %v2917_v57 = vld [vmem:[%s4505_s3 + $0x540] ss:$24 sps:$4 sm:$0xff]   ;;  %v2920_v59 = vld [vmem:[%s4505_s3 + $0x574] ss:$24 sps:$4 sm:$0xff]  }
  0x15   :  { %1823 = vmatprep.subr.bf16.mxu0 %v2872_v21  ;;  %1802 = vmatprep.mubr.bf16.mxu1 %v3509_v53  ;;  %v2922_v60 = vld [vmem:[%s4505_s3 + $0x270] ss:$24 sps:$4 sm:$0xff]   ;;  %v2924_v62 = vld [vmem:[%s4505_s3 + $0x2a4] ss:$24 sps:$4 sm:$0xff]   ;;  %v2928_v0 = vld [vmem:[%s4505_s3 + $0x2a0] ss:$24 sps:$4 sm:$0xff]  }
  0x16   :  { %1845 = vmatprep.mubr.bf16.mxu0 %v3511_v54  ;;  %v2923_v61 = vld [vmem:[%s4505_s3 + $0x570] ss:$24 sps:$4 sm:$0xff]   ;;  %v2926_v63 = vld [vmem:[%s4505_s3 + $0x5a4] ss:$24 sps:$4 sm:$0xff]   ;;  %v2929_v1 = vld [vmem:[%s4505_s3 + $0x5a0] ss:$24 sps:$4 sm:$0xff]  }
  0x17   :  { %1781 = vmatpush1.bf16.msra.mxu1 %v2874_v22  ;;  %v2930_v2 = vld [vmem:[%s4505_s3 + $0x2d4] ss:$24 sps:$4 sm:$0xff]   ;;  %v2934_v4 = vld [vmem:[%s4505_s3 + $0x2d0] ss:$24 sps:$4 sm:$0xff]   ;;  %v2938_v7 = vld [vmem:[%s4505_s3 + $0x604] ss:$24 sps:$4 sm:$0xff]  }
  0x18   :  { %1824 = vmatpush1.bf16.msra.mxu0 %v2875_v23  ;;  %1782 = vmatprep.subr.bf16.mxu1 %v2876_v24  ;;  %v2932_v3 = vld [vmem:[%s4505_s3 + $0x5d4] ss:$24 sps:$4 sm:$0xff]   ;;  %v2935_v5 = vld [vmem:[%s4505_s3 + $0x5d0] ss:$24 sps:$4 sm:$0xff]   ;;  %v32_v10 = vld [vmem:[%s4502_s0 + $0x40] sm:$0xff] }
  0x19   :  { %1825 = vmatprep.subr.bf16.mxu0 %v2878_v25  ;;  %v26_v9 = vld [vmem:[%s4502_s0 + $0x10] sm:$0xff]  ;;  %v2941_v11 = vld [vmem:[%s4505_s3 + $0xc] ss:$24 sps:$4 sm:$0xff]   ;;  %v2936_v12 = vld [vmem:[%s4505_s3 + $0x600] ss:$24 sps:$4 sm:$0xff]  }
  0x1a   :  { %v2939_v13 = vld [vmem:[%s4505_s3 + $0x8] ss:$24 sps:$4 sm:$0xff]   ;;  %v3586_v15 = vpack.c.bf16 %v32_v10, %v26_v9  ;;  %v2944_v16 = vld [vmem:[%s4505_s3 + $0x634] ss:$24 sps:$4 sm:$0xff]   ;;  %v2945_v19 = vld [vmem:[%s4505_s3 + $0x38] ss:$24 sps:$4 sm:$0xff]  }
  0x1b   :  { %1783 = vmatpush1.bf16.msra.mxu1 %v2880_v26  ;;  %v2947_v17 = vld [vmem:[%s4505_s3 + $0x3c] ss:$24 sps:$4 sm:$0xff]   ;;  %v2942_v18 = vld [vmem:[%s4505_s3 + $0x630] ss:$24 sps:$4 sm:$0xff]   ;;  %v2953_v21 = vld [vmem:[%s4505_s3 + $0x6c] ss:$24 sps:$4 sm:$0xff]  }
  0x1c   :  { %1826 = vmatpush1.bf16.msra.mxu0 %v2881_v27  ;;  %1784 = vmatprep.subr.bf16.mxu1 %v2882_v28  ;;  %v2950_v20 = vld [vmem:[%s4505_s3 + $0x664] ss:$24 sps:$4 sm:$0xff]   ;;  %v2948_v22 = vld [vmem:[%s4505_s3 + $0x660] ss:$24 sps:$4 sm:$0xff]   ;;  %v2956_v24 = vld [vmem:[%s4505_s3 + $0x694] ss:$24 sps:$4 sm:$0xff]  }
  0x1d   :  { %1827 = vmatprep.subr.bf16.mxu0 %v2884_v29  ;;  %v2951_v23 = vld [vmem:[%s4505_s3 + $0x68] ss:$24 sps:$4 sm:$0xff]   ;;  %v2959_v25 = vld [vmem:[%s4505_s3 + $0x9c] ss:$24 sps:$4 sm:$0xff]   ;;  %v2957_v27 = vld [vmem:[%s4505_s3 + $0x98] ss:$24 sps:$4 sm:$0xff]  }
  0x1e   :  { %v2954_v26 = vld [vmem:[%s4505_s3 + $0x690] ss:$24 sps:$4 sm:$0xff]   ;;  %v2962_v28 = vld [vmem:[%s4505_s3 + $0x6c4] ss:$24 sps:$4 sm:$0xff]   ;;  %v2984_v49 = vld [vmem:[%s4505_s3 + $0x780] ss:$24 sps:$4 sm:$0xff]  }
  0x1f   :  { %1785 = vmatpush1.bf16.msra.mxu1 %v2886_v30  ;;  %v2965_v29 = vld [vmem:[%s4505_s3 + $0xcc] ss:$24 sps:$4 sm:$0xff]   ;;  %v2960_v30 = vld [vmem:[%s4505_s3 + $0x6c0] ss:$24 sps:$4 sm:$0xff]   ;;  %v3019_v6 = vld [vmem:[%s4505_s3 + $0x27c] ss:$24 sps:$4 sm:$0xff]  }
  0x20   :  { %1828 = vmatpush1.bf16.msra.mxu0 %v2887_v31  ;;  %1786 = vmatprep.subr.bf16.mxu1 %v2888_v32  ;;  %v2963_v31 = vld [vmem:[%s4505_s3 + $0xc8] ss:$24 sps:$4 sm:$0xff]   ;;  %v2968_v32 = vld [vmem:[%s4505_s3 + $0x6f4] ss:$24 sps:$4 sm:$0xff]   ;;  %v3017_v8 = vld [vmem:[%s4505_s3 + $0x278] ss:$24 sps:$4 sm:$0xff]  }
  0x21   :  { %1829 = vmatprep.subr.bf16.mxu0 %v2890_v33  ;;  %v2971_v33 = vld [vmem:[%s4505_s3 + $0xfc] ss:$24 sps:$4 sm:$0xff]   ;;  %v2989_v48 = vld [vmem:[%s4505_s3 + $0x18c] ss:$24 sps:$4 sm:$0xff]   ;;  %v2987_v50 = vld [vmem:[%s4505_s3 + $0x188] ss:$24 sps:$4 sm:$0xff]  }
  0x22   :  { %v2992_v51 = vld [vmem:[%s4505_s3 + $0x7b4] ss:$24 sps:$4 sm:$0xff]   ;;  %v3022_v9 = vld [vmem:[%s4505_s3 + $0x8a4] ss:$24 sps:$4 sm:$0xff]  }
  0x23   :  { %1787 = vmatpush1.bf16.msra.mxu1 %v2892_v34  ;;  %v2966_v34 = vld [vmem:[%s4505_s3 + $0x6f0] ss:$24 sps:$4 sm:$0xff]   ;;  %v3025_v10 = vld [vmem:[%s4505_s3 + $0x2ac] ss:$24 sps:$4 sm:$0xff]  }
  0x24   :  { %1830 = vmatpush1.bf16.msra.mxu0 %v2893_v35  ;;  %1788 = vmatprep.subr.bf16.mxu1 %v2894_v36  ;;  %v2969_v35 = vld [vmem:[%s4505_s3 + $0xf8] ss:$24 sps:$4 sm:$0xff]   ;;  %v2974_v36 = vld [vmem:[%s4505_s3 + $0x724] ss:$24 sps:$4 sm:$0xff]  }
  0x25   :  { %1831 = vmatprep.subr.bf16.mxu0 %v2896_v37  ;;  %v2977_v37 = vld [vmem:[%s4505_s3 + $0x12c] ss:$24 sps:$4 sm:$0xff]  }
  0x27   :  { %1789 = vmatpush1.bf16.msra.mxu1 %v2898_v38  ;;  %v2972_v38 = vld [vmem:[%s4505_s3 + $0x720] ss:$24 sps:$4 sm:$0xff]  }
  0x28   :  { %1832 = vmatpush1.bf16.msra.mxu0 %v2899_v39  ;;  %1790 = vmatprep.subr.bf16.mxu1 %v2900_v40  ;;  %v2975_v39 = vld [vmem:[%s4505_s3 + $0x128] ss:$24 sps:$4 sm:$0xff]   ;;  %v2980_v40 = vld [vmem:[%s4505_s3 + $0x754] ss:$24 sps:$4 sm:$0xff]  }
  0x29   :  { %1833 = vmatprep.subr.bf16.mxu0 %v2902_v41  ;;  %v29_v41 = vld [vmem:[%s4502_s0 + $0x28] sm:$0xff] }
  0x2b   :  { %1791 = vmatpush1.bf16.msra.mxu1 %v2904_v42  ;;  %v35_v42 = vld [vmem:[%s4502_s0 + $0x58] sm:$0xff] }
  0x2c   :  { %1834 = vmatpush1.bf16.msra.mxu0 %v2905_v43  ;;  %1792 = vmatprep.subr.bf16.mxu1 %v2906_v44  ;;  %v2983_v43 = vld [vmem:[%s4505_s3 + $0x15c] ss:$24 sps:$4 sm:$0xff]   ;;  %v3675_v44 = vpack.c.bf16 %v35_v42, %v29_v41 }
  0x2d   :  { %1835 = vmatprep.subr.bf16.mxu0 %v2908_v45  ;;  %v2978_v45 = vld [vmem:[%s4505_s3 + $0x750] ss:$24 sps:$4 sm:$0xff]   ;;  %v3064_v41 = vld [vmem:[%s4505_s3 + $0x3fc] ss:$24 sps:$4 sm:$0xff]  }
  0x2e   :  { %v3067_v42 = vld [vmem:[%s4505_s3 + $0x104] ss:$24 sps:$4 sm:$0xff]  }
  0x2f   :  { %1793 = vmatpush1.bf16.msra.mxu1 %v2910_v46  ;;  %v2981_v46 = vld [vmem:[%s4505_s3 + $0x158] ss:$24 sps:$4 sm:$0xff]  }
  0x30   :  { %1836 = vmatpush1.bf16.msra.mxu0 %v2911_v47  ;;  %1794 = vmatprep.subr.bf16.mxu1 %v2912_v52  ;;  %v2986_v47 = vld [vmem:[%s4505_s3 + $0x784] ss:$24 sps:$4 sm:$0xff]  }
  0x31   :  { %1837 = vmatprep.subr.bf16.mxu0 %v2914_v55  ;;  %v2995_v52 = vld [vmem:[%s4505_s3 + $0x1bc] ss:$24 sps:$4 sm:$0xff]   ;;  %v2990_v55 = vld [vmem:[%s4505_s3 + $0x7b0] ss:$24 sps:$4 sm:$0xff]  }
  0x33   :  { %1795 = vmatpush1.bf16.msra.mxu1 %v2916_v56  ;;  %v2993_v56 = vld [vmem:[%s4505_s3 + $0x1b8] ss:$24 sps:$4 sm:$0xff]  }
  0x34   :  { %1838 = vmatpush1.bf16.msra.mxu0 %v2917_v57  ;;  %1796 = vmatprep.subr.bf16.mxu1 %v2918_v58  ;;  %v2998_v57 = vld [vmem:[%s4505_s3 + $0x7e4] ss:$24 sps:$4 sm:$0xff]  }
  0x35   :  { %1839 = vmatprep.subr.bf16.mxu0 %v2920_v59  ;;  %v3001_v58 = vld [vmem:[%s4505_s3 + $0x1ec] ss:$24 sps:$4 sm:$0xff]   ;;  %v2996_v59 = vld [vmem:[%s4505_s3 + $0x7e0] ss:$24 sps:$4 sm:$0xff]  }
  0x37   :  { %1797 = vmatpush1.bf16.msra.mxu1 %v2922_v60  ;;  %v2999_v60 = vld [vmem:[%s4505_s3 + $0x1e8] ss:$24 sps:$4 sm:$0xff]  }
  0x38   :  { %1840 = vmatpush1.bf16.msra.mxu0 %v2923_v61  ;;  %1798 = vmatprep.subr.bf16.mxu1 %v2924_v62  ;;  %v3004_v61 = vld [vmem:[%s4505_s3 + $0x814] ss:$24 sps:$4 sm:$0xff]  }
  0x39   :  { %1841 = vmatprep.subr.bf16.mxu0 %v2926_v63  ;;  %v3007_v62 = vld [vmem:[%s4505_s3 + $0x21c] ss:$24 sps:$4 sm:$0xff]   ;;  %v3002_v63 = vld [vmem:[%s4505_s3 + $0x810] ss:$24 sps:$4 sm:$0xff]  }
  0x3b   :  { %1799 = vmatpush1.bf16.msra.mxu1 %v2928_v0  ;;  %v3005_v0 = vld [vmem:[%s4505_s3 + $0x218] ss:$24 sps:$4 sm:$0xff]  }
  0x3c   :  { %1842 = vmatpush1.bf16.msra.mxu0 %v2929_v1  ;;  %1800 = vmatprep.subr.bf16.mxu1 %v2930_v2  ;;  %v3010_v1 = vld [vmem:[%s4505_s3 + $0x844] ss:$24 sps:$4 sm:$0xff]  }
  0x3d   :  { %1843 = vmatprep.subr.bf16.mxu0 %v2932_v3  ;;  %v3013_v2 = vld [vmem:[%s4505_s3 + $0x24c] ss:$24 sps:$4 sm:$0xff]   ;;  %v3008_v3 = vld [vmem:[%s4505_s3 + $0x840] ss:$24 sps:$4 sm:$0xff]  }
  0x3f   :  { %1801 = vmatpush1.bf16.msra.mxu1 %v2934_v4  ;;  %v3011_v4 = vld [vmem:[%s4505_s3 + $0x248] ss:$24 sps:$4 sm:$0xff]  }
  0x40   :  { %1844 = vmatpush1.bf16.msra.mxu0 %v2935_v5  ;;  %1899 = vmatprep.subr.bf16.mxu1 %v2941_v11  ;;  %v3016_v5 = vld [vmem:[%s4505_s3 + $0x874] ss:$24 sps:$4 sm:$0xff]   ;;  %v3020_v11 = vld [vmem:[%s4505_s3 + $0x8a0] ss:$24 sps:$4 sm:$0xff]  }
  0x41   :  { %1856 = vmatprep.subr.bf16.mxu0 %v2938_v7  ;;  %v3014_v7 = vld [vmem:[%s4505_s3 + $0x870] ss:$24 sps:$4 sm:$0xff]  }
  0x42   :  { %1803 = vmatmul.mubr.bf16.vlgmr.msra.gmra.mrb[0].mxu1 %v3584_v14 }
  0x43   :  { %1846 = vmatmul.mubr.bf16.vlgmr.msra.gmra.mrb[0].mxu0 %v3586_v15  ;;  %1900 = vmatpush1.bf16.msra.mxu1 %v2939_v13  ;;  %v3028_v13 = vld [vmem:[%s4505_s3 + $0x8d4] ss:$24 sps:$4 sm:$0xff]  }
  0x44   :  { %1857 = vmatpush1.bf16.msra.mxu0 %v2936_v12  ;;  %1901 = vmatprep.subr.bf16.mxu1 %v2947_v17  ;;  %v3023_v12 = vld [vmem:[%s4505_s3 + $0x2a8] ss:$24 sps:$4 sm:$0xff]  }
  0x45   :  { %1858 = vmatprep.subr.bf16.mxu0 %v2944_v16  ;;  %1931 = vmatprep.mubr.bf16.mxu1 %v3509_v53  ;;  %v3031_v16 = vld [vmem:[%s4505_s3 + $0x2dc] ss:$24 sps:$4 sm:$0xff]   ;;  %v3026_v17 = vld [vmem:[%s4505_s3 + $0x8d0] ss:$24 sps:$4 sm:$0xff]  }
  0x46   :  { %1888 = vmatprep.mubr.bf16.mxu0 %v3675_v44 }
  0x47   :  { %1902 = vmatpush1.bf16.msra.mxu1 %v2945_v19  ;;  %v28_v19 = vld [vmem:[%s4502_s0 + $0x20] sm:$0xff] }
  0x48   :  { %1859 = vmatpush1.bf16.msra.mxu0 %v2942_v18  ;;  %1903 = vmatprep.subr.bf16.mxu1 %v2953_v21  ;;  %v3029_v18 = vld [vmem:[%s4505_s3 + $0x2d8] ss:$24 sps:$4 sm:$0xff]   ;;  %v3034_v21 = vld [vmem:[%s4505_s3 + $0x30c] ss:$24 sps:$4 sm:$0xff]  }
  0x49   :  { %1860 = vmatprep.subr.bf16.mxu0 %v2950_v20  ;;  %v34_v20 = vld [vmem:[%s4502_s0 + $0x50] sm:$0xff] }
  0x4b   :  { %1904 = vmatpush1.bf16.msra.mxu1 %v2951_v23  ;;  %v3792_v23 = vpack.c.bf16 %v34_v20, %v28_v19  ;;  %v3121_v19 = vld [vmem:[%s4505_s3 + $0x2b4] ss:$24 sps:$4 sm:$0xff]   ;;  %v3116_v20 = vld [vmem:[%s4505_s3 + $0x5a8] ss:$24 sps:$4 sm:$0xff]  }
  0x4c   :  { %1861 = vmatpush1.bf16.msra.mxu0 %v2948_v22  ;;  %1905 = vmatprep.subr.bf16.mxu1 %v2959_v25  ;;  %v3037_v22 = vld [vmem:[%s4505_s3 + $0x14] ss:$24 sps:$4 sm:$0xff]   ;;  %v3035_v25 = vld [vmem:[%s4505_s3 + $0x10] ss:$24 sps:$4 sm:$0xff]  }
  0x4d   :  { %1862 = vmatprep.subr.bf16.mxu0 %v2956_v24  ;;  %v3032_v24 = vld [vmem:[%s4505_s3 + $0x308] ss:$24 sps:$4 sm:$0xff]  }
  0x4f   :  { %1906 = vmatpush1.bf16.msra.mxu1 %v2957_v27  ;;  %v3043_v27 = vld [vmem:[%s4505_s3 + $0x44] ss:$24 sps:$4 sm:$0xff]  }
  0x50   :  { %1863 = vmatpush1.bf16.msra.mxu0 %v2954_v26  ;;  %1907 = vmatprep.subr.bf16.mxu1 %v2965_v29  ;;  %v3040_v26 = vld [vmem:[%s4505_s3 + $0x33c] ss:$24 sps:$4 sm:$0xff]   ;;  %v3041_v29 = vld [vmem:[%s4505_s3 + $0x40] ss:$24 sps:$4 sm:$0xff]  }
  0x51   :  { %1864 = vmatprep.subr.bf16.mxu0 %v2962_v28  ;;  %v3038_v28 = vld [vmem:[%s4505_s3 + $0x338] ss:$24 sps:$4 sm:$0xff]  }
  0x53   :  { %1908 = vmatpush1.bf16.msra.mxu1 %v2963_v31  ;;  %v3049_v31 = vld [vmem:[%s4505_s3 + $0x74] ss:$24 sps:$4 sm:$0xff]  }
  0x54   :  { %1865 = vmatpush1.bf16.msra.mxu0 %v2960_v30  ;;  %1909 = vmatprep.subr.bf16.mxu1 %v2971_v33  ;;  %v3046_v30 = vld [vmem:[%s4505_s3 + $0x36c] ss:$24 sps:$4 sm:$0xff]   ;;  %v3047_v33 = vld [vmem:[%s4505_s3 + $0x70] ss:$24 sps:$4 sm:$0xff]  }
  0x55   :  { %1866 = vmatprep.subr.bf16.mxu0 %v2968_v32  ;;  %v3044_v32 = vld [vmem:[%s4505_s3 + $0x368] ss:$24 sps:$4 sm:$0xff]  }
  0x57   :  { %1910 = vmatpush1.bf16.msra.mxu1 %v2969_v35  ;;  %v3050_v35 = vld [vmem:[%s4505_s3 + $0x398] ss:$24 sps:$4 sm:$0xff]  }
  0x58   :  { %1867 = vmatpush1.bf16.msra.mxu0 %v2966_v34  ;;  %1911 = vmatprep.subr.bf16.mxu1 %v2977_v37  ;;  %v3052_v34 = vld [vmem:[%s4505_s3 + $0x39c] ss:$24 sps:$4 sm:$0xff]   ;;  %v3058_v37 = vld [vmem:[%s4505_s3 + $0x3cc] ss:$24 sps:$4 sm:$0xff]  }
  0x59   :  { %1868 = vmatprep.subr.bf16.mxu0 %v2974_v36  ;;  %v3053_v36 = vld [vmem:[%s4505_s3 + $0xa0] ss:$24 sps:$4 sm:$0xff]  }
  0x5b   :  { %1912 = vmatpush1.bf16.msra.mxu1 %v2975_v39  ;;  %v3056_v39 = vld [vmem:[%s4505_s3 + $0x3c8] ss:$24 sps:$4 sm:$0xff]  }
  0x5c   :  { %1869 = vmatpush1.bf16.msra.mxu0 %v2972_v38  ;;  %1913 = vmatprep.subr.bf16.mxu1 %v2983_v43  ;;  %v3061_v38 = vld [vmem:[%s4505_s3 + $0xd4] ss:$24 sps:$4 sm:$0xff]   ;;  %v3062_v43 = vld [vmem:[%s4505_s3 + $0x3f8] ss:$24 sps:$4 sm:$0xff]  }
  0x5d   :  { %1870 = vmatprep.subr.bf16.mxu0 %v2980_v40  ;;  %v3059_v40 = vld [vmem:[%s4505_s3 + $0xd0] ss:$24 sps:$4 sm:$0xff]  }
  0x5f   :  { %1914 = vmatpush1.bf16.msra.mxu1 %v2981_v46  ;;  %v3070_v46 = vld [vmem:[%s4505_s3 + $0x42c] ss:$24 sps:$4 sm:$0xff]  }
  0x60   :  { %1871 = vmatpush1.bf16.msra.mxu0 %v2978_v45  ;;  %1915 = vmatprep.subr.bf16.mxu1 %v2989_v48  ;;  %v3065_v45 = vld [vmem:[%s4505_s3 + $0x100] ss:$24 sps:$4 sm:$0xff]  }
  0x61   :  { %1872 = vmatprep.subr.bf16.mxu0 %v2986_v47  ;;  %v3073_v47 = vld [vmem:[%s4505_s3 + $0x134] ss:$24 sps:$4 sm:$0xff]   ;;  %v3068_v48 = vld [vmem:[%s4505_s3 + $0x428] ss:$24 sps:$4 sm:$0xff]  }
  0x63   :  { %1916 = vmatpush1.bf16.msra.mxu1 %v2987_v50  ;;  %v3076_v50 = vld [vmem:[%s4505_s3 + $0x45c] ss:$24 sps:$4 sm:$0xff]  }
  0x64   :  { %1873 = vmatpush1.bf16.msra.mxu0 %v2984_v49  ;;  %1917 = vmatprep.subr.bf16.mxu1 %v2995_v52  ;;  %v3071_v49 = vld [vmem:[%s4505_s3 + $0x130] ss:$24 sps:$4 sm:$0xff]  }
  0x65   :  { %1874 = vmatprep.subr.bf16.mxu0 %v2992_v51  ;;  %v3079_v51 = vld [vmem:[%s4505_s3 + $0x164] ss:$24 sps:$4 sm:$0xff]   ;;  %v3074_v52 = vld [vmem:[%s4505_s3 + $0x458] ss:$24 sps:$4 sm:$0xff]  }
  0x67   :  { %1918 = vmatpush1.bf16.msra.mxu1 %v2993_v56  ;;  %v3082_v56 = vld [vmem:[%s4505_s3 + $0x48c] ss:$24 sps:$4 sm:$0xff]  }
  0x68   :  { %1875 = vmatpush1.bf16.msra.mxu0 %v2990_v55  ;;  %1919 = vmatprep.subr.bf16.mxu1 %v3001_v58  ;;  %v3077_v55 = vld [vmem:[%s4505_s3 + $0x160] ss:$24 sps:$4 sm:$0xff]  }
  0x69   :  { %1876 = vmatprep.subr.bf16.mxu0 %v2998_v57  ;;  %v3085_v57 = vld [vmem:[%s4505_s3 + $0x194] ss:$24 sps:$4 sm:$0xff]   ;;  %v3080_v58 = vld [vmem:[%s4505_s3 + $0x488] ss:$24 sps:$4 sm:$0xff]  }
  0x6b   :  { %1920 = vmatpush1.bf16.msra.mxu1 %v2999_v60  ;;  %v3088_v60 = vld [vmem:[%s4505_s3 + $0x4bc] ss:$24 sps:$4 sm:$0xff]  }
  0x6c   :  { %1877 = vmatpush1.bf16.msra.mxu0 %v2996_v59  ;;  %1921 = vmatprep.subr.bf16.mxu1 %v3007_v62  ;;  %v3083_v59 = vld [vmem:[%s4505_s3 + $0x190] ss:$24 sps:$4 sm:$0xff]  }
  0x6d   :  { %1878 = vmatprep.subr.bf16.mxu0 %v3004_v61  ;;  %v3091_v61 = vld [vmem:[%s4505_s3 + $0x1c4] ss:$24 sps:$4 sm:$0xff]   ;;  %v3086_v62 = vld [vmem:[%s4505_s3 + $0x4b8] ss:$24 sps:$4 sm:$0xff]  }
  0x6f   :  { %1922 = vmatpush1.bf16.msra.mxu1 %v3005_v0  ;;  %v3094_v0 = vld [vmem:[%s4505_s3 + $0x4ec] ss:$24 sps:$4 sm:$0xff]  }
  0x70   :  { %1879 = vmatpush1.bf16.msra.mxu0 %v3002_v63  ;;  %1923 = vmatprep.subr.bf16.mxu1 %v3013_v2  ;;  %v3089_v63 = vld [vmem:[%s4505_s3 + $0x1c0] ss:$24 sps:$4 sm:$0xff]  }
  0x71   :  { %1880 = vmatprep.subr.bf16.mxu0 %v3010_v1  ;;  %v3097_v1 = vld [vmem:[%s4505_s3 + $0x1f4] ss:$24 sps:$4 sm:$0xff]   ;;  %v3092_v2 = vld [vmem:[%s4505_s3 + $0x4e8] ss:$24 sps:$4 sm:$0xff]  }
  0x73   :  { %1924 = vmatpush1.bf16.msra.mxu1 %v3011_v4  ;;  %v3100_v4 = vld [vmem:[%s4505_s3 + $0x51c] ss:$24 sps:$4 sm:$0xff]  }
  0x74   :  { %1881 = vmatpush1.bf16.msra.mxu0 %v3008_v3  ;;  %1925 = vmatprep.subr.bf16.mxu1 %v3019_v6  ;;  %v3095_v3 = vld [vmem:[%s4505_s3 + $0x1f0] ss:$24 sps:$4 sm:$0xff]  }
  0x75   :  { %1882 = vmatprep.subr.bf16.mxu0 %v3016_v5  ;;  %v3103_v5 = vld [vmem:[%s4505_s3 + $0x224] ss:$24 sps:$4 sm:$0xff]   ;;  %v3098_v6 = vld [vmem:[%s4505_s3 + $0x518] ss:$24 sps:$4 sm:$0xff]  }
  0x77   :  { %1926 = vmatpush1.bf16.msra.mxu1 %v3017_v8  ;;  %v3106_v8 = vld [vmem:[%s4505_s3 + $0x54c] ss:$24 sps:$4 sm:$0xff]  }
  0x78   :  { %1883 = vmatpush1.bf16.msra.mxu0 %v3014_v7  ;;  %1927 = vmatprep.subr.bf16.mxu1 %v3025_v10  ;;  %v3101_v7 = vld [vmem:[%s4505_s3 + $0x220] ss:$24 sps:$4 sm:$0xff]  }
  0x79   :  { %1884 = vmatprep.subr.bf16.mxu0 %v3022_v9  ;;  %v3109_v9 = vld [vmem:[%s4505_s3 + $0x254] ss:$24 sps:$4 sm:$0xff]   ;;  %v3104_v10 = vld [vmem:[%s4505_s3 + $0x548] ss:$24 sps:$4 sm:$0xff]  }
  0x7b   :  { %1928 = vmatpush1.bf16.msra.mxu1 %v3023_v12  ;;  %v3112_v12 = vld [vmem:[%s4505_s3 + $0x57c] ss:$24 sps:$4 sm:$0xff]  }
  0x7c   :  { %1885 = vmatpush1.bf16.msra.mxu0 %v3020_v11  ;;  %1929 = vmatprep.subr.bf16.mxu1 %v3031_v16  ;;  %v3107_v11 = vld [vmem:[%s4505_s3 + $0x250] ss:$24 sps:$4 sm:$0xff]  }
  0x7d   :  { %1886 = vmatprep.subr.bf16.mxu0 %v3028_v13  ;;  %v3115_v13 = vld [vmem:[%s4505_s3 + $0x284] ss:$24 sps:$4 sm:$0xff]   ;;  %v3110_v16 = vld [vmem:[%s4505_s3 + $0x578] ss:$24 sps:$4 sm:$0xff]  }
  0x7f   :  { %1930 = vmatpush1.bf16.msra.mxu1 %v3029_v18  ;;  %v3118_v18 = vld [vmem:[%s4505_s3 + $0x5ac] ss:$24 sps:$4 sm:$0xff]  }
  0x80   :  { %1887 = vmatpush1.bf16.msra.mxu0 %v3026_v17  ;;  %1942 = vmatprep.subr.bf16.mxu1 %v3034_v21  ;;  %v3113_v17 = vld [vmem:[%s4505_s3 + $0x280] ss:$24 sps:$4 sm:$0xff]   ;;  %v3119_v21 = vld [vmem:[%s4505_s3 + $0x2b0] ss:$24 sps:$4 sm:$0xff]  }
  0x81   :  { %2028 = vmatprep.subr.bf16.mxu0 %v3037_v22  ;;  %v3124_v22 = vld [vmem:[%s4505_s3 + $0x5dc] ss:$24 sps:$4 sm:$0xff]  }
  0x82   :  { %1932 = vmatmul.mubr.bf16.vlgmr.msra.gmra.mrb[4].mxu1 %v3584_v14 }
  0x83   :  { %1889 = vmatmul.mubr.bf16.vlgmr.msra.gmra.mrb[0].mxu0 %v3792_v23  ;;  %1943 = vmatpush1.bf16.msra.mxu1 %v3032_v24  ;;  %v3127_v24 = vld [vmem:[%s4505_s3 + $0x2e4] ss:$24 sps:$4 sm:$0xff]  }
  0x84   :  { %2029 = vmatpush1.bf16.msra.mxu0 %v3035_v25  ;;  %1944 = vmatprep.subr.bf16.mxu1 %v3040_v26  ;;  %v3122_v25 = vld [vmem:[%s4505_s3 + $0x5d8] ss:$24 sps:$4 sm:$0xff]  }
  0x85   :  { %2030 = vmatprep.subr.bf16.mxu0 %v3043_v27  ;;  %1974 = vmatprep.mubr.bf16.mxu1 %v3511_v54  ;;  %v3125_v26 = vld [vmem:[%s4505_s3 + $0x2e0] ss:$24 sps:$4 sm:$0xff]   ;;  %v3130_v27 = vld [vmem:[%s4505_s3 + $0x60c] ss:$24 sps:$4 sm:$0xff]  }
  0x86   :  { %2060 = vmatprep.mubr.bf16.mxu0 %v3509_v53  ;;  %v3055_v53 = vld [vmem:[%s4505_s3 + $0xa4] ss:$24 sps:$4 sm:$0xff]  }
  0x87   :  { %1945 = vmatpush1.bf16.msra.mxu1 %v3038_v28  ;;  %v3133_v28 = vld [vmem:[%s4505_s3 + $0x314] ss:$24 sps:$4 sm:$0xff]  }
  0x88   :  { %2031 = vmatpush1.bf16.msra.mxu0 %v3041_v29  ;;  %1946 = vmatprep.subr.bf16.mxu1 %v3046_v30  ;;  %v3128_v29 = vld [vmem:[%s4505_s3 + $0x608] ss:$24 sps:$4 sm:$0xff]  }
  0x89   :  { %2032 = vmatprep.subr.bf16.mxu0 %v3049_v31  ;;  %v3131_v30 = vld [vmem:[%s4505_s3 + $0x310] ss:$24 sps:$4 sm:$0xff]   ;;  %v3136_v31 = vld [vmem:[%s4505_s3 + $0x63c] ss:$24 sps:$4 sm:$0xff]  }
  0x8b   :  { %1947 = vmatpush1.bf16.msra.mxu1 %v3044_v32  ;;  %v3139_v32 = vld [vmem:[%s4505_s3 + $0x344] ss:$24 sps:$4 sm:$0xff]  }
  0x8c   :  { %2033 = vmatpush1.bf16.msra.mxu0 %v3047_v33  ;;  %1948 = vmatprep.subr.bf16.mxu1 %v3052_v34  ;;  %v3134_v33 = vld [vmem:[%s4505_s3 + $0x638] ss:$24 sps:$4 sm:$0xff]  }
  0x8d   :  { %2034 = vmatprep.subr.bf16.mxu0 %v3055_v53  ;;  %v3137_v34 = vld [vmem:[%s4505_s3 + $0x340] ss:$24 sps:$4 sm:$0xff]  }
  0x8f   :  { %1949 = vmatpush1.bf16.msra.mxu1 %v3050_v35 }
  0x90   :  { %2035 = vmatpush1.bf16.msra.mxu0 %v3053_v36  ;;  %1950 = vmatprep.subr.bf16.mxu1 %v3058_v37 }
  0x91   :  { %2036 = vmatprep.subr.bf16.mxu0 %v3061_v38 }
  0x93   :  { %1951 = vmatpush1.bf16.msra.mxu1 %v3056_v39 }
  0x94   :  { %2037 = vmatpush1.bf16.msra.mxu0 %v3059_v40  ;;  %1952 = vmatprep.subr.bf16.mxu1 %v3064_v41 }
  0x95   :  { %2038 = vmatprep.subr.bf16.mxu0 %v3067_v42 }
  0x97   :  { %1953 = vmatpush1.bf16.msra.mxu1 %v3062_v43 }
  0x98   :  { %2039 = vmatpush1.bf16.msra.mxu0 %v3065_v45  ;;  %1954 = vmatprep.subr.bf16.mxu1 %v3070_v46 }
  0x99   :  { %2040 = vmatprep.subr.bf16.mxu0 %v3073_v47 }
  0x9b   :  { %1955 = vmatpush1.bf16.msra.mxu1 %v3068_v48 }
  0x9c   :  { %2041 = vmatpush1.bf16.msra.mxu0 %v3071_v49  ;;  %1956 = vmatprep.subr.bf16.mxu1 %v3076_v50 }
  0x9d   :  { %2042 = vmatprep.subr.bf16.mxu0 %v3079_v51 }
  0x9f   :  { %1957 = vmatpush1.bf16.msra.mxu1 %v3074_v52 }
  0xa0   :  { %2043 = vmatpush1.bf16.msra.mxu0 %v3077_v55  ;;  %1958 = vmatprep.subr.bf16.mxu1 %v3082_v56 }
  0xa1   :  { %2044 = vmatprep.subr.bf16.mxu0 %v3085_v57 }
  0xa3   :  { %1959 = vmatpush1.bf16.msra.mxu1 %v3080_v58 }
  0xa4   :  { %2045 = vmatpush1.bf16.msra.mxu0 %v3083_v59  ;;  %1960 = vmatprep.subr.bf16.mxu1 %v3088_v60 }
  0xa5   :  { %2046 = vmatprep.subr.bf16.mxu0 %v3091_v61 }
  0xa7   :  { %1961 = vmatpush1.bf16.msra.mxu1 %v3086_v62 }
  0xa8   :  { %2047 = vmatpush1.bf16.msra.mxu0 %v3089_v63  ;;  %1962 = vmatprep.subr.bf16.mxu1 %v3094_v0 }
  0xa9   :  { %2048 = vmatprep.subr.bf16.mxu0 %v3097_v1 }
  0xab   :  { %1963 = vmatpush1.bf16.msra.mxu1 %v3092_v2 }
  0xac   :  { %2049 = vmatpush1.bf16.msra.mxu0 %v3095_v3  ;;  %1964 = vmatprep.subr.bf16.mxu1 %v3100_v4 }
  0xad   :  { %2050 = vmatprep.subr.bf16.mxu0 %v3103_v5 }
  0xaf   :  { %1965 = vmatpush1.bf16.msra.mxu1 %v3098_v6 }
  0xb0   :  { %2051 = vmatpush1.bf16.msra.mxu0 %v3101_v7  ;;  %1966 = vmatprep.subr.bf16.mxu1 %v3106_v8 }
  0xb1   :  { %2052 = vmatprep.subr.bf16.mxu0 %v3109_v9 }
  0xb3   :  { %1967 = vmatpush1.bf16.msra.mxu1 %v3104_v10 }
  0xb4   :  { %2053 = vmatpush1.bf16.msra.mxu0 %v3107_v11  ;;  %1968 = vmatprep.subr.bf16.mxu1 %v3112_v12 }
  0xb5   :  { %2054 = vmatprep.subr.bf16.mxu0 %v3115_v13 }
  0xb7   :  { %1969 = vmatpush1.bf16.msra.mxu1 %v3110_v16 }
  0xb8   :  { %2055 = vmatpush1.bf16.msra.mxu0 %v3113_v17  ;;  %1970 = vmatprep.subr.bf16.mxu1 %v3118_v18 }
  0xb9   :  { %2056 = vmatprep.subr.bf16.mxu0 %v3121_v19 }
  0xbb   :  { %1971 = vmatpush1.bf16.msra.mxu1 %v3116_v20 }
  0xbc   :  { %2057 = vmatpush1.bf16.msra.mxu0 %v3119_v21  ;;  %1972 = vmatprep.subr.bf16.mxu1 %v3124_v22 }
  0xbd   :  { %2058 = vmatprep.subr.bf16.mxu0 %v3127_v24 }
  0xbf   :  { %1973 = vmatpush1.bf16.msra.mxu1 %v3122_v25 }
  0xc0   :  { %2059 = vmatpush1.bf16.msra.mxu0 %v3125_v26  ;;  %1985 = vmatprep.subr.bf16.mxu1 %v3130_v27 }
  0xc1   :  { %2071 = vmatprep.subr.bf16.mxu0 %v3133_v28 }
  0xc2   :  { %1975 = vmatmul.mubr.bf16.vlgmr.msra.gmra.mrb[4].mxu1 %v3586_v15 }
  0xc3   :  { %2061 = vmatmul.mubr.bf16.vlgmr.msra.gmra.mrb[4].mxu0 %v3584_v14  ;;  %1986 = vmatpush1.bf16.msra.mxu1 %v3128_v29 }
  0xc4   :  { %2072 = vmatpush1.bf16.msra.mxu0 %v3131_v30 }
  0xc5   :  { %11 = vsyncpa [#allocation3], 0  ;;  %1987 = vmatprep.subr.bf16.mxu1 %v3136_v31  ;;  %2073 = vmatprep.subr.bf16.mxu0 %v3139_v32  ;;  %v3142_v53 = vld [vmem:[%s4505_s3 + $0x66c] ss:$24 sps:$4 sm:$0xff]   ;;  %v3140_v35 = vld [vmem:[%s4505_s3 + $0x668] ss:$24 sps:$4 sm:$0xff]  }
  0xc6   :  { %v3145_v14 = vld [vmem:[%s4505_s3 + $0x374] ss:$24 sps:$4 sm:$0xff]   ;;  %2017 = vmatprep.mubr.bf16.mxu1 %v3675_v44  ;;  %2103 = vmatprep.mubr.bf16.mxu0 %v3511_v54  ;;  %v3143_v36 = vld [vmem:[%s4505_s3 + $0x370] ss:$24 sps:$4 sm:$0xff]   ;;  %v3151_v54 = vld [vmem:[%s4505_s3 + $0x3a4] ss:$24 sps:$4 sm:$0xff]  }
  0xc7   :  { %1988 = vmatpush1.bf16.msra.mxu1 %v3134_v33  ;;  %v3148_v37 = vld [vmem:[%s4505_s3 + $0x69c] ss:$24 sps:$4 sm:$0xff]   ;;  %v3146_v38 = vld [vmem:[%s4505_s3 + $0x698] ss:$24 sps:$4 sm:$0xff]   ;;  %v3154_v40 = vld [vmem:[%s4505_s3 + $0x6cc] ss:$24 sps:$4 sm:$0xff]  }
  0xc8   :  { %2074 = vmatpush1.bf16.msra.mxu0 %v3137_v34  ;;  %1989 = vmatprep.subr.bf16.mxu1 %v3142_v53  ;;  %v3149_v39 = vld [vmem:[%s4505_s3 + $0x3a0] ss:$24 sps:$4 sm:$0xff]   ;;  %v3157_v41 = vld [vmem:[%s4505_s3 + $0x3d4] ss:$24 sps:$4 sm:$0xff]   ;;  %v3155_v43 = vld [vmem:[%s4505_s3 + $0x3d0] ss:$24 sps:$4 sm:$0xff]  }
  0xc9   :  { %2075 = vmatprep.subr.bf16.mxu0 %v3145_v14  ;;  %v3152_v42 = vld [vmem:[%s4505_s3 + $0x6c8] ss:$24 sps:$4 sm:$0xff]   ;;  %v3160_v45 = vld [vmem:[%s4505_s3 + $0x6fc] ss:$24 sps:$4 sm:$0xff]   ;;  %v3158_v47 = vld [vmem:[%s4505_s3 + $0x6f8] ss:$24 sps:$4 sm:$0xff]  }
  0xca   :  { %v3163_v46 = vld [vmem:[%s4505_s3 + $0x404] ss:$24 sps:$4 sm:$0xff]   ;;  %v3161_v48 = vld [vmem:[%s4505_s3 + $0x400] ss:$24 sps:$4 sm:$0xff]   ;;  %v3169_v50 = vld [vmem:[%s4505_s3 + $0x434] ss:$24 sps:$4 sm:$0xff]  }
  0xcb   :  { %1990 = vmatpush1.bf16.msra.mxu1 %v3140_v35  ;;  %v3166_v49 = vld [vmem:[%s4505_s3 + $0x72c] ss:$24 sps:$4 sm:$0xff]   ;;  %v3164_v51 = vld [vmem:[%s4505_s3 + $0x728] ss:$24 sps:$4 sm:$0xff]   ;;  %v3172_v55 = vld [vmem:[%s4505_s3 + $0x75c] ss:$24 sps:$4 sm:$0xff]  }
  0xcc   :  { %2076 = vmatpush1.bf16.msra.mxu0 %v3143_v36  ;;  %1991 = vmatprep.subr.bf16.mxu1 %v3148_v37  ;;  %v3167_v52 = vld [vmem:[%s4505_s3 + $0x430] ss:$24 sps:$4 sm:$0xff]   ;;  %v3175_v56 = vld [vmem:[%s4505_s3 + $0x464] ss:$24 sps:$4 sm:$0xff]   ;;  %v3173_v58 = vld [vmem:[%s4505_s3 + $0x460] ss:$24 sps:$4 sm:$0xff]  }
  0xcd   :  { %2077 = vmatprep.subr.bf16.mxu0 %v3151_v54  ;;  %v3170_v57 = vld [vmem:[%s4505_s3 + $0x758] ss:$24 sps:$4 sm:$0xff]   ;;  %v3178_v59 = vld [vmem:[%s4505_s3 + $0x78c] ss:$24 sps:$4 sm:$0xff]   ;;  %v3176_v61 = vld [vmem:[%s4505_s3 + $0x788] ss:$24 sps:$4 sm:$0xff]  }
  0xce   :  { %v3181_v60 = vld [vmem:[%s4505_s3 + $0x494] ss:$24 sps:$4 sm:$0xff]   ;;  %v3179_v62 = vld [vmem:[%s4505_s3 + $0x490] ss:$24 sps:$4 sm:$0xff]   ;;  %v3187_v0 = vld [vmem:[%s4505_s3 + $0x4c4] ss:$24 sps:$4 sm:$0xff]  }
  0xcf   :  { %1992 = vmatpush1.bf16.msra.mxu1 %v3146_v38  ;;  %v3184_v63 = vld [vmem:[%s4505_s3 + $0x7bc] ss:$24 sps:$4 sm:$0xff]   ;;  %v3182_v1 = vld [vmem:[%s4505_s3 + $0x7b8] ss:$24 sps:$4 sm:$0xff]   ;;  %v3190_v3 = vld [vmem:[%s4505_s3 + $0x7ec] ss:$24 sps:$4 sm:$0xff]  }
  0xd0   :  { %2078 = vmatpush1.bf16.msra.mxu0 %v3149_v39  ;;  %1993 = vmatprep.subr.bf16.mxu1 %v3154_v40  ;;  %v3185_v2 = vld [vmem:[%s4505_s3 + $0x4c0] ss:$24 sps:$4 sm:$0xff]   ;;  %v3193_v4 = vld [vmem:[%s4505_s3 + $0x4f4] ss:$24 sps:$4 sm:$0xff]   ;;  %v3191_v6 = vld [vmem:[%s4505_s3 + $0x4f0] ss:$24 sps:$4 sm:$0xff]  }
  0xd1   :  { %2079 = vmatprep.subr.bf16.mxu0 %v3157_v41  ;;  %v3188_v5 = vld [vmem:[%s4505_s3 + $0x7e8] ss:$24 sps:$4 sm:$0xff]   ;;  %v3196_v7 = vld [vmem:[%s4505_s3 + $0x81c] ss:$24 sps:$4 sm:$0xff]   ;;  %v3194_v9 = vld [vmem:[%s4505_s3 + $0x818] ss:$24 sps:$4 sm:$0xff]  }
  0xd2   :  { %v3199_v8 = vld [vmem:[%s4505_s3 + $0x524] ss:$24 sps:$4 sm:$0xff]   ;;  %v3197_v10 = vld [vmem:[%s4505_s3 + $0x520] ss:$24 sps:$4 sm:$0xff]   ;;  %v3205_v12 = vld [vmem:[%s4505_s3 + $0x554] ss:$24 sps:$4 sm:$0xff]  }
  0xd3   :  { %1994 = vmatpush1.bf16.msra.mxu1 %v3152_v42  ;;  %v3202_v11 = vld [vmem:[%s4505_s3 + $0x84c] ss:$24 sps:$4 sm:$0xff]   ;;  %v3200_v13 = vld [vmem:[%s4505_s3 + $0x848] ss:$24 sps:$4 sm:$0xff]   ;;  %v3208_v17 = vld [vmem:[%s4505_s3 + $0x87c] ss:$24 sps:$4 sm:$0xff]  }
  0xd4   :  { %2080 = vmatpush1.bf16.msra.mxu0 %v3155_v43  ;;  %1995 = vmatprep.subr.bf16.mxu1 %v3160_v45  ;;  %v3203_v16 = vld [vmem:[%s4505_s3 + $0x550] ss:$24 sps:$4 sm:$0xff]   ;;  %v3211_v18 = vld [vmem:[%s4505_s3 + $0x584] ss:$24 sps:$4 sm:$0xff]   ;;  %v3209_v20 = vld [vmem:[%s4505_s3 + $0x580] ss:$24 sps:$4 sm:$0xff]  }
  0xd5   :  { %2081 = vmatprep.subr.bf16.mxu0 %v3163_v46  ;;  %v3206_v19 = vld [vmem:[%s4505_s3 + $0x878] ss:$24 sps:$4 sm:$0xff]   ;;  %v3214_v21 = vld [vmem:[%s4505_s3 + $0x8ac] ss:$24 sps:$4 sm:$0xff]   ;;  %v3212_v24 = vld [vmem:[%s4505_s3 + $0x8a8] ss:$24 sps:$4 sm:$0xff]  }
  0xd6   :  { %v3217_v22 = vld [vmem:[%s4505_s3 + $0x5b4] ss:$24 sps:$4 sm:$0xff]   ;;  %v3215_v25 = vld [vmem:[%s4505_s3 + $0x5b0] ss:$24 sps:$4 sm:$0xff]   ;;  %v3223_v27 = vld [vmem:[%s4505_s3 + $0x5e4] ss:$24 sps:$4 sm:$0xff]  }
  0xd7   :  { %1996 = vmatpush1.bf16.msra.mxu1 %v3158_v47  ;;  %v3220_v26 = vld [vmem:[%s4505_s3 + $0x8dc] ss:$24 sps:$4 sm:$0xff]   ;;  %v3218_v28 = vld [vmem:[%s4505_s3 + $0x8d8] ss:$24 sps:$4 sm:$0xff]  }
  0xd8   :  { %2082 = vmatpush1.bf16.msra.mxu0 %v3161_v48  ;;  %1997 = vmatprep.subr.bf16.mxu1 %v3166_v49  ;;  %v3221_v29 = vld [vmem:[%s4505_s3 + $0x5e0] ss:$24 sps:$4 sm:$0xff]   ;;  %v3226_v30 = vld [vmem:[%s4505_s3 + $0x614] ss:$24 sps:$4 sm:$0xff]   ;;  %v3224_v31 = vld [vmem:[%s4505_s3 + $0x610] ss:$24 sps:$4 sm:$0xff]  }
  0xd9   :  { %2083 = vmatprep.subr.bf16.mxu0 %v3169_v50  ;;  %v3229_v32 = vld [vmem:[%s4505_s3 + $0x644] ss:$24 sps:$4 sm:$0xff]   ;;  %v3227_v33 = vld [vmem:[%s4505_s3 + $0x640] ss:$24 sps:$4 sm:$0xff]   ;;  %v3232_v34 = vld [vmem:[%s4505_s3 + $0x674] ss:$24 sps:$4 sm:$0xff]  }
  0xda   :  { %v3230_v53 = vld [vmem:[%s4505_s3 + $0x670] ss:$24 sps:$4 sm:$0xff]   ;;  %v3238_v14 = vld [vmem:[%s4505_s3 + $0x6d4] ss:$24 sps:$4 sm:$0xff]   ;;  %v3241_v36 = vld [vmem:[%s4505_s3 + $0x704] ss:$24 sps:$4 sm:$0xff]  }
  0xdb   :  { %1998 = vmatpush1.bf16.msra.mxu1 %v3164_v51  ;;  %v3236_v35 = vld [vmem:[%s4505_s3 + $0x6d0] ss:$24 sps:$4 sm:$0xff]   ;;  %v3239_v37 = vld [vmem:[%s4505_s3 + $0x700] ss:$24 sps:$4 sm:$0xff]   ;;  %v3244_v54 = vld [vmem:[%s4505_s3 + $0x734] ss:$24 sps:$4 sm:$0xff]  }
  0xdc   :  { %2084 = vmatpush1.bf16.msra.mxu0 %v3167_v52  ;;  %1999 = vmatprep.subr.bf16.mxu1 %v3172_v55  ;;  %v3242_v40 = vld [vmem:[%s4505_s3 + $0x730] ss:$24 sps:$4 sm:$0xff]   ;;  %v3247_v42 = vld [vmem:[%s4505_s3 + $0x764] ss:$24 sps:$4 sm:$0xff]   ;;  %v3245_v45 = vld [vmem:[%s4505_s3 + $0x760] ss:$24 sps:$4 sm:$0xff]  }
  0xdd   :  { %2085 = vmatprep.subr.bf16.mxu0 %v3175_v56  ;;  %v3250_v46 = vld [vmem:[%s4505_s3 + $0x794] ss:$24 sps:$4 sm:$0xff]   ;;  %v3248_v47 = vld [vmem:[%s4505_s3 + $0x790] ss:$24 sps:$4 sm:$0xff]   ;;  %v3253_v48 = vld [vmem:[%s4505_s3 + $0x7c4] ss:$24 sps:$4 sm:$0xff]  }
  0xde   :  { %v3251_v49 = vld [vmem:[%s4505_s3 + $0x7c0] ss:$24 sps:$4 sm:$0xff]   ;;  %v3256_v50 = vld [vmem:[%s4505_s3 + $0x7f4] ss:$24 sps:$4 sm:$0xff]   ;;  %v3254_v51 = vld [vmem:[%s4505_s3 + $0x7f0] ss:$24 sps:$4 sm:$0xff]  }
  0xdf   :  { %2000 = vmatpush1.bf16.msra.mxu1 %v3170_v57  ;;  %v3259_v52 = vld [vmem:[%s4505_s3 + $0x824] ss:$24 sps:$4 sm:$0xff]   ;;  %v3257_v55 = vld [vmem:[%s4505_s3 + $0x820] ss:$24 sps:$4 sm:$0xff]   ;;  %v3262_v56 = vld [vmem:[%s4505_s3 + $0x854] ss:$24 sps:$4 sm:$0xff]  }
  0xe0   :  { %2086 = vmatpush1.bf16.msra.mxu0 %v3173_v58  ;;  %2001 = vmatprep.subr.bf16.mxu1 %v3178_v59  ;;  %v3260_v57 = vld [vmem:[%s4505_s3 + $0x850] ss:$24 sps:$4 sm:$0xff]   ;;  %v3265_v58 = vld [vmem:[%s4505_s3 + $0x884] ss:$24 sps:$4 sm:$0xff]   ;;  %v3263_v59 = vld [vmem:[%s4505_s3 + $0x880] ss:$24 sps:$4 sm:$0xff]  }
  0xe1   :  { %2087 = vmatprep.subr.bf16.mxu0 %v3181_v60  ;;  %v3268_v60 = vld [vmem:[%s4505_s3 + $0x8b4] ss:$24 sps:$4 sm:$0xff]  }
  0xe3   :  { %2002 = vmatpush1.bf16.msra.mxu1 %v3176_v61  ;;  %v3266_v61 = vld [vmem:[%s4505_s3 + $0x8b0] ss:$24 sps:$4 sm:$0xff]  }
  0xe4   :  { %2088 = vmatpush1.bf16.msra.mxu0 %v3179_v62  ;;  %2003 = vmatprep.subr.bf16.mxu1 %v3184_v63  ;;  %v3271_v62 = vld [vmem:[%s4505_s3 + $0x8e4] ss:$24 sps:$4 sm:$0xff]   ;;  %v3269_v63 = vld [vmem:[%s4505_s3 + $0x8e0] ss:$24 sps:$4 sm:$0xff]  }
  0xe5   :  { %2089 = vmatprep.subr.bf16.mxu0 %v3187_v0 }
  0xe7   :  { %2004 = vmatpush1.bf16.msra.mxu1 %v3182_v1 }
  0xe8   :  { %2090 = vmatpush1.bf16.msra.mxu0 %v3185_v2  ;;  %2005 = vmatprep.subr.bf16.mxu1 %v3190_v3 }
  0xe9   :  { %2091 = vmatprep.subr.bf16.mxu0 %v3193_v4 }
  0xeb   :  { %2006 = vmatpush1.bf16.msra.mxu1 %v3188_v5 }
  0xec   :  { %2092 = vmatpush1.bf16.msra.mxu0 %v3191_v6  ;;  %2007 = vmatprep.subr.bf16.mxu1 %v3196_v7 }
  0xed   :  { %2093 = vmatprep.subr.bf16.mxu0 %v3199_v8 }
  0xef   :  { %2008 = vmatpush1.bf16.msra.mxu1 %v3194_v9 }
  0xf0   :  { %2094 = vmatpush1.bf16.msra.mxu0 %v3197_v10  ;;  %2009 = vmatprep.subr.bf16.mxu1 %v3202_v11 }
  0xf1   :  { %2095 = vmatprep.subr.bf16.mxu0 %v3205_v12  ;;  %v2161_v12 = vlaneseq }
  0xf3   :  { %2010 = vmatpush1.bf16.msra.mxu1 %v3200_v13  ;;  %v2162_v13 = vshrl.u32 %v2161_v12, 7 }
  0xf4   :  { %2096 = vmatpush1.bf16.msra.mxu0 %v3203_v16  ;;  %2011 = vmatprep.subr.bf16.mxu1 %v3208_v17 }
  0xf5   :  { %2097 = vmatprep.subr.bf16.mxu0 %v3211_v18  ;;  %v4280_v16 = vsub.s32 0, %v2162_v13  ;;  %v4282_v17 = vsub.s32 1, %v2162_v13  ;;  %v4292_v18 = vld [vmem:[%s4503_s1 + $0x6] sm:$0x3f] }
  0xf7   :  { %2012 = vmatpush1.bf16.msra.mxu1 %v3206_v19 }
  0xf8   :  { %2098 = vmatpush1.bf16.msra.mxu0 %v3209_v20  ;;  %2013 = vmatprep.subr.bf16.mxu1 %v3214_v21  ;;  %v4298_v21 = vsub.s32 2, %v2162_v13 }
  0xf9   :  { %2099 = vmatprep.subr.bf16.mxu0 %v3217_v22  ;;  %v2188_v22 = vrot.slane %v4292_v18, %v4280_v16 }
  0xfb   :  { %2014 = vmatpush1.bf16.msra.mxu1 %v3212_v24  ;;  %v2192_v24 = vrot.slane %v4292_v18, %v4282_v17 }
  0xfc   :  { %2100 = vmatpush1.bf16.msra.mxu0 %v3215_v25  ;;  %2015 = vmatprep.subr.bf16.mxu1 %v3220_v26 }
  0xfd   :  { %2101 = vmatprep.subr.bf16.mxu0 %v3223_v27  ;;  %v4307_v27 = vld [vmem:[%s4504_s2] sm:$0x3f] }
  0xff   :  { %2016 = vmatpush1.bf16.msra.mxu1 %v3218_v28 }
 0x100   :  { %2102 = vmatpush1.bf16.msra.mxu0 %v3221_v29  ;;  %v4311_v29 = vsub.s32 3, %v2162_v13 }
 0x101   :  { %2114 = vmatprep.subr.bf16.mxu0 %v3226_v30 }
 0x102   :  { %2018 = vmatmul.mubr.bf16.vlgmr.msra.gmra.mrb[4].mxu1 %v3792_v23 }
 0x103   :  { %2104 = vmatmul.mubr.bf16.vlgmr.msra.gmra.mrb[4].mxu0 %v3586_v15  ;;  %v3235_v15 = vld [vmem:[%s4505_s3 + $0x6a4] ss:$24 sps:$4 sm:$0xff]  }
 0x104   :  { %2115 = vmatpush1.bf16.msra.mxu0 %v3224_v31  ;;  %2146 = vmatprep.mubr.bf16.mxu0 %v3675_v44  ;;  %v3233_v44 = vld [vmem:[%s4505_s3 + $0x6a0] ss:$24 sps:$4 sm:$0xff]  }
 0x105   :  { %2116 = vmatprep.subr.bf16.mxu0 %v3229_v32  ;;  %v4316_v32 = vld [vmem:[%s4504_s2 + $0x6] sm:$0x3f] }
 0x108   :  { %2117 = vmatpush1.bf16.msra.mxu0 %v3227_v33  ;;  %v2196_v33 = vrot.slane %v4292_v18, %v4298_v21 }
 0x109   :  { %2118 = vmatprep.subr.bf16.mxu0 %v3232_v34 }
 0x10c   :  { %2119 = vmatpush1.bf16.msra.mxu0 %v3230_v53  ;;  %v2252_v53 = vrot.slane %v4307_v27, %v4280_v16 }
 0x10d   :  { %2120 = vmatprep.subr.bf16.mxu0 %v3235_v15 }
 0x110   :  { %2121 = vmatpush1.bf16.msra.mxu0 %v3233_v44  ;;  %v2256_v44 = vrot.slane %v4307_v27, %v4282_v17 }
 0x111   :  { %2122 = vmatprep.subr.bf16.mxu0 %v3238_v14 }
 0x114   :  { %2123 = vmatpush1.bf16.msra.mxu0 %v3236_v35 }
 0x115   :  { %2124 = vmatprep.subr.bf16.mxu0 %v3241_v36  ;;  %v1804_v38 = vpop.f32.mrb[0].mxu1 }
 0x116   :  { %v1806_v39 = vpop.f32.mrb[1].mxu1 }
 0x117   :  { %v1808_v41 = vpop.f32.mrb[2].mxu1 }
 0x118   :  { %2125 = vmatpush1.bf16.msra.mxu0 %v3239_v37  ;;  %v1810_v43 = vpop.f32.mrb[3].mxu1  ;;  %v2276_v37 = vrot.slane %v4316_v32, %v4280_v16 }
 0x119   :  { %2126 = vmatprep.subr.bf16.mxu0 %v3244_v54 }
 0x11c   :  { %2127 = vmatpush1.bf16.msra.mxu0 %v3242_v40  ;;  %v2200_v40 = vrot.slane %v4292_v18, %v4311_v29 }
 0x11d   :  { %2128 = vmatprep.subr.bf16.mxu0 %v3247_v42 }
 0x120   :  { %2129 = vmatpush1.bf16.msra.mxu0 %v3245_v45  ;;  %v2260_v45 = vrot.slane %v4307_v27, %v4298_v21 }
 0x121   :  { %2130 = vmatprep.subr.bf16.mxu0 %v3250_v46 }
 0x124   :  { %2131 = vmatpush1.bf16.msra.mxu0 %v3248_v47 }
 0x125   :  { %2132 = vmatprep.subr.bf16.mxu0 %v3253_v48 }
 0x128   :  { %2133 = vmatpush1.bf16.msra.mxu0 %v3251_v49 }
 0x129   :  { %2134 = vmatprep.subr.bf16.mxu0 %v3256_v50  ;;  %v2284_v50 = vrot.slane %v4316_v32, %v4298_v21 }
 0x12c   :  { %2135 = vmatpush1.bf16.msra.mxu0 %v3254_v51 }
 0x12d   :  { %2136 = vmatprep.subr.bf16.mxu0 %v3259_v52  ;;  %v3276_v52 = vld [vmem:[%s4502_s0] sm:$0xff] }
 0x130   :  { %2137 = vmatpush1.bf16.msra.mxu0 %v3257_v55 }
 0x131   :  { %2138 = vmatprep.subr.bf16.mxu0 %v3262_v56  ;;  %v3277_v56 = vld [vmem:[%s4502_s0 + $0x8] sm:$0xff] }
 0x134   :  { %2139 = vmatpush1.bf16.msra.mxu0 %v3260_v57 }
 0x135   :  { %2140 = vmatprep.subr.bf16.mxu0 %v3265_v58 }
 0x138   :  { %2141 = vmatpush1.bf16.msra.mxu0 %v3263_v59 }
 0x139   :  { %2142 = vmatprep.subr.bf16.mxu0 %v3268_v60  ;;  %v2264_v60 = vrot.slane %v4307_v27, %v4311_v29 }
 0x13c   :  { %2143 = vmatpush1.bf16.msra.mxu0 %v3266_v61  ;;  %v3278_v61 = vld [vmem:[%s4502_s0 + $0x30] sm:$0xff] }
 0x13d   :  { %2144 = vmatprep.subr.bf16.mxu0 %v3271_v62 }
 0x140   :  { %2145 = vmatpush1.bf16.msra.mxu0 %v3269_v63  ;;  %v3279_v63 = vld [vmem:[%s4502_s0 + $0x38] sm:$0xff] }
 0x143   :  { %2147 = vmatmul.mubr.bf16.vlgmr.msra.gmra.mrb[4].mxu0 %v3792_v23  ;;  %v4287_v23 = vld [vmem:[%s4503_s1] sm:$0x3f] }
 0x144   :  { %v2164_v19 = vrot.slane %v4287_v23, %v4280_v16  ;;  %v2168_v20 = vrot.slane %v4287_v23, %v4282_v17  ;;  %v2172_v28 = vrot.slane %v4287_v23, %v4298_v21  ;;  %v2176_v35 = vrot.slane %v4287_v23, %v4311_v29 }
 0x156   :  { %v1890_v0 = vpop.f32.mrb[0].mxu0 }
 0x157   :  { %v2813_v1 = vadd.f32 %v1890_v0, %v1804_v38  ;;  %v1892_v2 = vpop.f32.mrb[1].mxu0  ;;  %v2280_v38 = vrot.slane %v4316_v32, %v4282_v17 }
 0x158   :  { %v2814_v3 = vadd.f32 %v1892_v2, %v1806_v39  ;;  %v1894_v4 = vpop.f32.mrb[2].mxu0 }
 0x159   :  { %v2815_v5 = vadd.f32 %v1894_v4, %v1808_v41  ;;  %v1896_v6 = vpop.f32.mrb[3].mxu0  ;;  %v2221_v25 = vadd.f32 %v2813_v1, %v2164_v19  ;;  %v4358_v1 = vsub.s32 4, %v2162_v13  ;;  %v2288_v4 = vrot.slane %v4316_v32, %v4311_v29  ;;  %v3281_v19 = vld [vmem:[%s4502_s0 + $0x40] sm:$0xff] }
 0x15a   :  { %v2816_v7 = vadd.f32 %v1896_v6, %v1810_v43  ;;  %v2222_v26 = vadd.f32 %v2814_v3, %v2168_v20 }
 0x15b   :  { %v2227_v30 = vadd.f32 %v2815_v5, %v2188_v22  ;;  %v2233_v34 = vmax.f32 %v2221_v25, 0.0  ;;  %v4362_v5 = vsub.s32 5, %v2162_v13  ;;  %v2204_v25 = vrot.slane %v4292_v18, %v4358_v1 }
 0x15c   :  { %v2228_v31 = vadd.f32 %v2816_v7, %v2192_v24  ;;  %v2234_v15 = vmax.f32 %v2222_v26, 0.0 }
 0x15d   :  { %v2239_v36 = vmax.f32 %v2227_v30, 0.0  ;;  %v2309_v41 = vmul.f32 %v2252_v53, %v2233_v34  ;;  %v2184_v24 = vrot.slane %v4287_v23, %v4362_v5  ;;  %v3282_v30 = vld [vmem:[%s4502_s0 + $0x18] sm:$0xff]  ;;  %v2208_v34 = vrot.slane %v4292_v18, %v4362_v5 }
 0x15e   :  { %v2240_v54 = vmax.f32 %v2228_v31, 0.0  ;;  %v2310_v42 = vmul.f32 %v2256_v44, %v2234_v15  ;;  %v2268_v44 = vrot.slane %v4307_v27, %v4358_v1 }
 0x15f   :  { %v2315_v47 = vmul.f32 %v2276_v37, %v2239_v36  ;;  %v4339_v55 = vadd.f32 %v3276_v52, %v2309_v41  ;;  %v3283_v37 = vld [vmem:[%s4502_s0 + $0x48] sm:$0xff] }
 0x160   :  { %v2316_v48 = vmul.f32 %v2280_v38, %v2240_v54  ;;  %v4344_v57 = vadd.f32 %v3277_v56, %v2310_v42 }
 0x161   :  { %v4351_v62 = vadd.f32 %v3278_v61, %v2315_v47  ;;  %v2349_v6 = vmul.f32 %v4339_v55, %v4339_v55 }
 0x162   :  { %v4356_v0 = vadd.f32 %v3279_v63, %v2316_v48  ;;  %v2350_v7 = vmul.f32 %v4344_v57, %v4344_v57  ;;  %v2333_v26 = vadd.f32 %v4344_v57, %v4339_v55 }
 0x163   :  { %v2355_v12 = vmul.f32 %v4351_v62, %v4351_v62 }
 0x164   :  { %v2356_v13 = vmul.f32 %v4356_v0, %v4356_v0  ;;  %v2340_v53 = vadd.f32 %v4356_v0, %v4351_v62 }
 0x166   :  { %v2368_v36 = vadd.f32 %v2356_v13, %v2355_v12 }
 0x1d5   :  { %v2019_v8 = vpop.f32.mrb[4].mxu1 }
 0x1d6   :  { %v2021_v9 = vpop.f32.mrb[5].mxu1  ;;  %v2223_v14 = vadd.f32 %v2172_v28, %v2019_v8  ;;  %v3280_v8 = vld [vmem:[%s4502_s0 + $0x10] sm:$0xff]  ;;  %v2361_v28 = vadd.f32 %v2350_v7, %v2349_v6 }
 0x1d7   :  { %v2023_v10 = vpop.f32.mrb[6].mxu1  ;;  %v2224_v46 = vadd.f32 %v2176_v35, %v2021_v9  ;;  %v2272_v35 = vrot.slane %v4307_v27, %v4362_v5  ;;  %v2296_v27 = vrot.slane %v4316_v32, %v4362_v5 }
 0x1d8   :  { %v2025_v11 = vpop.f32.mrb[7].mxu1  ;;  %v2229_v39 = vadd.f32 %v2196_v33, %v2023_v10  ;;  %v2235_v43 = vmax.f32 %v2223_v14, 0.0 }
 0x1d9   :  { %v2230_v51 = vadd.f32 %v2200_v40, %v2025_v11  ;;  %v2236_v59 = vmax.f32 %v2224_v46, 0.0  ;;  %v2180_v11 = vrot.slane %v4287_v23, %v4358_v1 }
 0x1da   :  { %v2241_v49 = vmax.f32 %v2229_v39, 0.0  ;;  %v2311_v58 = vmul.f32 %v2260_v45, %v2235_v43  ;;  %v2292_v39 = vrot.slane %v4316_v32, %v4358_v1  ;;  %v3284_v32 = vld [vmem:[%s4502_s0 + $0x20] sm:$0xff] }
 0x1db   :  { %v2242_v3 = vmax.f32 %v2230_v51, 0.0  ;;  %v2312_v10 = vmul.f32 %v2264_v60, %v2236_v59 }
 0x1dc   :  { %v2317_v2 = vmul.f32 %v2284_v50, %v2241_v49  ;;  %v4371_v9 = vadd.f32 %v3280_v8, %v2311_v58  ;;  %v3286_v8 = vld [vmem:[%s4502_s0 + $0x50] sm:$0xff] }
 0x1dd   :  { %v2318_v22 = vmul.f32 %v2288_v4, %v2242_v3  ;;  %v4393_v31 = vadd.f32 %v3282_v30, %v2312_v10  ;;  %v3285_v4 = vld [vmem:[%s4502_s0 + $0x28] sm:$0xff] }
 0x1de   :  { %v4382_v20 = vadd.f32 %v3281_v19, %v2317_v2  ;;  %v2351_v23 = vmul.f32 %v4371_v9, %v4371_v9  ;;  %v2334_v45 = vadd.f32 %v2333_v26, %v4371_v9  ;;  %v3287_v19 = vld [vmem:[%s4502_s0 + $0x58] sm:$0xff] }
 0x1df   :  { %v4408_v18 = vadd.f32 %v3283_v37, %v2318_v22  ;;  %v2352_v48 = vmul.f32 %v4393_v31, %v4393_v31 }
 0x1e0   :  { %v2357_v40 = vmul.f32 %v4382_v20, %v4382_v20  ;;  %v2362_v49 = vadd.f32 %v2361_v28, %v2351_v23  ;;  %v2341_v52 = vadd.f32 %v2340_v53, %v4382_v20  ;;  %v2335_v2 = vadd.f32 %v2334_v45, %v4393_v31 }
 0x1e1   :  { %v2358_v59 = vmul.f32 %v4408_v18, %v4408_v18 }
 0x1e2   :  { %v2369_v60 = vadd.f32 %v2368_v36, %v2357_v40  ;;  %v2363_v7 = vadd.f32 %v2362_v49, %v2352_v48  ;;  %v2342_v13 = vadd.f32 %v2341_v52, %v4408_v18 }
 0x216   :  { %v2148_v33 = vpop.f32.mrb[4].mxu0 }
 0x217   :  { %v2225_v15 = vadd.f32 %v2180_v11, %v2148_v33  ;;  %v2150_v14 = vpop.f32.mrb[5].mxu0 }
 0x218   :  { %v2226_v54 = vadd.f32 %v2184_v24, %v2150_v14  ;;  %v2152_v38 = vpop.f32.mrb[6].mxu0 }
 0x219   :  { %v2237_v41 = vmax.f32 %v2225_v15, 0.0  ;;  %v2231_v42 = vadd.f32 %v2204_v25, %v2152_v38  ;;  %v2154_v43 = vpop.f32.mrb[7].mxu0  ;;  %v2370_v25 = vadd.f32 %v2369_v60, %v2358_v59 }
 0x21a   :  { %v2238_v46 = vmax.f32 %v2226_v54, 0.0  ;;  %v2232_v47 = vadd.f32 %v2208_v34, %v2154_v43 }
 0x21b   :  { %v2313_v50 = vmul.f32 %v2268_v44, %v2237_v41  ;;  %v2243_v51 = vmax.f32 %v2231_v42, 0.0 }
 0x21c   :  { %v2314_v56 = vmul.f32 %v2272_v35, %v2238_v46  ;;  %v2244_v58 = vmax.f32 %v2232_v47, 0.0  ;;  %v2409_v46 = vld [vmem:[%s4506_s4] sm:$0x3f]  ;;  %s3312_s4 = smov [#allocation2]  }
 0x21d   :  { %v4425_v61 = vadd.f32 %v3284_v32, %v2313_v50  ;;  %v2319_v63 = vmul.f32 %v2292_v39, %v2243_v51  ;;  %v2453_v47 = vld [vmem:[%s4507_s5] sm:$0x3f]  ;;  %v2414_v49 = vrot.slane %v2409_v46, %v4280_v16  ;;  %v2418_v51 = vrot.slane %v2409_v46, %v4282_v17  ;;  %s2514_s5 = sshll.u32 %s3312_s4, 4  ;;  %s2515_s5 = int_to_ptr.vmem [resolvable:$true] %s2514_s5 }
 0x21e   :  { %v2320_v3 = vmul.f32 %v2296_v27, %v2244_v58  ;;  %v4431_v6 = vadd.f32 %v3285_v4, %v2314_v56  ;;  %v4464_v50 = vrot.slane %v2453_v47, %v4280_v16  ;;  %v2462_v52 = vrot.slane %v2453_v47, %v4282_v17  ;;  %s3288_s2 = scalar_lea.vmem %s2515_s5, 1536  ;;  %p3293_p1 = scmp.lt.s32.totalorder %s2515_s5, %s2515_s5 }
 0x21f   :  { %v4436_v10 = vadd.f32 %v3286_v8, %v2319_v63  ;;  %v2336_v11 = vadd.f32 %v2335_v2, %v4425_v61  ;;  %v2353_v12 = vmul.f32 %v4425_v61, %v4425_v61  ;;  %v2422_v56 = vrot.slane %v2409_v46, %v4298_v21  ;;  %p3289_p0 = scmp.ne.s32.totalorder %s2515_s5, %s3288_s2  ;;  %p3294_p2 = scmp.lt.s32.totalorder %s3288_s2, %s3288_s2 }
 0x220   :  { %v4445_v22 = vadd.f32 %v3287_v19, %v2320_v3  ;;  %v2354_v24 = vmul.f32 %v4431_v6, %v4431_v6  ;;  %v2466_v58 = vrot.slane %v2453_v47, %v4298_v21  ;;  %v2426_v59 = vrot.slane %v2409_v46, %v4311_v29 }
 0x221   :  { %v2337_v26 = vadd.f32 %v2336_v11, %v4431_v6  ;;  %v2364_v28 = vadd.f32 %v2363_v7, %v2353_v12  ;;  %v2343_v30 = vadd.f32 %v2342_v13, %v4436_v10  ;;  %v2359_v33 = vmul.f32 %v4436_v10, %v4436_v10  ;;  %p3295_p3 = por %p3294_p2, %p3293_p1 }
 0x222   :  { %v2360_v23 = vmul.f32 %v4445_v22, %v4445_v22  ;;  %v2470_v60 = vrot.slane %v2453_v47, %v4311_v29  ;;  %v2430_v32 = vrot.slane %v2409_v46, %v4358_v1  ;;  %v2474_v63 = vrot.slane %v2453_v47, %v4358_v1 }
 0x223   :  { %2338 = vadd.xlane.f32.xlu0 %v2337_v26  ;;  %v2365_v34 = vadd.f32 %v2364_v28, %v2354_v24  ;;  %v2371_v53 = vadd.f32 %v2370_v25, %v2359_v33  ;;  %v2344_v15 = vadd.f32 %v2343_v30, %v4445_v22  ;;  %v2434_v2 = vrot.slane %v2409_v46, %v4362_v5  ;;  %p3296_p4 = pnand %p3295_p3, %p3289_p0 }
 0x224   :  { %v2478_v16 = vrot.slane %v2453_v47, %v4362_v5 }
 0x225   :  { %2366 = vadd.xlane.f32.xlu1 %v2365_v34  ;;  %v2372_v44 = vadd.f32 %v2371_v53, %v2360_v23 }
 0x227   :  { %2345 = vadd.xlane.f32.xlu0 %v2344_v15 }
 0x229   :  { %2373 = vadd.xlane.f32.xlu1 %v2372_v44 }
 0x2b0   :  { %v2339_v14 = vpop.xlane.xlu0 %2338 }
 0x2b1   :  { %v2347_v35 = vmul.f32 0.0013020834, %v2339_v14 }
 0x2b2   :  { %v2367_v36 = vpop.xlane.xlu1 %2366 }
 0x2b3   :  { %v2375_v37 = vmul.f32 0.0013020834, %v2367_v36  ;;  %v2377_v54 = vmul.f32 %v2347_v35, %v2347_v35  ;;  %v2381_v3 = vsub.f32 %v4339_v55, %v2347_v35  ;;  %v2382_v17 = vsub.f32 %v4344_v57, %v2347_v35 }
 0x2b4   :  { %v2346_v38 = vpop.xlane.xlu0 %2345  ;;  %v2383_v4 = vsub.f32 %v4371_v9, %v2347_v35  ;;  %v2384_v21 = vsub.f32 %v4393_v31, %v2347_v35  ;;  %v2385_v8 = vsub.f32 %v4425_v61, %v2347_v35  ;;  %v2386_v29 = vsub.f32 %v4431_v6, %v2347_v35 }
 0x2b5   :  { %v2348_v39 = vmul.f32 0.0013020834, %v2346_v38  ;;  %v2379_v40 = vsub.f32 %v2375_v37, %v2377_v54 }
 0x2b6   :  { %v2374_v41 = vpop.xlane.xlu1 %2373 }
 0x2b7   :  { %v2393_v42 = vadd.f32 1e-05, %v2379_v40  ;;  %v2376_v43 = vmul.f32 0.0013020834, %v2374_v41  ;;  %v2378_v27 = vmul.f32 %v2348_v39, %v2348_v39  ;;  %v2387_v11 = vsub.f32 %v4351_v62, %v2348_v39 }
 0x2b8   :  { %v2388_v1 = vsub.f32 %v4356_v0, %v2348_v39  ;;  %v2389_v55 = vsub.f32 %v4382_v20, %v2348_v39  ;;  %v2390_v57 = vsub.f32 %v4408_v18, %v2348_v39  ;;  %v2391_v6 = vsub.f32 %v4436_v10, %v2348_v39 }
 0x2b9   :  { %3272 = vrsqrt.f32 %v2393_v42  ;;  %v2380_v45 = vsub.f32 %v2376_v43, %v2378_v27  ;;  %v2392_v62 = vsub.f32 %v4445_v22, %v2348_v39 }
 0x2bb   :  { %v2394_v48 = vadd.f32 1e-05, %v2380_v45 }
 0x2bd   :  { %3274 = vrsqrt.f32 %v2394_v48 }
 0x2c3   :  { %v3273_v7 = vpop.eup %3272 }
 0x2c4   :  { %v2397_v12 = vmul.f32 %v3273_v7, %v2381_v3  ;;  %v2398_v13 = vmul.f32 %v3273_v7, %v2382_v17  ;;  %v2399_v5 = vmul.f32 %v3273_v7, %v2383_v4  ;;  %v2400_v19 = vmul.f32 %v3273_v7, %v2384_v21 }
 0x2c5   :  { %v2401_v9 = vmul.f32 %v3273_v7, %v2385_v8  ;;  %v2402_v24 = vmul.f32 %v3273_v7, %v2386_v29 }
 0x2c6   :  { %v2441_v31 = vmul.f32 %v2414_v49, %v2397_v12  ;;  %v2442_v25 = vmul.f32 %v2418_v51, %v2398_v13  ;;  %v2443_v26 = vmul.f32 %v2422_v56, %v2399_v5  ;;  %v2444_v61 = vmul.f32 %v2426_v59, %v2400_v19 }
 0x2c7   :  { %v2445_v28 = vmul.f32 %v2430_v32, %v2401_v9  ;;  %v2446_v0 = vmul.f32 %v2434_v2, %v2402_v24  ;;  %v3275_v30 = vpop.eup %3274 }
 0x2c8   :  { %v2485_v33 = vadd.f32 %v4464_v50, %v2441_v31  ;;  %v2486_v34 = vadd.f32 %v2462_v52, %v2442_v25  ;;  %v2487_v23 = vadd.f32 %v2466_v58, %v2443_v26  ;;  %v2488_v20 = vadd.f32 %v2470_v60, %v2444_v61 }
 0x2c9   :  { %v2403_v53 = vmul.f32 %v3275_v30, %v2387_v11  ;;  %v2404_v18 = vmul.f32 %v3275_v30, %v2388_v1  ;;  %v2405_v15 = vmul.f32 %v3275_v30, %v2389_v55  ;;  %v2406_v44 = vmul.f32 %v3275_v30, %v2390_v57 }
 0x2ca   :  { %v2407_v14 = vmul.f32 %v3275_v30, %v2391_v6  ;;  %v2408_v35 = vmul.f32 %v3275_v30, %v2392_v62  ;;  %v2489_v36 = vadd.f32 %v2474_v63, %v2445_v28  ;;  %v2490_v37 = vadd.f32 %v2478_v16, %v2446_v0  ;;  %2497 = vst [vmem:[#allocation2] sm:$0xff] %v2485_v33 }
 0x2cb   :  { %2498 = vst [vmem:[#allocation2 + $0x8] sm:$0xff] %v2486_v34  ;;  %2499 = vst [vmem:[#allocation2 + $0x10] sm:$0xff] %v2487_v23  ;;  %v2447_v10 = vmul.f32 %v2414_v49, %v2403_v53  ;;  %v2448_v22 = vmul.f32 %v2418_v51, %v2404_v18  ;;  %v2449_v54 = vmul.f32 %v2422_v56, %v2405_v15 }
 0x2cc   :  { %2500 = vst [vmem:[#allocation2 + $0x18] sm:$0xff] %v2488_v20  ;;  %v2450_v38 = vmul.f32 %v2426_v59, %v2406_v44  ;;  %v2451_v39 = vmul.f32 %v2430_v32, %v2407_v14  ;;  %v2452_v40 = vmul.f32 %v2434_v2, %v2408_v35  ;;  %2501 = vst [vmem:[#allocation2 + $0x20] sm:$0xff] %v2489_v36 }
 0x2cd   :  { %2502 = vst [vmem:[#allocation2 + $0x28] sm:$0xff] %v2490_v37  ;;  %v2491_v41 = vadd.f32 %v4464_v50, %v2447_v10  ;;  %v2492_v42 = vadd.f32 %v2462_v52, %v2448_v22  ;;  %v2493_v43 = vadd.f32 %v2466_v58, %v2449_v54 }
 0x2ce   :  { %v2494_v27 = vadd.f32 %v2470_v60, %v2450_v38  ;;  %v2495_v45 = vadd.f32 %v2474_v63, %v2451_v39  ;;  %v2496_v46 = vadd.f32 %v2478_v16, %v2452_v40 }
 0x2cf   :  { %2503 = vst [vmem:[#allocation2 + $0x30] sm:$0xff] %v2491_v41  ;;  %2504 = vst [vmem:[#allocation2 + $0x38] sm:$0xff] %v2492_v42 }
 0x2d0   :  { %2505 = vst [vmem:[#allocation2 + $0x40] sm:$0xff] %v2493_v43  ;;  %2506 = vst [vmem:[#allocation2 + $0x48] sm:$0xff] %v2494_v27 }
 0x2d1   :  { %2507 = vst [vmem:[#allocation2 + $0x50] sm:$0xff] %v2495_v45  ;;  %2508 = vst [vmem:[#allocation2 + $0x58] sm:$0xff] %v2496_v46 }
 0x2d2   :  { %3299 = shalt.err (!%p3296_p4)
}
 0x2d3   :  { %s3300_s29 = scalar_lea.hbm %s4508_s6, 1536 }
 0x2d4   :  { %p3301_p5 = scmp.ne.s32.totalorder %s4508_s6, %s3300_s29  ;;  %p3304_p6 = scmp.lt.u32.totalorder %s3300_s29, %s4508_s6 }
 0x2d6   :  { %p3306_p7 = pnand %p3304_p6, %p3301_p5 }
 0x2d8   :  { %3309 = shalt.err (!%p3306_p7)
}
 0x2d9   :  { %s3313_s10 = smov 768   ;;  %s3314_s11 = smov 48  }
 0x2da   :  { %2520 = dma.vmem_to_hbm [thread:$0]  %s2515_s5, 1536, %s4508_s6, [#allocation3], %s3313_s10, %s3313_s10, %s3314_s11  }
 0x2db   :  { %3310 = dma.done.wait [#allocation3], 1536  }
 0x2dc   :  { %3311 = vsyncadd [#allocation3], 4294965760 }
 0x2dd   :  { %2524 = vsyncpa [#allocation3], 1 }

// kernel: attn_gating_forward.2
= control target key start
LH: loop header
LB: loop body
LE: loop exit
PB: predicated region body
PF: predicated region fallthrough
CT: control target
= control target key end

     0   :  { %vm2422_vm0 = vcmask 1040384   ;;  %s4320_s3 = inlined_call_operand.vmem [shape: bf16[768,768], index: 3, kind: input, shape index: {}]   ;;  %s4321_s0 = inlined_call_operand.vmem [shape: f32[2,8,768], index: 0, kind: input, shape index: {}]   ;;  %s4322_s1 = inlined_call_operand.vmem [shape: f32[2,1,768], index: 1, kind: input, shape index: {}]   ;;  %s4323_s2 = inlined_call_operand.vmem [shape: f32[2,1,768], index: 2, kind: input, shape index: {}]   ;;  %s4324_s4 = inlined_call_operand.vmem [shape: f32[1,1,2,768], index: 4, kind: output, shape index: {}]  }
   0x1   :  { %v2782_v0 = vld [vmem:[%s4320_s3 + $0x4] ss:$24 sps:$4 sm:$0xff]   ;;  %v2786_v2 = vld [vmem:[%s4320_s3] ss:$24 sps:$4 sm:$0xff]   ;;  %v2788_v4 = vld [vmem:[%s4320_s3 + $0x34] ss:$24 sps:$4 sm:$0xff]  }
   0x2   :  { %v2784_v1 = vld [vmem:[%s4320_s3 + $0x304] ss:$24 sps:$4 sm:$0xff]   ;;  %1763 = vmatprep.subr.bf16.mxu1 %v2782_v0  ;;  %v2787_v3 = vld [vmem:[%s4320_s3 + $0x300] ss:$24 sps:$4 sm:$0xff]   ;;  %v2790_v5 = vld [vmem:[%s4320_s3 + $0x334] ss:$24 sps:$4 sm:$0xff]  }
   0x3   :  { %1806 = vmatprep.subr.bf16.mxu0 %v2784_v1  ;;  %1764 = vmatpush1.bf16.msra.mxu1 %v2786_v2  ;;  %v2792_v6 = vld [vmem:[%s4320_s3 + $0x30] ss:$24 sps:$4 sm:$0xff]   ;;  %v2794_v8 = vld [vmem:[%s4320_s3 + $0x64] ss:$24 sps:$4 sm:$0xff]   ;;  %v2798_v10 = vld [vmem:[%s4320_s3 + $0x60] ss:$24 sps:$4 sm:$0xff]  }
   0x4   :  { %1807 = vmatpush1.bf16.msra.mxu0 %v2787_v3  ;;  %1765 = vmatprep.subr.bf16.mxu1 %v2788_v4  ;;  %v2793_v7 = vld [vmem:[%s4320_s3 + $0x330] ss:$24 sps:$4 sm:$0xff]   ;;  %v2796_v9 = vld [vmem:[%s4320_s3 + $0x364] ss:$24 sps:$4 sm:$0xff]   ;;  %v2799_v11 = vld [vmem:[%s4320_s3 + $0x360] ss:$24 sps:$4 sm:$0xff]  }
   0x5   :  { %1808 = vmatprep.subr.bf16.mxu0 %v2790_v5  ;;  %v2800_v12 = vld [vmem:[%s4320_s3 + $0x94] ss:$24 sps:$4 sm:$0xff]   ;;  %v2804_v14 = vld [vmem:[%s4320_s3 + $0x90] ss:$24 sps:$4 sm:$0xff]   ;;  %v2806_v16 = vld [vmem:[%s4320_s3 + $0xc4] ss:$24 sps:$4 sm:$0xff]  }
   0x6   :  { %v2802_v13 = vld [vmem:[%s4320_s3 + $0x394] ss:$24 sps:$4 sm:$0xff]   ;;  %v2805_v15 = vld [vmem:[%s4320_s3 + $0x390] ss:$24 sps:$4 sm:$0xff]   ;;  %v2808_v17 = vld [vmem:[%s4320_s3 + $0x3c4] ss:$24 sps:$4 sm:$0xff]  }
   0x7   :  { %1766 = vmatpush1.bf16.msra.mxu1 %v2792_v6  ;;  %v2810_v18 = vld [vmem:[%s4320_s3 + $0xc0] ss:$24 sps:$4 sm:$0xff]   ;;  %v2812_v20 = vld [vmem:[%s4320_s3 + $0xf4] ss:$24 sps:$4 sm:$0xff]   ;;  %v2816_v22 = vld [vmem:[%s4320_s3 + $0xf0] ss:$24 sps:$4 sm:$0xff]  }
   0x8   :  { %1809 = vmatpush1.bf16.msra.mxu0 %v2793_v7  ;;  %1767 = vmatprep.subr.bf16.mxu1 %v2794_v8  ;;  %v2811_v19 = vld [vmem:[%s4320_s3 + $0x3c0] ss:$24 sps:$4 sm:$0xff]   ;;  %v2814_v21 = vld [vmem:[%s4320_s3 + $0x3f4] ss:$24 sps:$4 sm:$0xff]   ;;  %v2817_v23 = vld [vmem:[%s4320_s3 + $0x3f0] ss:$24 sps:$4 sm:$0xff]  }
   0x9   :  { %1810 = vmatprep.subr.bf16.mxu0 %v2796_v9  ;;  %v2818_v24 = vld [vmem:[%s4320_s3 + $0x124] ss:$24 sps:$4 sm:$0xff]   ;;  %v2822_v26 = vld [vmem:[%s4320_s3 + $0x120] ss:$24 sps:$4 sm:$0xff]   ;;  %v2824_v28 = vld [vmem:[%s4320_s3 + $0x154] ss:$24 sps:$4 sm:$0xff]  }
   0xa   :  { %v2820_v25 = vld [vmem:[%s4320_s3 + $0x424] ss:$24 sps:$4 sm:$0xff]   ;;  %v2823_v27 = vld [vmem:[%s4320_s3 + $0x420] ss:$24 sps:$4 sm:$0xff]   ;;  %v2826_v29 = vld [vmem:[%s4320_s3 + $0x454] ss:$24 sps:$4 sm:$0xff]  }
   0xb   :  { %1768 = vmatpush1.bf16.msra.mxu1 %v2798_v10  ;;  %v2828_v30 = vld [vmem:[%s4320_s3 + $0x150] ss:$24 sps:$4 sm:$0xff]   ;;  %v2830_v32 = vld [vmem:[%s4320_s3 + $0x184] ss:$24 sps:$4 sm:$0xff]   ;;  %v2834_v34 = vld [vmem:[%s4320_s3 + $0x180] ss:$24 sps:$4 sm:$0xff]  }
   0xc   :  { %1811 = vmatpush1.bf16.msra.mxu0 %v2799_v11  ;;  %1769 = vmatprep.subr.bf16.mxu1 %v2800_v12  ;;  %v2829_v31 = vld [vmem:[%s4320_s3 + $0x450] ss:$24 sps:$4 sm:$0xff]   ;;  %v2832_v33 = vld [vmem:[%s4320_s3 + $0x484] ss:$24 sps:$4 sm:$0xff]   ;;  %v2835_v35 = vld [vmem:[%s4320_s3 + $0x480] ss:$24 sps:$4 sm:$0xff]  }
   0xd   :  { %1812 = vmatprep.subr.bf16.mxu0 %v2802_v13  ;;  %v2836_v36 = vld [vmem:[%s4320_s3 + $0x1b4] ss:$24 sps:$4 sm:$0xff]   ;;  %v2840_v38 = vld [vmem:[%s4320_s3 + $0x1b0] ss:$24 sps:$4 sm:$0xff]   ;;  %v2842_v40 = vld [vmem:[%s4320_s3 + $0x1e4] ss:$24 sps:$4 sm:$0xff]  }
   0xe   :  { %v2838_v37 = vld [vmem:[%s4320_s3 + $0x4b4] ss:$24 sps:$4 sm:$0xff]   ;;  %v2841_v39 = vld [vmem:[%s4320_s3 + $0x4b0] ss:$24 sps:$4 sm:$0xff]   ;;  %v2844_v41 = vld [vmem:[%s4320_s3 + $0x4e4] ss:$24 sps:$4 sm:$0xff]  }
   0xf   :  { %1770 = vmatpush1.bf16.msra.mxu1 %v2804_v14  ;;  %v2846_v42 = vld [vmem:[%s4320_s3 + $0x1e0] ss:$24 sps:$4 sm:$0xff]   ;;  %v2848_v44 = vld [vmem:[%s4320_s3 + $0x214] ss:$24 sps:$4 sm:$0xff]   ;;  %v2852_v46 = vld [vmem:[%s4320_s3 + $0x210] ss:$24 sps:$4 sm:$0xff]  }
  0x10   :  { %1813 = vmatpush1.bf16.msra.mxu0 %v2805_v15  ;;  %1771 = vmatprep.subr.bf16.mxu1 %v2806_v16  ;;  %v2847_v43 = vld [vmem:[%s4320_s3 + $0x4e0] ss:$24 sps:$4 sm:$0xff]   ;;  %v2850_v45 = vld [vmem:[%s4320_s3 + $0x514] ss:$24 sps:$4 sm:$0xff]   ;;  %v2853_v47 = vld [vmem:[%s4320_s3 + $0x510] ss:$24 sps:$4 sm:$0xff]  }
  0x11   :  { %1814 = vmatprep.subr.bf16.mxu0 %v2808_v17  ;;  %v18_v48 = vld [vmem:[%s4321_s0 + $0x8] sm:$0xff]  ;;  %v24_v49 = vld [vmem:[%s4321_s0 + $0x38] sm:$0xff]  ;;  %v17_v63 = vld [vmem:[%s4321_s0] sm:$0xff] }
  0x12   :  { %v2369_v50 = vmul.f32 %v18_v48, %v18_v48  ;;  %v20_v51 = vld [vmem:[%s4321_s0 + $0x18] sm:$0xff]  ;;  %v26_v52 = vld [vmem:[%s4321_s0 + $0x48] sm:$0xff]  ;;  %v3399_v54 = vpack.c.bf16 %v24_v49, %v18_v48  ;;  %v2375_v55 = vmul.f32 %v24_v49, %v24_v49  ;;  %v23_v2 = vld [vmem:[%s4321_s0 + $0x30] sm:$0xff]  ;;  %v2368_v3 = vmul.f32 %v17_v63, %v17_v63 }
  0x13   :  { %1772 = vmatpush1.bf16.msra.mxu1 %v2810_v18  ;;  %v2854_v53 = vld [vmem:[%s4320_s3 + $0x244] ss:$24 sps:$4 sm:$0xff]   ;;  %v3401_v56 = vpack.c.bf16 %v26_v52, %v20_v51  ;;  %v2371_v58 = vmul.f32 %v20_v51, %v20_v51  ;;  %v2377_v59 = vmul.f32 %v26_v52, %v26_v52  ;;  %v2858_v60 = vld [vmem:[%s4320_s3 + $0x240] ss:$24 sps:$4 sm:$0xff]   ;;  %v2860_v0 = vld [vmem:[%s4320_s3 + $0x274] ss:$24 sps:$4 sm:$0xff]   ;;  %v2374_v5 = vmul.f32 %v23_v2, %v23_v2 }
  0x14   :  { %1815 = vmatpush1.bf16.msra.mxu0 %v2811_v19  ;;  %1773 = vmatprep.subr.bf16.mxu1 %v2812_v20  ;;  %v2856_v57 = vld [vmem:[%s4320_s3 + $0x544] ss:$24 sps:$4 sm:$0xff]   ;;  %v2859_v61 = vld [vmem:[%s4320_s3 + $0x540] ss:$24 sps:$4 sm:$0xff]   ;;  %v3413_v62 = vadd.f32 %v2375_v55, %v2369_v50  ;;  %v19_v4 = vld [vmem:[%s4321_s0 + $0x10] sm:$0xff] }
  0x15   :  { %1816 = vmatprep.subr.bf16.mxu0 %v2814_v21  ;;  %1795 = vmatprep.mubr.bf16.mxu1 %v3399_v54  ;;  %v3422_v1 = vadd.f32 %v2377_v59, %v2371_v58  ;;  %v25_v6 = vld [vmem:[%s4321_s0 + $0x40] sm:$0xff]  ;;  %v2862_v7 = vld [vmem:[%s4320_s3 + $0x574] ss:$24 sps:$4 sm:$0xff]   ;;  %v2370_v8 = vmul.f32 %v19_v4, %v19_v4  ;;  %v3436_v10 = vadd.f32 %v2374_v5, %v2368_v3  ;;  %v2864_v11 = vld [vmem:[%s4320_s3 + $0x270] ss:$24 sps:$4 sm:$0xff]  }
  0x16   :  { %1838 = vmatprep.mubr.bf16.mxu0 %v3401_v56  ;;  %v2376_v9 = vmul.f32 %v25_v6, %v25_v6  ;;  %v2865_v12 = vld [vmem:[%s4320_s3 + $0x570] ss:$24 sps:$4 sm:$0xff]   ;;  %v2866_v14 = vld [vmem:[%s4320_s3 + $0x2a4] ss:$24 sps:$4 sm:$0xff]   ;;  %v2870_v16 = vld [vmem:[%s4320_s3 + $0x2a0] ss:$24 sps:$4 sm:$0xff]  }
  0x17   :  { %1774 = vmatpush1.bf16.msra.mxu1 %v2816_v22  ;;  %v2868_v15 = vld [vmem:[%s4320_s3 + $0x5a4] ss:$24 sps:$4 sm:$0xff]   ;;  %v2871_v17 = vld [vmem:[%s4320_s3 + $0x5a0] ss:$24 sps:$4 sm:$0xff]   ;;  %v2872_v18 = vld [vmem:[%s4320_s3 + $0x2d4] ss:$24 sps:$4 sm:$0xff]  }
  0x18   :  { %1817 = vmatpush1.bf16.msra.mxu0 %v2817_v23  ;;  %1775 = vmatprep.subr.bf16.mxu1 %v2818_v24  ;;  %v3444_v13 = vadd.f32 %v2376_v9, %v2370_v8  ;;  %v2874_v19 = vld [vmem:[%s4320_s3 + $0x5d4] ss:$24 sps:$4 sm:$0xff]   ;;  %v2876_v20 = vld [vmem:[%s4320_s3 + $0x2d0] ss:$24 sps:$4 sm:$0xff]   ;;  %v2880_v22 = vld [vmem:[%s4320_s3 + $0x604] ss:$24 sps:$4 sm:$0xff]  }
  0x19   :  { %1818 = vmatprep.subr.bf16.mxu0 %v2820_v25  ;;  %v2877_v21 = vld [vmem:[%s4320_s3 + $0x5d0] ss:$24 sps:$4 sm:$0xff]   ;;  %v2883_v23 = vld [vmem:[%s4320_s3 + $0xc] ss:$24 sps:$4 sm:$0xff]   ;;  %v2878_v24 = vld [vmem:[%s4320_s3 + $0x600] ss:$24 sps:$4 sm:$0xff]  }
  0x1a   :  { %v2881_v25 = vld [vmem:[%s4320_s3 + $0x8] ss:$24 sps:$4 sm:$0xff]   ;;  %v2916_v48 = vld [vmem:[%s4320_s3 + $0x724] ss:$24 sps:$4 sm:$0xff]   ;;  %v2922_v52 = vld [vmem:[%s4320_s3 + $0x754] ss:$24 sps:$4 sm:$0xff]  }
  0x1b   :  { %1776 = vmatpush1.bf16.msra.mxu1 %v2822_v26  ;;  %v3482_v26 = vpack.c.bf16 %v23_v2, %v17_v63  ;;  %v2919_v49 = vld [vmem:[%s4320_s3 + $0x12c] ss:$24 sps:$4 sm:$0xff]   ;;  %v2914_v50 = vld [vmem:[%s4320_s3 + $0x720] ss:$24 sps:$4 sm:$0xff]   ;;  %v3583_v63 = vld [vmem:[%s4321_s0 + $0x50] sm:$0xff] }
  0x1c   :  { %1819 = vmatpush1.bf16.msra.mxu0 %v2823_v27  ;;  %1777 = vmatprep.subr.bf16.mxu1 %v2824_v28  ;;  %v3484_v27 = vpack.c.bf16 %v25_v6, %v19_v4  ;;  %v2886_v28 = vld [vmem:[%s4320_s3 + $0x634] ss:$24 sps:$4 sm:$0xff]   ;;  %v2917_v51 = vld [vmem:[%s4320_s3 + $0x128] ss:$24 sps:$4 sm:$0xff]   ;;  %v2378_v2 = vmul.f32 %v3583_v63, %v3583_v63  ;;  %v2923_v4 = vld [vmem:[%s4320_s3 + $0x158] ss:$24 sps:$4 sm:$0xff]  }
  0x1d   :  { %1820 = vmatprep.subr.bf16.mxu0 %v2826_v29  ;;  %v2889_v29 = vld [vmem:[%s4320_s3 + $0x3c] ss:$24 sps:$4 sm:$0xff]   ;;  %v22_v55 = vld [vmem:[%s4321_s0 + $0x28] sm:$0xff]  ;;  %v3576_v58 = vld [vmem:[%s4321_s0 + $0x20] sm:$0xff] }
  0x1e   :  { %v2920_v3 = vld [vmem:[%s4320_s3 + $0x750] ss:$24 sps:$4 sm:$0xff]   ;;  %v2928_v6 = vld [vmem:[%s4320_s3 + $0x784] ss:$24 sps:$4 sm:$0xff]   ;;  %v2926_v9 = vld [vmem:[%s4320_s3 + $0x780] ss:$24 sps:$4 sm:$0xff]  }
  0x1f   :  { %1778 = vmatpush1.bf16.msra.mxu1 %v2828_v30  ;;  %v2884_v30 = vld [vmem:[%s4320_s3 + $0x630] ss:$24 sps:$4 sm:$0xff]   ;;  %v2931_v8 = vld [vmem:[%s4320_s3 + $0x18c] ss:$24 sps:$4 sm:$0xff]  }
  0x20   :  { %1821 = vmatpush1.bf16.msra.mxu0 %v2829_v31  ;;  %1779 = vmatprep.subr.bf16.mxu1 %v2830_v32  ;;  %v2887_v31 = vld [vmem:[%s4320_s3 + $0x38] ss:$24 sps:$4 sm:$0xff]   ;;  %v2892_v32 = vld [vmem:[%s4320_s3 + $0x664] ss:$24 sps:$4 sm:$0xff]  }
  0x21   :  { %1822 = vmatprep.subr.bf16.mxu0 %v2832_v33  ;;  %v2895_v33 = vld [vmem:[%s4320_s3 + $0x6c] ss:$24 sps:$4 sm:$0xff]  }
  0x23   :  { %1780 = vmatpush1.bf16.msra.mxu1 %v2834_v34  ;;  %v2890_v34 = vld [vmem:[%s4320_s3 + $0x660] ss:$24 sps:$4 sm:$0xff]  }
  0x24   :  { %1823 = vmatpush1.bf16.msra.mxu0 %v2835_v35  ;;  %1781 = vmatprep.subr.bf16.mxu1 %v2836_v36  ;;  %v2893_v35 = vld [vmem:[%s4320_s3 + $0x68] ss:$24 sps:$4 sm:$0xff]   ;;  %v2898_v36 = vld [vmem:[%s4320_s3 + $0x694] ss:$24 sps:$4 sm:$0xff]  }
  0x25   :  { %1824 = vmatprep.subr.bf16.mxu0 %v2838_v37  ;;  %v2901_v37 = vld [vmem:[%s4320_s3 + $0x9c] ss:$24 sps:$4 sm:$0xff]  }
  0x27   :  { %1782 = vmatpush1.bf16.msra.mxu1 %v2840_v38  ;;  %v2896_v38 = vld [vmem:[%s4320_s3 + $0x690] ss:$24 sps:$4 sm:$0xff]  }
  0x28   :  { %1825 = vmatpush1.bf16.msra.mxu0 %v2841_v39  ;;  %1783 = vmatprep.subr.bf16.mxu1 %v2842_v40  ;;  %v2899_v39 = vld [vmem:[%s4320_s3 + $0x98] ss:$24 sps:$4 sm:$0xff]   ;;  %v2904_v40 = vld [vmem:[%s4320_s3 + $0x6c4] ss:$24 sps:$4 sm:$0xff]  }
  0x29   :  { %1826 = vmatprep.subr.bf16.mxu0 %v2844_v41  ;;  %v2907_v41 = vld [vmem:[%s4320_s3 + $0xcc] ss:$24 sps:$4 sm:$0xff]  }
  0x2b   :  { %1784 = vmatpush1.bf16.msra.mxu1 %v2846_v42  ;;  %v2902_v42 = vld [vmem:[%s4320_s3 + $0x6c0] ss:$24 sps:$4 sm:$0xff]  }
  0x2c   :  { %1827 = vmatpush1.bf16.msra.mxu0 %v2847_v43  ;;  %1785 = vmatprep.subr.bf16.mxu1 %v2848_v44  ;;  %v2905_v43 = vld [vmem:[%s4320_s3 + $0xc8] ss:$24 sps:$4 sm:$0xff]   ;;  %v2910_v44 = vld [vmem:[%s4320_s3 + $0x6f4] ss:$24 sps:$4 sm:$0xff]  }
  0x2d   :  { %1828 = vmatprep.subr.bf16.mxu0 %v2850_v45  ;;  %v2913_v45 = vld [vmem:[%s4320_s3 + $0xfc] ss:$24 sps:$4 sm:$0xff]  }
  0x2f   :  { %1786 = vmatpush1.bf16.msra.mxu1 %v2852_v46  ;;  %v2908_v46 = vld [vmem:[%s4320_s3 + $0x6f0] ss:$24 sps:$4 sm:$0xff]  }
  0x30   :  { %1829 = vmatpush1.bf16.msra.mxu0 %v2853_v47  ;;  %1787 = vmatprep.subr.bf16.mxu1 %v2854_v53  ;;  %v2911_v47 = vld [vmem:[%s4320_s3 + $0xf8] ss:$24 sps:$4 sm:$0xff]   ;;  %v2925_v53 = vld [vmem:[%s4320_s3 + $0x15c] ss:$24 sps:$4 sm:$0xff]  }
  0x31   :  { %1830 = vmatprep.subr.bf16.mxu0 %v2856_v57  ;;  %v28_v57 = vld [vmem:[%s4321_s0 + $0x58] sm:$0xff] }
  0x32   :  { %v3578_v59 = vpack.c.bf16 %v28_v57, %v22_v55 }
  0x33   :  { %1788 = vmatpush1.bf16.msra.mxu1 %v2858_v60  ;;  %v2373_v60 = vmul.f32 %v22_v55, %v22_v55  ;;  %v2986_v55 = vld [vmem:[%s4320_s3 + $0x368] ss:$24 sps:$4 sm:$0xff]  }
  0x34   :  { %1831 = vmatpush1.bf16.msra.mxu0 %v2859_v61  ;;  %1789 = vmatprep.subr.bf16.mxu1 %v2860_v0  ;;  %v2379_v61 = vmul.f32 %v28_v57, %v28_v57  ;;  %v2372_v0 = vmul.f32 %v3576_v58, %v3576_v58  ;;  %v2989_v57 = vld [vmem:[%s4320_s3 + $0x70] ss:$24 sps:$4 sm:$0xff]  }
  0x35   :  { %1832 = vmatprep.subr.bf16.mxu0 %v2862_v7 }
  0x36   :  { %v3596_v5 = vadd.f32 %v2379_v61, %v2373_v60  ;;  %v3601_v7 = vadd.f32 %v2378_v2, %v2372_v0  ;;  %v2992_v60 = vld [vmem:[%s4320_s3 + $0x398] ss:$24 sps:$4 sm:$0xff]   ;;  %v3003_v0 = vld [vmem:[%s4320_s3 + $0xd4] ss:$24 sps:$4 sm:$0xff]   ;;  %v2998_v2 = vld [vmem:[%s4320_s3 + $0x3c8] ss:$24 sps:$4 sm:$0xff]  }
  0x37   :  { %1790 = vmatpush1.bf16.msra.mxu1 %v2864_v11  ;;  %v2929_v11 = vld [vmem:[%s4320_s3 + $0x188] ss:$24 sps:$4 sm:$0xff]  }
  0x38   :  { %1833 = vmatpush1.bf16.msra.mxu0 %v2865_v12  ;;  %1791 = vmatprep.subr.bf16.mxu1 %v2866_v14  ;;  %v2934_v12 = vld [vmem:[%s4320_s3 + $0x7b4] ss:$24 sps:$4 sm:$0xff]   ;;  %v2995_v61 = vld [vmem:[%s4320_s3 + $0xa0] ss:$24 sps:$4 sm:$0xff]  }
  0x39   :  { %1834 = vmatprep.subr.bf16.mxu0 %v2868_v15  ;;  %v2937_v14 = vld [vmem:[%s4320_s3 + $0x1bc] ss:$24 sps:$4 sm:$0xff]   ;;  %v2932_v15 = vld [vmem:[%s4320_s3 + $0x7b0] ss:$24 sps:$4 sm:$0xff]  }
  0x3b   :  { %1792 = vmatpush1.bf16.msra.mxu1 %v2870_v16  ;;  %v2935_v16 = vld [vmem:[%s4320_s3 + $0x1b8] ss:$24 sps:$4 sm:$0xff]  }
  0x3c   :  { %1835 = vmatpush1.bf16.msra.mxu0 %v2871_v17  ;;  %1793 = vmatprep.subr.bf16.mxu1 %v2872_v18  ;;  %v2940_v17 = vld [vmem:[%s4320_s3 + $0x7e4] ss:$24 sps:$4 sm:$0xff]  }
  0x3d   :  { %1836 = vmatprep.subr.bf16.mxu0 %v2874_v19  ;;  %v2943_v18 = vld [vmem:[%s4320_s3 + $0x1ec] ss:$24 sps:$4 sm:$0xff]   ;;  %v2938_v19 = vld [vmem:[%s4320_s3 + $0x7e0] ss:$24 sps:$4 sm:$0xff]  }
  0x3f   :  { %1794 = vmatpush1.bf16.msra.mxu1 %v2876_v20  ;;  %v2941_v20 = vld [vmem:[%s4320_s3 + $0x1e8] ss:$24 sps:$4 sm:$0xff]  }
  0x40   :  { %1837 = vmatpush1.bf16.msra.mxu0 %v2877_v21  ;;  %1892 = vmatprep.subr.bf16.mxu1 %v2883_v23  ;;  %v2946_v21 = vld [vmem:[%s4320_s3 + $0x814] ss:$24 sps:$4 sm:$0xff]   ;;  %v2944_v23 = vld [vmem:[%s4320_s3 + $0x810] ss:$24 sps:$4 sm:$0xff]  }
  0x41   :  { %1849 = vmatprep.subr.bf16.mxu0 %v2880_v22  ;;  %v2949_v22 = vld [vmem:[%s4320_s3 + $0x21c] ss:$24 sps:$4 sm:$0xff]  }
  0x42   :  { %1796 = vmatmul.mubr.bf16.vlgmr.msra.gmra.mrb[0].mxu1 %v3482_v26 }
  0x43   :  { %1839 = vmatmul.mubr.bf16.vlgmr.msra.gmra.mrb[0].mxu0 %v3484_v27  ;;  %1893 = vmatpush1.bf16.msra.mxu1 %v2881_v25  ;;  %v2952_v25 = vld [vmem:[%s4320_s3 + $0x844] ss:$24 sps:$4 sm:$0xff]  }
  0x44   :  { %1850 = vmatpush1.bf16.msra.mxu0 %v2878_v24  ;;  %1894 = vmatprep.subr.bf16.mxu1 %v2889_v29  ;;  %v2947_v24 = vld [vmem:[%s4320_s3 + $0x218] ss:$24 sps:$4 sm:$0xff]  }
  0x45   :  { %1851 = vmatprep.subr.bf16.mxu0 %v2886_v28  ;;  %1924 = vmatprep.mubr.bf16.mxu1 %v3399_v54  ;;  %v2955_v28 = vld [vmem:[%s4320_s3 + $0x24c] ss:$24 sps:$4 sm:$0xff]   ;;  %v2950_v29 = vld [vmem:[%s4320_s3 + $0x840] ss:$24 sps:$4 sm:$0xff]  }
  0x46   :  { %1881 = vmatprep.mubr.bf16.mxu0 %v3578_v59 }
  0x47   :  { %1895 = vmatpush1.bf16.msra.mxu1 %v2887_v31  ;;  %v2958_v31 = vld [vmem:[%s4320_s3 + $0x874] ss:$24 sps:$4 sm:$0xff]  }
  0x48   :  { %1852 = vmatpush1.bf16.msra.mxu0 %v2884_v30  ;;  %1896 = vmatprep.subr.bf16.mxu1 %v2895_v33  ;;  %v2953_v30 = vld [vmem:[%s4320_s3 + $0x248] ss:$24 sps:$4 sm:$0xff]  }
  0x49   :  { %1853 = vmatprep.subr.bf16.mxu0 %v2892_v32  ;;  %v2961_v32 = vld [vmem:[%s4320_s3 + $0x27c] ss:$24 sps:$4 sm:$0xff]   ;;  %v2956_v33 = vld [vmem:[%s4320_s3 + $0x870] ss:$24 sps:$4 sm:$0xff]  }
  0x4b   :  { %1897 = vmatpush1.bf16.msra.mxu1 %v2893_v35  ;;  %v2964_v35 = vld [vmem:[%s4320_s3 + $0x8a4] ss:$24 sps:$4 sm:$0xff]  }
  0x4c   :  { %1854 = vmatpush1.bf16.msra.mxu0 %v2890_v34  ;;  %1898 = vmatprep.subr.bf16.mxu1 %v2901_v37  ;;  %v2959_v34 = vld [vmem:[%s4320_s3 + $0x278] ss:$24 sps:$4 sm:$0xff]  }
  0x4d   :  { %1855 = vmatprep.subr.bf16.mxu0 %v2898_v36  ;;  %v2967_v36 = vld [vmem:[%s4320_s3 + $0x2ac] ss:$24 sps:$4 sm:$0xff]   ;;  %v2962_v37 = vld [vmem:[%s4320_s3 + $0x8a0] ss:$24 sps:$4 sm:$0xff]  }
  0x4f   :  { %1899 = vmatpush1.bf16.msra.mxu1 %v2899_v39  ;;  %v2970_v39 = vld [vmem:[%s4320_s3 + $0x8d4] ss:$24 sps:$4 sm:$0xff]  }
  0x50   :  { %1856 = vmatpush1.bf16.msra.mxu0 %v2896_v38  ;;  %1900 = vmatprep.subr.bf16.mxu1 %v2907_v41  ;;  %v2965_v38 = vld [vmem:[%s4320_s3 + $0x2a8] ss:$24 sps:$4 sm:$0xff]  }
  0x51   :  { %1857 = vmatprep.subr.bf16.mxu0 %v2904_v40  ;;  %v2973_v40 = vld [vmem:[%s4320_s3 + $0x2dc] ss:$24 sps:$4 sm:$0xff]   ;;  %v2968_v41 = vld [vmem:[%s4320_s3 + $0x8d0] ss:$24 sps:$4 sm:$0xff]  }
  0x53   :  { %1901 = vmatpush1.bf16.msra.mxu1 %v2905_v43  ;;  %v2976_v43 = vld [vmem:[%s4320_s3 + $0x30c] ss:$24 sps:$4 sm:$0xff]  }
  0x54   :  { %1858 = vmatpush1.bf16.msra.mxu0 %v2902_v42  ;;  %1902 = vmatprep.subr.bf16.mxu1 %v2913_v45  ;;  %v2971_v42 = vld [vmem:[%s4320_s3 + $0x2d8] ss:$24 sps:$4 sm:$0xff]   ;;  %v3704_v45 = vpack.c.bf16 %v3583_v63, %v3576_v58  ;;  %v2994_v58 = vld [vmem:[%s4320_s3 + $0x39c] ss:$24 sps:$4 sm:$0xff]   ;;  %v3000_v63 = vld [vmem:[%s4320_s3 + $0x3cc] ss:$24 sps:$4 sm:$0xff]  }
  0x55   :  { %1859 = vmatprep.subr.bf16.mxu0 %v2910_v44  ;;  %v2979_v44 = vld [vmem:[%s4320_s3 + $0x14] ss:$24 sps:$4 sm:$0xff]  }
  0x57   :  { %1903 = vmatpush1.bf16.msra.mxu1 %v2911_v47  ;;  %v2977_v47 = vld [vmem:[%s4320_s3 + $0x10] ss:$24 sps:$4 sm:$0xff]  }
  0x58   :  { %1860 = vmatpush1.bf16.msra.mxu0 %v2908_v46  ;;  %1904 = vmatprep.subr.bf16.mxu1 %v2919_v49  ;;  %v2974_v46 = vld [vmem:[%s4320_s3 + $0x308] ss:$24 sps:$4 sm:$0xff]   ;;  %v2985_v49 = vld [vmem:[%s4320_s3 + $0x44] ss:$24 sps:$4 sm:$0xff]  }
  0x59   :  { %1861 = vmatprep.subr.bf16.mxu0 %v2916_v48  ;;  %v2982_v48 = vld [vmem:[%s4320_s3 + $0x33c] ss:$24 sps:$4 sm:$0xff]  }
  0x5b   :  { %1905 = vmatpush1.bf16.msra.mxu1 %v2917_v51  ;;  %v2983_v51 = vld [vmem:[%s4320_s3 + $0x40] ss:$24 sps:$4 sm:$0xff]  }
  0x5c   :  { %1862 = vmatpush1.bf16.msra.mxu0 %v2914_v50  ;;  %1906 = vmatprep.subr.bf16.mxu1 %v2925_v53  ;;  %v2980_v50 = vld [vmem:[%s4320_s3 + $0x338] ss:$24 sps:$4 sm:$0xff]   ;;  %v2991_v53 = vld [vmem:[%s4320_s3 + $0x74] ss:$24 sps:$4 sm:$0xff]  }
  0x5d   :  { %1863 = vmatprep.subr.bf16.mxu0 %v2922_v52  ;;  %v2988_v52 = vld [vmem:[%s4320_s3 + $0x36c] ss:$24 sps:$4 sm:$0xff]  }
  0x5f   :  { %1907 = vmatpush1.bf16.msra.mxu1 %v2923_v4  ;;  %v3006_v4 = vld [vmem:[%s4320_s3 + $0x3fc] ss:$24 sps:$4 sm:$0xff]  }
  0x60   :  { %1864 = vmatpush1.bf16.msra.mxu0 %v2920_v3  ;;  %1908 = vmatprep.subr.bf16.mxu1 %v2931_v8  ;;  %v3001_v3 = vld [vmem:[%s4320_s3 + $0xd0] ss:$24 sps:$4 sm:$0xff]  }
  0x61   :  { %1865 = vmatprep.subr.bf16.mxu0 %v2928_v6  ;;  %v3009_v6 = vld [vmem:[%s4320_s3 + $0x104] ss:$24 sps:$4 sm:$0xff]   ;;  %v3004_v8 = vld [vmem:[%s4320_s3 + $0x3f8] ss:$24 sps:$4 sm:$0xff]  }
  0x63   :  { %1909 = vmatpush1.bf16.msra.mxu1 %v2929_v11  ;;  %v3012_v11 = vld [vmem:[%s4320_s3 + $0x42c] ss:$24 sps:$4 sm:$0xff]  }
  0x64   :  { %1866 = vmatpush1.bf16.msra.mxu0 %v2926_v9  ;;  %1910 = vmatprep.subr.bf16.mxu1 %v2937_v14  ;;  %v3007_v9 = vld [vmem:[%s4320_s3 + $0x100] ss:$24 sps:$4 sm:$0xff]  }
  0x65   :  { %1867 = vmatprep.subr.bf16.mxu0 %v2934_v12  ;;  %v3015_v12 = vld [vmem:[%s4320_s3 + $0x134] ss:$24 sps:$4 sm:$0xff]   ;;  %v3010_v14 = vld [vmem:[%s4320_s3 + $0x428] ss:$24 sps:$4 sm:$0xff]  }
  0x67   :  { %1911 = vmatpush1.bf16.msra.mxu1 %v2935_v16  ;;  %v3018_v16 = vld [vmem:[%s4320_s3 + $0x45c] ss:$24 sps:$4 sm:$0xff]  }
  0x68   :  { %1868 = vmatpush1.bf16.msra.mxu0 %v2932_v15  ;;  %1912 = vmatprep.subr.bf16.mxu1 %v2943_v18  ;;  %v3013_v15 = vld [vmem:[%s4320_s3 + $0x130] ss:$24 sps:$4 sm:$0xff]  }
  0x69   :  { %1869 = vmatprep.subr.bf16.mxu0 %v2940_v17  ;;  %v3021_v17 = vld [vmem:[%s4320_s3 + $0x164] ss:$24 sps:$4 sm:$0xff]   ;;  %v3016_v18 = vld [vmem:[%s4320_s3 + $0x458] ss:$24 sps:$4 sm:$0xff]  }
  0x6b   :  { %1913 = vmatpush1.bf16.msra.mxu1 %v2941_v20  ;;  %v3024_v20 = vld [vmem:[%s4320_s3 + $0x48c] ss:$24 sps:$4 sm:$0xff]  }
  0x6c   :  { %1870 = vmatpush1.bf16.msra.mxu0 %v2938_v19  ;;  %1914 = vmatprep.subr.bf16.mxu1 %v2949_v22  ;;  %v3019_v19 = vld [vmem:[%s4320_s3 + $0x160] ss:$24 sps:$4 sm:$0xff]  }
  0x6d   :  { %1871 = vmatprep.subr.bf16.mxu0 %v2946_v21  ;;  %v3027_v21 = vld [vmem:[%s4320_s3 + $0x194] ss:$24 sps:$4 sm:$0xff]   ;;  %v3022_v22 = vld [vmem:[%s4320_s3 + $0x488] ss:$24 sps:$4 sm:$0xff]  }
  0x6f   :  { %1915 = vmatpush1.bf16.msra.mxu1 %v2947_v24  ;;  %v3030_v24 = vld [vmem:[%s4320_s3 + $0x4bc] ss:$24 sps:$4 sm:$0xff]  }
  0x70   :  { %1872 = vmatpush1.bf16.msra.mxu0 %v2944_v23  ;;  %1916 = vmatprep.subr.bf16.mxu1 %v2955_v28  ;;  %v3025_v23 = vld [vmem:[%s4320_s3 + $0x190] ss:$24 sps:$4 sm:$0xff]  }
  0x71   :  { %1873 = vmatprep.subr.bf16.mxu0 %v2952_v25  ;;  %v3033_v25 = vld [vmem:[%s4320_s3 + $0x1c4] ss:$24 sps:$4 sm:$0xff]   ;;  %v3028_v28 = vld [vmem:[%s4320_s3 + $0x4b8] ss:$24 sps:$4 sm:$0xff]  }
  0x73   :  { %1917 = vmatpush1.bf16.msra.mxu1 %v2953_v30  ;;  %v3036_v30 = vld [vmem:[%s4320_s3 + $0x4ec] ss:$24 sps:$4 sm:$0xff]  }
  0x74   :  { %1874 = vmatpush1.bf16.msra.mxu0 %v2950_v29  ;;  %1918 = vmatprep.subr.bf16.mxu1 %v2961_v32  ;;  %v3031_v29 = vld [vmem:[%s4320_s3 + $0x1c0] ss:$24 sps:$4 sm:$0xff]  }
  0x75   :  { %1875 = vmatprep.subr.bf16.mxu0 %v2958_v31  ;;  %v3039_v31 = vld [vmem:[%s4320_s3 + $0x1f4] ss:$24 sps:$4 sm:$0xff]   ;;  %v3034_v32 = vld [vmem:[%s4320_s3 + $0x4e8] ss:$24 sps:$4 sm:$0xff]  }
  0x77   :  { %1919 = vmatpush1.bf16.msra.mxu1 %v2959_v34  ;;  %v3042_v34 = vld [vmem:[%s4320_s3 + $0x51c] ss:$24 sps:$4 sm:$0xff]  }
  0x78   :  { %1876 = vmatpush1.bf16.msra.mxu0 %v2956_v33  ;;  %1920 = vmatprep.subr.bf16.mxu1 %v2967_v36  ;;  %v3037_v33 = vld [vmem:[%s4320_s3 + $0x1f0] ss:$24 sps:$4 sm:$0xff]  }
  0x79   :  { %1877 = vmatprep.subr.bf16.mxu0 %v2964_v35  ;;  %v3045_v35 = vld [vmem:[%s4320_s3 + $0x224] ss:$24 sps:$4 sm:$0xff]   ;;  %v3040_v36 = vld [vmem:[%s4320_s3 + $0x518] ss:$24 sps:$4 sm:$0xff]  }
  0x7b   :  { %1921 = vmatpush1.bf16.msra.mxu1 %v2965_v38  ;;  %v3048_v38 = vld [vmem:[%s4320_s3 + $0x54c] ss:$24 sps:$4 sm:$0xff]  }
  0x7c   :  { %1878 = vmatpush1.bf16.msra.mxu0 %v2962_v37  ;;  %1922 = vmatprep.subr.bf16.mxu1 %v2973_v40  ;;  %v3043_v37 = vld [vmem:[%s4320_s3 + $0x220] ss:$24 sps:$4 sm:$0xff]  }
  0x7d   :  { %1879 = vmatprep.subr.bf16.mxu0 %v2970_v39  ;;  %v3051_v39 = vld [vmem:[%s4320_s3 + $0x254] ss:$24 sps:$4 sm:$0xff]   ;;  %v3046_v40 = vld [vmem:[%s4320_s3 + $0x548] ss:$24 sps:$4 sm:$0xff]  }
  0x7f   :  { %1923 = vmatpush1.bf16.msra.mxu1 %v2971_v42  ;;  %v3054_v42 = vld [vmem:[%s4320_s3 + $0x57c] ss:$24 sps:$4 sm:$0xff]  }
  0x80   :  { %1880 = vmatpush1.bf16.msra.mxu0 %v2968_v41  ;;  %1935 = vmatprep.subr.bf16.mxu1 %v2976_v43  ;;  %v3049_v41 = vld [vmem:[%s4320_s3 + $0x250] ss:$24 sps:$4 sm:$0xff]   ;;  %v3057_v43 = vld [vmem:[%s4320_s3 + $0x284] ss:$24 sps:$4 sm:$0xff]  }
  0x81   :  { %2021 = vmatprep.subr.bf16.mxu0 %v2979_v44  ;;  %v3052_v44 = vld [vmem:[%s4320_s3 + $0x578] ss:$24 sps:$4 sm:$0xff]  }
  0x82   :  { %1925 = vmatmul.mubr.bf16.vlgmr.msra.gmra.mrb[4].mxu1 %v3482_v26 }
  0x83   :  { %1882 = vmatmul.mubr.bf16.vlgmr.msra.gmra.mrb[0].mxu0 %v3704_v45  ;;  %1936 = vmatpush1.bf16.msra.mxu1 %v2974_v46  ;;  %v3055_v46 = vld [vmem:[%s4320_s3 + $0x280] ss:$24 sps:$4 sm:$0xff]  }
  0x84   :  { %2022 = vmatpush1.bf16.msra.mxu0 %v2977_v47  ;;  %1937 = vmatprep.subr.bf16.mxu1 %v2982_v48  ;;  %v3060_v47 = vld [vmem:[%s4320_s3 + $0x5ac] ss:$24 sps:$4 sm:$0xff]  }
  0x85   :  { %2023 = vmatprep.subr.bf16.mxu0 %v2985_v49  ;;  %1967 = vmatprep.mubr.bf16.mxu1 %v3401_v56  ;;  %v3063_v48 = vld [vmem:[%s4320_s3 + $0x2b4] ss:$24 sps:$4 sm:$0xff]   ;;  %v3058_v49 = vld [vmem:[%s4320_s3 + $0x5a8] ss:$24 sps:$4 sm:$0xff]  }
  0x86   :  { %2053 = vmatprep.mubr.bf16.mxu0 %v3399_v54  ;;  %v2997_v54 = vld [vmem:[%s4320_s3 + $0xa4] ss:$24 sps:$4 sm:$0xff]  }
  0x87   :  { %1938 = vmatpush1.bf16.msra.mxu1 %v2980_v50  ;;  %v3061_v50 = vld [vmem:[%s4320_s3 + $0x2b0] ss:$24 sps:$4 sm:$0xff]  }
  0x88   :  { %2024 = vmatpush1.bf16.msra.mxu0 %v2983_v51  ;;  %1939 = vmatprep.subr.bf16.mxu1 %v2988_v52  ;;  %v3066_v51 = vld [vmem:[%s4320_s3 + $0x5dc] ss:$24 sps:$4 sm:$0xff]  }
  0x89   :  { %2025 = vmatprep.subr.bf16.mxu0 %v2991_v53  ;;  %v3069_v52 = vld [vmem:[%s4320_s3 + $0x2e4] ss:$24 sps:$4 sm:$0xff]   ;;  %v3064_v53 = vld [vmem:[%s4320_s3 + $0x5d8] ss:$24 sps:$4 sm:$0xff]  }
  0x8b   :  { %1940 = vmatpush1.bf16.msra.mxu1 %v2986_v55  ;;  %v3067_v55 = vld [vmem:[%s4320_s3 + $0x2e0] ss:$24 sps:$4 sm:$0xff]  }
  0x8c   :  { %2026 = vmatpush1.bf16.msra.mxu0 %v2989_v57  ;;  %1941 = vmatprep.subr.bf16.mxu1 %v2994_v58  ;;  %v3072_v57 = vld [vmem:[%s4320_s3 + $0x60c] ss:$24 sps:$4 sm:$0xff]  }
  0x8d   :  { %2027 = vmatprep.subr.bf16.mxu0 %v2997_v54  ;;  %v3075_v58 = vld [vmem:[%s4320_s3 + $0x314] ss:$24 sps:$4 sm:$0xff]   ;;  %v3070_v54 = vld [vmem:[%s4320_s3 + $0x608] ss:$24 sps:$4 sm:$0xff]  }
  0x8f   :  { %1942 = vmatpush1.bf16.msra.mxu1 %v2992_v60  ;;  %v3073_v60 = vld [vmem:[%s4320_s3 + $0x310] ss:$24 sps:$4 sm:$0xff]  }
  0x90   :  { %2028 = vmatpush1.bf16.msra.mxu0 %v2995_v61  ;;  %1943 = vmatprep.subr.bf16.mxu1 %v3000_v63  ;;  %v3078_v61 = vld [vmem:[%s4320_s3 + $0x63c] ss:$24 sps:$4 sm:$0xff]  }
  0x91   :  { %2029 = vmatprep.subr.bf16.mxu0 %v3003_v0  ;;  %v3081_v63 = vld [vmem:[%s4320_s3 + $0x344] ss:$24 sps:$4 sm:$0xff]   ;;  %v3076_v0 = vld [vmem:[%s4320_s3 + $0x638] ss:$24 sps:$4 sm:$0xff]  }
  0x93   :  { %1944 = vmatpush1.bf16.msra.mxu1 %v2998_v2  ;;  %v3079_v2 = vld [vmem:[%s4320_s3 + $0x340] ss:$24 sps:$4 sm:$0xff]  }
  0x94   :  { %2030 = vmatpush1.bf16.msra.mxu0 %v3001_v3  ;;  %1945 = vmatprep.subr.bf16.mxu1 %v3006_v4  ;;  %v3084_v3 = vld [vmem:[%s4320_s3 + $0x66c] ss:$24 sps:$4 sm:$0xff]   ;;  %v3082_v4 = vld [vmem:[%s4320_s3 + $0x668] ss:$24 sps:$4 sm:$0xff]  }
  0x95   :  { %2031 = vmatprep.subr.bf16.mxu0 %v3009_v6  ;;  %v3085_v6 = vld [vmem:[%s4320_s3 + $0x370] ss:$24 sps:$4 sm:$0xff]  }
  0x97   :  { %1946 = vmatpush1.bf16.msra.mxu1 %v3004_v8  ;;  %v3090_v8 = vld [vmem:[%s4320_s3 + $0x69c] ss:$24 sps:$4 sm:$0xff]  }
  0x98   :  { %2032 = vmatpush1.bf16.msra.mxu0 %v3007_v9  ;;  %1947 = vmatprep.subr.bf16.mxu1 %v3012_v11  ;;  %v3088_v9 = vld [vmem:[%s4320_s3 + $0x698] ss:$24 sps:$4 sm:$0xff]  }
  0x99   :  { %2033 = vmatprep.subr.bf16.mxu0 %v3015_v12  ;;  %v3091_v11 = vld [vmem:[%s4320_s3 + $0x3a0] ss:$24 sps:$4 sm:$0xff]   ;;  %v3096_v12 = vld [vmem:[%s4320_s3 + $0x6cc] ss:$24 sps:$4 sm:$0xff]  }
  0x9b   :  { %1948 = vmatpush1.bf16.msra.mxu1 %v3010_v14  ;;  %v3099_v14 = vld [vmem:[%s4320_s3 + $0x3d4] ss:$24 sps:$4 sm:$0xff]  }
  0x9c   :  { %2034 = vmatpush1.bf16.msra.mxu0 %v3013_v15  ;;  %1949 = vmatprep.subr.bf16.mxu1 %v3018_v16  ;;  %v3094_v15 = vld [vmem:[%s4320_s3 + $0x6c8] ss:$24 sps:$4 sm:$0xff]  }
  0x9d   :  { %2035 = vmatprep.subr.bf16.mxu0 %v3021_v17  ;;  %v3097_v16 = vld [vmem:[%s4320_s3 + $0x3d0] ss:$24 sps:$4 sm:$0xff]   ;;  %v3102_v17 = vld [vmem:[%s4320_s3 + $0x6fc] ss:$24 sps:$4 sm:$0xff]  }
  0x9f   :  { %1950 = vmatpush1.bf16.msra.mxu1 %v3016_v18  ;;  %v3105_v18 = vld [vmem:[%s4320_s3 + $0x404] ss:$24 sps:$4 sm:$0xff]  }
  0xa0   :  { %2036 = vmatpush1.bf16.msra.mxu0 %v3019_v19  ;;  %1951 = vmatprep.subr.bf16.mxu1 %v3024_v20  ;;  %v3100_v19 = vld [vmem:[%s4320_s3 + $0x6f8] ss:$24 sps:$4 sm:$0xff]  }
  0xa1   :  { %2037 = vmatprep.subr.bf16.mxu0 %v3027_v21  ;;  %v3103_v20 = vld [vmem:[%s4320_s3 + $0x400] ss:$24 sps:$4 sm:$0xff]   ;;  %v3108_v21 = vld [vmem:[%s4320_s3 + $0x72c] ss:$24 sps:$4 sm:$0xff]  }
  0xa3   :  { %1952 = vmatpush1.bf16.msra.mxu1 %v3022_v22  ;;  %v3111_v22 = vld [vmem:[%s4320_s3 + $0x434] ss:$24 sps:$4 sm:$0xff]  }
  0xa4   :  { %2038 = vmatpush1.bf16.msra.mxu0 %v3025_v23  ;;  %1953 = vmatprep.subr.bf16.mxu1 %v3030_v24  ;;  %v3106_v23 = vld [vmem:[%s4320_s3 + $0x728] ss:$24 sps:$4 sm:$0xff]  }
  0xa5   :  { %2039 = vmatprep.subr.bf16.mxu0 %v3033_v25  ;;  %v3109_v24 = vld [vmem:[%s4320_s3 + $0x430] ss:$24 sps:$4 sm:$0xff]   ;;  %v3114_v25 = vld [vmem:[%s4320_s3 + $0x75c] ss:$24 sps:$4 sm:$0xff]  }
  0xa7   :  { %1954 = vmatpush1.bf16.msra.mxu1 %v3028_v28  ;;  %v3117_v28 = vld [vmem:[%s4320_s3 + $0x464] ss:$24 sps:$4 sm:$0xff]  }
  0xa8   :  { %2040 = vmatpush1.bf16.msra.mxu0 %v3031_v29  ;;  %1955 = vmatprep.subr.bf16.mxu1 %v3036_v30  ;;  %v3112_v29 = vld [vmem:[%s4320_s3 + $0x758] ss:$24 sps:$4 sm:$0xff]  }
  0xa9   :  { %2041 = vmatprep.subr.bf16.mxu0 %v3039_v31  ;;  %v3115_v30 = vld [vmem:[%s4320_s3 + $0x460] ss:$24 sps:$4 sm:$0xff]   ;;  %v3120_v31 = vld [vmem:[%s4320_s3 + $0x78c] ss:$24 sps:$4 sm:$0xff]  }
  0xab   :  { %1956 = vmatpush1.bf16.msra.mxu1 %v3034_v32  ;;  %v3123_v32 = vld [vmem:[%s4320_s3 + $0x494] ss:$24 sps:$4 sm:$0xff]  }
  0xac   :  { %2042 = vmatpush1.bf16.msra.mxu0 %v3037_v33  ;;  %1957 = vmatprep.subr.bf16.mxu1 %v3042_v34  ;;  %v3118_v33 = vld [vmem:[%s4320_s3 + $0x788] ss:$24 sps:$4 sm:$0xff]  }
  0xad   :  { %2043 = vmatprep.subr.bf16.mxu0 %v3045_v35  ;;  %v3121_v34 = vld [vmem:[%s4320_s3 + $0x490] ss:$24 sps:$4 sm:$0xff]   ;;  %v3126_v35 = vld [vmem:[%s4320_s3 + $0x7bc] ss:$24 sps:$4 sm:$0xff]  }
  0xaf   :  { %1958 = vmatpush1.bf16.msra.mxu1 %v3040_v36  ;;  %v3129_v36 = vld [vmem:[%s4320_s3 + $0x4c4] ss:$24 sps:$4 sm:$0xff]  }
  0xb0   :  { %2044 = vmatpush1.bf16.msra.mxu0 %v3043_v37  ;;  %1959 = vmatprep.subr.bf16.mxu1 %v3048_v38  ;;  %v3124_v37 = vld [vmem:[%s4320_s3 + $0x7b8] ss:$24 sps:$4 sm:$0xff]  }
  0xb1   :  { %2045 = vmatprep.subr.bf16.mxu0 %v3051_v39  ;;  %v3127_v38 = vld [vmem:[%s4320_s3 + $0x4c0] ss:$24 sps:$4 sm:$0xff]   ;;  %v3132_v39 = vld [vmem:[%s4320_s3 + $0x7ec] ss:$24 sps:$4 sm:$0xff]  }
  0xb3   :  { %1960 = vmatpush1.bf16.msra.mxu1 %v3046_v40  ;;  %v3135_v40 = vld [vmem:[%s4320_s3 + $0x4f4] ss:$24 sps:$4 sm:$0xff]  }
  0xb4   :  { %2046 = vmatpush1.bf16.msra.mxu0 %v3049_v41  ;;  %1961 = vmatprep.subr.bf16.mxu1 %v3054_v42  ;;  %v3130_v41 = vld [vmem:[%s4320_s3 + $0x7e8] ss:$24 sps:$4 sm:$0xff]  }
  0xb5   :  { %2047 = vmatprep.subr.bf16.mxu0 %v3057_v43  ;;  %v3133_v42 = vld [vmem:[%s4320_s3 + $0x4f0] ss:$24 sps:$4 sm:$0xff]   ;;  %v3138_v43 = vld [vmem:[%s4320_s3 + $0x81c] ss:$24 sps:$4 sm:$0xff]  }
  0xb7   :  { %1962 = vmatpush1.bf16.msra.mxu1 %v3052_v44  ;;  %v3141_v44 = vld [vmem:[%s4320_s3 + $0x524] ss:$24 sps:$4 sm:$0xff]  }
  0xb8   :  { %2048 = vmatpush1.bf16.msra.mxu0 %v3055_v46  ;;  %1963 = vmatprep.subr.bf16.mxu1 %v3060_v47  ;;  %v3136_v46 = vld [vmem:[%s4320_s3 + $0x818] ss:$24 sps:$4 sm:$0xff]  }
  0xb9   :  { %2049 = vmatprep.subr.bf16.mxu0 %v3063_v48  ;;  %v3139_v47 = vld [vmem:[%s4320_s3 + $0x520] ss:$24 sps:$4 sm:$0xff]   ;;  %v3144_v48 = vld [vmem:[%s4320_s3 + $0x84c] ss:$24 sps:$4 sm:$0xff]  }
  0xbb   :  { %1964 = vmatpush1.bf16.msra.mxu1 %v3058_v49  ;;  %v3147_v49 = vld [vmem:[%s4320_s3 + $0x554] ss:$24 sps:$4 sm:$0xff]  }
  0xbc   :  { %2050 = vmatpush1.bf16.msra.mxu0 %v3061_v50  ;;  %1965 = vmatprep.subr.bf16.mxu1 %v3066_v51  ;;  %v3142_v50 = vld [vmem:[%s4320_s3 + $0x848] ss:$24 sps:$4 sm:$0xff]  }
  0xbd   :  { %2051 = vmatprep.subr.bf16.mxu0 %v3069_v52  ;;  %v3145_v51 = vld [vmem:[%s4320_s3 + $0x550] ss:$24 sps:$4 sm:$0xff]   ;;  %v3150_v52 = vld [vmem:[%s4320_s3 + $0x87c] ss:$24 sps:$4 sm:$0xff]  }
  0xbf   :  { %1966 = vmatpush1.bf16.msra.mxu1 %v3064_v53  ;;  %v3153_v53 = vld [vmem:[%s4320_s3 + $0x584] ss:$24 sps:$4 sm:$0xff]  }
  0xc0   :  { %2052 = vmatpush1.bf16.msra.mxu0 %v3067_v55  ;;  %1978 = vmatprep.subr.bf16.mxu1 %v3072_v57  ;;  %v3148_v55 = vld [vmem:[%s4320_s3 + $0x878] ss:$24 sps:$4 sm:$0xff]  }
  0xc1   :  { %2064 = vmatprep.subr.bf16.mxu0 %v3075_v58  ;;  %v3151_v57 = vld [vmem:[%s4320_s3 + $0x580] ss:$24 sps:$4 sm:$0xff]   ;;  %v3156_v58 = vld [vmem:[%s4320_s3 + $0x8ac] ss:$24 sps:$4 sm:$0xff]  }
  0xc2   :  { %1968 = vmatmul.mubr.bf16.vlgmr.msra.gmra.mrb[4].mxu1 %v3484_v27 }
  0xc3   :  { %2054 = vmatmul.mubr.bf16.vlgmr.msra.gmra.mrb[4].mxu0 %v3482_v26  ;;  %1979 = vmatpush1.bf16.msra.mxu1 %v3070_v54  ;;  %v3087_v26 = vld [vmem:[%s4320_s3 + $0x374] ss:$24 sps:$4 sm:$0xff]  }
  0xc4   :  { %2065 = vmatpush1.bf16.msra.mxu0 %v3073_v60  ;;  %1980 = vmatprep.subr.bf16.mxu1 %v3078_v61  ;;  %v3159_v54 = vld [vmem:[%s4320_s3 + $0x5b4] ss:$24 sps:$4 sm:$0xff]   ;;  %v3154_v60 = vld [vmem:[%s4320_s3 + $0x8a8] ss:$24 sps:$4 sm:$0xff]  }
  0xc5   :  { %2066 = vmatprep.subr.bf16.mxu0 %v3081_v63  ;;  %2010 = vmatprep.mubr.bf16.mxu1 %v3578_v59  ;;  %v3157_v61 = vld [vmem:[%s4320_s3 + $0x5b0] ss:$24 sps:$4 sm:$0xff]   ;;  %v3162_v63 = vld [vmem:[%s4320_s3 + $0x8dc] ss:$24 sps:$4 sm:$0xff]  }
  0xc6   :  { %2096 = vmatprep.mubr.bf16.mxu0 %v3401_v56  ;;  %v3093_v56 = vld [vmem:[%s4320_s3 + $0x3a4] ss:$24 sps:$4 sm:$0xff]  }
  0xc7   :  { %1981 = vmatpush1.bf16.msra.mxu1 %v3076_v0  ;;  %v3165_v0 = vld [vmem:[%s4320_s3 + $0x5e4] ss:$24 sps:$4 sm:$0xff]  }
  0xc8   :  { %2067 = vmatpush1.bf16.msra.mxu0 %v3079_v2  ;;  %1982 = vmatprep.subr.bf16.mxu1 %v3084_v3  ;;  %v3160_v2 = vld [vmem:[%s4320_s3 + $0x8d8] ss:$24 sps:$4 sm:$0xff]  }
  0xc9   :  { %2068 = vmatprep.subr.bf16.mxu0 %v3087_v26  ;;  %v3163_v3 = vld [vmem:[%s4320_s3 + $0x5e0] ss:$24 sps:$4 sm:$0xff]   ;;  %v3168_v26 = vld [vmem:[%s4320_s3 + $0x614] ss:$24 sps:$4 sm:$0xff]  }
  0xcb   :  { %1983 = vmatpush1.bf16.msra.mxu1 %v3082_v4  ;;  %v3166_v4 = vld [vmem:[%s4320_s3 + $0x610] ss:$24 sps:$4 sm:$0xff]  }
  0xcc   :  { %2069 = vmatpush1.bf16.msra.mxu0 %v3085_v6  ;;  %1984 = vmatprep.subr.bf16.mxu1 %v3090_v8  ;;  %v3171_v6 = vld [vmem:[%s4320_s3 + $0x644] ss:$24 sps:$4 sm:$0xff]   ;;  %v3169_v8 = vld [vmem:[%s4320_s3 + $0x640] ss:$24 sps:$4 sm:$0xff]  }
  0xcd   :  { %2070 = vmatprep.subr.bf16.mxu0 %v3093_v56  ;;  %v3174_v56 = vld [vmem:[%s4320_s3 + $0x674] ss:$24 sps:$4 sm:$0xff]  }
  0xcf   :  { %1985 = vmatpush1.bf16.msra.mxu1 %v3088_v9  ;;  %v3172_v9 = vld [vmem:[%s4320_s3 + $0x670] ss:$24 sps:$4 sm:$0xff]  }
  0xd0   :  { %2071 = vmatpush1.bf16.msra.mxu0 %v3091_v11  ;;  %1986 = vmatprep.subr.bf16.mxu1 %v3096_v12  ;;  %v3180_v11 = vld [vmem:[%s4320_s3 + $0x6d4] ss:$24 sps:$4 sm:$0xff]   ;;  %v3178_v12 = vld [vmem:[%s4320_s3 + $0x6d0] ss:$24 sps:$4 sm:$0xff]  }
  0xd1   :  { %2072 = vmatprep.subr.bf16.mxu0 %v3099_v14  ;;  %v3183_v14 = vld [vmem:[%s4320_s3 + $0x704] ss:$24 sps:$4 sm:$0xff]  }
  0xd3   :  { %1987 = vmatpush1.bf16.msra.mxu1 %v3094_v15  ;;  %v3181_v15 = vld [vmem:[%s4320_s3 + $0x700] ss:$24 sps:$4 sm:$0xff]  }
  0xd4   :  { %2073 = vmatpush1.bf16.msra.mxu0 %v3097_v16  ;;  %1988 = vmatprep.subr.bf16.mxu1 %v3102_v17  ;;  %v3186_v16 = vld [vmem:[%s4320_s3 + $0x734] ss:$24 sps:$4 sm:$0xff]  }
  0xd5   :  { %2074 = vmatprep.subr.bf16.mxu0 %v3105_v18 }
  0xd7   :  { %1989 = vmatpush1.bf16.msra.mxu1 %v3100_v19  ;;  %v3184_v19 = vld [vmem:[%s4320_s3 + $0x730] ss:$24 sps:$4 sm:$0xff]  }
  0xd8   :  { %2075 = vmatpush1.bf16.msra.mxu0 %v3103_v20  ;;  %1990 = vmatprep.subr.bf16.mxu1 %v3108_v21  ;;  %v3189_v21 = vld [vmem:[%s4320_s3 + $0x764] ss:$24 sps:$4 sm:$0xff]  }
  0xd9   :  { %2076 = vmatprep.subr.bf16.mxu0 %v3111_v22 }
  0xdb   :  { %1991 = vmatpush1.bf16.msra.mxu1 %v3106_v23  ;;  %v3187_v23 = vld [vmem:[%s4320_s3 + $0x760] ss:$24 sps:$4 sm:$0xff]  }
  0xdc   :  { %2077 = vmatpush1.bf16.msra.mxu0 %v3109_v24  ;;  %1992 = vmatprep.subr.bf16.mxu1 %v3114_v25  ;;  %v3192_v24 = vld [vmem:[%s4320_s3 + $0x794] ss:$24 sps:$4 sm:$0xff]   ;;  %v3190_v25 = vld [vmem:[%s4320_s3 + $0x790] ss:$24 sps:$4 sm:$0xff]  }
  0xdd   :  { %2078 = vmatprep.subr.bf16.mxu0 %v3117_v28  ;;  %v3195_v28 = vld [vmem:[%s4320_s3 + $0x7c4] ss:$24 sps:$4 sm:$0xff]  }
  0xdf   :  { %1993 = vmatpush1.bf16.msra.mxu1 %v3112_v29  ;;  %v3193_v29 = vld [vmem:[%s4320_s3 + $0x7c0] ss:$24 sps:$4 sm:$0xff]  }
  0xe0   :  { %2079 = vmatpush1.bf16.msra.mxu0 %v3115_v30  ;;  %1994 = vmatprep.subr.bf16.mxu1 %v3120_v31  ;;  %v3198_v30 = vld [vmem:[%s4320_s3 + $0x7f4] ss:$24 sps:$4 sm:$0xff]   ;;  %v3196_v31 = vld [vmem:[%s4320_s3 + $0x7f0] ss:$24 sps:$4 sm:$0xff]  }
  0xe1   :  { %2080 = vmatprep.subr.bf16.mxu0 %v3123_v32  ;;  %v3201_v32 = vld [vmem:[%s4320_s3 + $0x824] ss:$24 sps:$4 sm:$0xff]  }
  0xe3   :  { %1995 = vmatpush1.bf16.msra.mxu1 %v3118_v33  ;;  %v3199_v33 = vld [vmem:[%s4320_s3 + $0x820] ss:$24 sps:$4 sm:$0xff]  }
  0xe4   :  { %2081 = vmatpush1.bf16.msra.mxu0 %v3121_v34  ;;  %1996 = vmatprep.subr.bf16.mxu1 %v3126_v35  ;;  %v3204_v34 = vld [vmem:[%s4320_s3 + $0x854] ss:$24 sps:$4 sm:$0xff]   ;;  %v3202_v35 = vld [vmem:[%s4320_s3 + $0x850] ss:$24 sps:$4 sm:$0xff]  }
  0xe5   :  { %2082 = vmatprep.subr.bf16.mxu0 %v3129_v36  ;;  %v3207_v36 = vld [vmem:[%s4320_s3 + $0x884] ss:$24 sps:$4 sm:$0xff]  }
  0xe7   :  { %1997 = vmatpush1.bf16.msra.mxu1 %v3124_v37  ;;  %v3205_v37 = vld [vmem:[%s4320_s3 + $0x880] ss:$24 sps:$4 sm:$0xff]  }
  0xe8   :  { %2083 = vmatpush1.bf16.msra.mxu0 %v3127_v38  ;;  %1998 = vmatprep.subr.bf16.mxu1 %v3132_v39  ;;  %v3210_v38 = vld [vmem:[%s4320_s3 + $0x8b4] ss:$24 sps:$4 sm:$0xff]   ;;  %v3208_v39 = vld [vmem:[%s4320_s3 + $0x8b0] ss:$24 sps:$4 sm:$0xff]  }
  0xe9   :  { %2084 = vmatprep.subr.bf16.mxu0 %v3135_v40  ;;  %v3213_v40 = vld [vmem:[%s4320_s3 + $0x8e4] ss:$24 sps:$4 sm:$0xff]  }
  0xeb   :  { %1999 = vmatpush1.bf16.msra.mxu1 %v3130_v41  ;;  %v3211_v41 = vld [vmem:[%s4320_s3 + $0x8e0] ss:$24 sps:$4 sm:$0xff]  }
  0xec   :  { %2085 = vmatpush1.bf16.msra.mxu0 %v3133_v42  ;;  %2000 = vmatprep.subr.bf16.mxu1 %v3138_v43  ;;  %v2154_v42 = vlaneseq }
  0xed   :  { %2086 = vmatprep.subr.bf16.mxu0 %v3141_v44 }
  0xee   :  { %v4196_v43 = vshrl.u32 %v2154_v42, 7 }
  0xef   :  { %2001 = vmatpush1.bf16.msra.mxu1 %v3136_v46  ;;  %v4202_v46 = vld [vmem:[%s4322_s1] sm:$0x3f] }
  0xf0   :  { %2087 = vmatpush1.bf16.msra.mxu0 %v3139_v47  ;;  %2002 = vmatprep.subr.bf16.mxu1 %v3144_v48  ;;  %v2156_v44 = vsub.s32 0, %v4196_v43  ;;  %v2160_v47 = vsub.s32 1, %v4196_v43  ;;  %v4208_v48 = vld [vmem:[%s4322_s1 + $0x6] sm:$0x3f] }
  0xf1   :  { %2088 = vmatprep.subr.bf16.mxu0 %v3147_v49 }
  0xf2   :  { %v2157_v49 = vrot.slane %v4202_v46, %v2156_v44 }
  0xf3   :  { %2003 = vmatpush1.bf16.msra.mxu1 %v3142_v50  ;;  %v4214_v50 = vld [vmem:[%s4323_s2] sm:$0x3f] }
  0xf4   :  { %2089 = vmatpush1.bf16.msra.mxu0 %v3145_v51  ;;  %2004 = vmatprep.subr.bf16.mxu1 %v3150_v52  ;;  %v2161_v51 = vrot.slane %v4202_v46, %v2160_v47 }
  0xf5   :  { %2090 = vmatprep.subr.bf16.mxu0 %v3153_v53 }
  0xf7   :  { %2005 = vmatpush1.bf16.msra.mxu1 %v3148_v55  ;;  %v2181_v55 = vrot.slane %v4208_v48, %v2156_v44 }
  0xf8   :  { %2091 = vmatpush1.bf16.msra.mxu0 %v3151_v57  ;;  %2006 = vmatprep.subr.bf16.mxu1 %v3156_v58 }
  0xf9   :  { %2092 = vmatprep.subr.bf16.mxu0 %v3159_v54  ;;  %v4221_v54 = vld [vmem:[%s4323_s2 + $0x6] sm:$0x3f] }
  0xfb   :  { %2007 = vmatpush1.bf16.msra.mxu1 %v3154_v60  ;;  %v2185_v60 = vrot.slane %v4208_v48, %v2160_v47 }
  0xfc   :  { %2093 = vmatpush1.bf16.msra.mxu0 %v3157_v61  ;;  %2008 = vmatprep.subr.bf16.mxu1 %v3162_v63  ;;  %v2381_v61 = vrot.slane %v3436_v10, 4 }
  0xfd   :  { %2094 = vmatprep.subr.bf16.mxu0 %v3165_v0  ;;  %v2245_v0 = vrot.slane %v4214_v50, %v2156_v44 }
  0xff   :  { %2009 = vmatpush1.bf16.msra.mxu1 %v3160_v2 }
 0x100   :  { %2095 = vmatpush1.bf16.msra.mxu0 %v3163_v3 }
 0x101   :  { %2107 = vmatprep.subr.bf16.mxu0 %v3168_v26  ;;  %v2388_v26 = vrot.slane %v3413_v62, 4 }
 0x102   :  { %2011 = vmatmul.mubr.bf16.vlgmr.msra.gmra.mrb[4].mxu1 %v3704_v45 }
 0x103   :  { %2097 = vmatmul.mubr.bf16.vlgmr.msra.gmra.mrb[4].mxu0 %v3484_v27  ;;  %v3177_v27 = vld [vmem:[%s4320_s3 + $0x6a4] ss:$24 sps:$4 sm:$0xff]  }
 0x104   :  { %2108 = vmatpush1.bf16.msra.mxu0 %v3166_v4  ;;  %2139 = vmatprep.mubr.bf16.mxu0 %v3578_v59  ;;  %v3175_v59 = vld [vmem:[%s4320_s3 + $0x6a0] ss:$24 sps:$4 sm:$0xff]  }
 0x105   :  { %2109 = vmatprep.subr.bf16.mxu0 %v3171_v6  ;;  %v2249_v6 = vrot.slane %v4214_v50, %v2160_v47 }
 0x108   :  { %2110 = vmatpush1.bf16.msra.mxu0 %v3169_v8 }
 0x109   :  { %2111 = vmatprep.subr.bf16.mxu0 %v3174_v56 }
 0x10c   :  { %2112 = vmatpush1.bf16.msra.mxu0 %v3172_v9 }
 0x10d   :  { %2113 = vmatprep.subr.bf16.mxu0 %v3177_v27  ;;  %v2269_v27 = vrot.slane %v4221_v54, %v2156_v44 }
 0x110   :  { %2114 = vmatpush1.bf16.msra.mxu0 %v3175_v59 }
 0x111   :  { %2115 = vmatprep.subr.bf16.mxu0 %v3180_v11 }
 0x114   :  { %2116 = vmatpush1.bf16.msra.mxu0 %v3178_v12  ;;  %v2273_v12 = vrot.slane %v4221_v54, %v2160_v47 }
 0x115   :  { %2117 = vmatprep.subr.bf16.mxu0 %v3183_v14  ;;  %v1797_v17 = vpop.f32.mrb[0].mxu1  ;;  %v2382_v14 = vadd.f32 %v2381_v61, %v3436_v10 }
 0x116   :  { %v1799_v18 = vpop.f32.mrb[1].mxu1 }
 0x117   :  { %v4137_v20 = vpop.f32.mrb[2].mxu1 }
 0x118   :  { %2118 = vmatpush1.bf16.msra.mxu0 %v3181_v15  ;;  %v4142_v22 = vpop.f32.mrb[3].mxu1 }
 0x119   :  { %2119 = vmatprep.subr.bf16.mxu0 %v3186_v16 }
 0x11c   :  { %2120 = vmatpush1.bf16.msra.mxu0 %v3184_v19 }
 0x11d   :  { %2121 = vmatprep.subr.bf16.mxu0 %v3189_v21 }
 0x120   :  { %2122 = vmatpush1.bf16.msra.mxu0 %v3187_v23  ;;  %v2383_v23 = vrot.slane %v2382_v14, 2 }
 0x121   :  { %2123 = vmatprep.subr.bf16.mxu0 %v3192_v24 }
 0x124   :  { %2124 = vmatpush1.bf16.msra.mxu0 %v3190_v25 }
 0x125   :  { %2125 = vmatprep.subr.bf16.mxu0 %v3195_v28 }
 0x128   :  { %2126 = vmatpush1.bf16.msra.mxu0 %v3193_v29 }
 0x129   :  { %2127 = vmatprep.subr.bf16.mxu0 %v3198_v30 }
 0x12c   :  { %2128 = vmatpush1.bf16.msra.mxu0 %v3196_v31 }
 0x12d   :  { %2129 = vmatprep.subr.bf16.mxu0 %v3201_v32  ;;  %v2384_v32 = vadd.f32 %v2383_v23, %v2382_v14 }
 0x130   :  { %2130 = vmatpush1.bf16.msra.mxu0 %v3199_v33 }
 0x131   :  { %2131 = vmatprep.subr.bf16.mxu0 %v3204_v34 }
 0x134   :  { %2132 = vmatpush1.bf16.msra.mxu0 %v3202_v35 }
 0x135   :  { %2133 = vmatprep.subr.bf16.mxu0 %v3207_v36 }
 0x138   :  { %2134 = vmatpush1.bf16.msra.mxu0 %v3205_v37  ;;  %v2385_v37 = vrot.slane %v2384_v32, 1 }
 0x139   :  { %2135 = vmatprep.subr.bf16.mxu0 %v3210_v38 }
 0x13a   :  { %v2386_v42 = vadd.f32 %v2385_v37, %v2384_v32 }
 0x13c   :  { %2136 = vmatpush1.bf16.msra.mxu0 %v3208_v39 }
 0x13d   :  { %2137 = vmatprep.subr.bf16.mxu0 %v3213_v40 }
 0x140   :  { %2138 = vmatpush1.bf16.msra.mxu0 %v3211_v41 }
 0x143   :  { %2140 = vmatmul.mubr.bf16.vlgmr.msra.gmra.mrb[4].mxu0 %v3704_v45 }
 0x156   :  { %v1883_v45 = vpop.f32.mrb[0].mxu0 }
 0x157   :  { %v2757_v52 = vadd.f32 %v1883_v45, %v1797_v17  ;;  %v1885_v53 = vpop.f32.mrb[1].mxu0  ;;  %v2389_v17 = vadd.f32 %v2388_v26, %v3413_v62 }
 0x158   :  { %v2758_v57 = vadd.f32 %v1885_v53, %v1799_v18  ;;  %v1887_v58 = vpop.f32.mrb[2].mxu0 }
 0x159   :  { %v2214_v63 = vadd.f32 %v2757_v52, %v2157_v49  ;;  %v2759_v2 = vadd.f32 %v1887_v58, %v4137_v20  ;;  %v1889_v3 = vpop.f32.mrb[3].mxu0  ;;  %v2390_v25 = vrot.slane %v2389_v17, 2  ;;  %v4246_v58 = vsub.s32 5, %v4196_v43 }
 0x15a   :  { %v2215_v4 = vadd.f32 %v2758_v57, %v2161_v51  ;;  %v2760_v8 = vadd.f32 %v1889_v3, %v4142_v22  ;;  %v4243_v57 = vsub.s32 4, %v4196_v43 }
 0x15b   :  { %v2226_v56 = vmax.f32 %v2214_v63, 0.0  ;;  %v2220_v9 = vadd.f32 %v2759_v2, %v2181_v55  ;;  %v2391_v34 = vadd.f32 %v2390_v25, %v2389_v17  ;;  %v2177_v61 = vrot.slane %v4202_v46, %v4246_v58 }
 0x15c   :  { %v2227_v59 = vmax.f32 %v2215_v4, 0.0  ;;  %v2221_v11 = vadd.f32 %v2760_v8, %v2185_v60  ;;  %v2173_v60 = vrot.slane %v4202_v46, %v4243_v57  ;;  %v2197_v63 = vrot.slane %v4208_v48, %v4243_v57 }
 0x15d   :  { %v2302_v15 = vmul.f32 %v2245_v0, %v2226_v56  ;;  %v2232_v16 = vmax.f32 %v2220_v9, 0.0  ;;  %v2392_v38 = vrot.slane %v2391_v34, 1  ;;  %v2201_v0 = vrot.slane %v4208_v48, %v4246_v58 }
 0x15e   :  { %v2303_v18 = vmul.f32 %v2249_v6, %v2227_v59  ;;  %v2233_v19 = vmax.f32 %v2221_v11, 0.0  ;;  %v2261_v2 = vrot.slane %v4214_v50, %v4243_v57  ;;  %v2265_v3 = vrot.slane %v4214_v50, %v4246_v58 }
 0x15f   :  { %v2308_v20 = vmul.f32 %v2269_v27, %v2232_v16  ;;  %v2314_v22 = vmul.f32 %v2302_v15, %v2302_v15  ;;  %v2393_v47 = vadd.f32 %v2392_v38, %v2391_v34  ;;  %v2285_v26 = vrot.slane %v4221_v54, %v4243_v57 }
 0x160   :  { %v2309_v21 = vmul.f32 %v2273_v12, %v2233_v19  ;;  %v2315_v28 = vmul.f32 %v2303_v18, %v2303_v18  ;;  %v2289_v4 = vrot.slane %v4221_v54, %v4246_v58  ;;  %v2164_v6 = vsub.s32 2, %v4196_v43 }
 0x161   :  { %v2320_v24 = vmul.f32 %v2308_v20, %v2308_v20  ;;  %v2168_v8 = vsub.s32 3, %v4196_v43  ;;  %v2395_v12 = vrot.slane %v3444_v13, 4  ;;  %v2402_v17 = vrot.slane %v3422_v1, 4 }
 0x162   :  { %v2321_v29 = vmul.f32 %v2309_v21, %v2309_v21  ;;  %v2165_v56 = vrot.slane %v4202_v46, %v2164_v6  ;;  %v2189_v27 = vrot.slane %v4208_v48, %v2164_v6  ;;  %v2253_v15 = vrot.slane %v4214_v50, %v2164_v6 }
 0x163   :  { %v2326_v30 = vadd.f32 %v2320_v24, %v2314_v22  ;;  %v2169_v9 = vrot.slane %v4202_v46, %v2168_v8  ;;  %v2193_v11 = vrot.slane %v4208_v48, %v2168_v8  ;;  %v2257_v19 = vrot.slane %v4214_v50, %v2168_v8 }
 0x164   :  { %v2333_v31 = vadd.f32 %v2321_v29, %v2315_v28  ;;  %v2277_v22 = vrot.slane %v4221_v54, %v2164_v6  ;;  %v2281_v29 = vrot.slane %v4221_v54, %v2168_v8 }
 0x165   :  { %v2327_v33 = vrot.slane %v2326_v30, 4 }
 0x166   :  { %v2334_v10 = vrot.slane %v2333_v31, 4 }
 0x167   :  { %v2328_v35 = vadd.f32 %v2327_v33, %v2326_v30  ;;  %v2396_v30 = vadd.f32 %v2395_v12, %v3444_v13  ;;  %v2403_v33 = vadd.f32 %v2402_v17, %v3422_v1  ;;  %v3214_v1 = vmov 1983009808  }
 0x168   :  { %v2335_v36 = vadd.f32 %v2334_v10, %v2333_v31 }
 0x169   :  { %v2329_v62 = vrot.slane %v2328_v35, 2  ;;  %v2397_v37 = vrot.slane %v2396_v30, 2 }
 0x16a   :  { %v2336_v39 = vrot.slane %v2335_v36, 2 }
 0x16b   :  { %v2330_v40 = vadd.f32 %v2329_v62, %v2328_v35 }
 0x16c   :  { %v2337_v41 = vadd.f32 %v2336_v39, %v2335_v36  ;;  %v2404_v39 = vrot.slane %v2403_v33, 2 }
 0x16d   :  { %v2331_v44 = vrot.slane %v2330_v40, 1 }
 0x16e   :  { %v2338_v49 = vrot.slane %v2337_v41, 1 }
 0x16f   :  { %v2332_v45 = vadd.f32 %v2331_v44, %v2330_v40 }
 0x170   :  { %v2339_v51 = vadd.f32 %v2338_v49, %v2337_v41 }
 0x171   :  { %v4235_v52 = vsel %vm2422_vm0, %v2332_v45, %v2386_v42  ;;  %v2405_v45 = vadd.f32 %v2404_v39, %v2403_v33  ;;  %v2416_v33 = vrot.slane %v3596_v5, 4 }
 0x172   :  { %v4238_v53 = vsel %vm2422_vm0, %v2339_v51, %v2393_v47  ;;  %v2398_v47 = vadd.f32 %v2397_v37, %v2396_v30 }
 0x173   :  { %v2435_v55 = vcombine.low %v4235_v52, %v4238_v53 }
 0x174   :  { %v2399_v8 = vrot.slane %v2398_v47, 1 }
 0x1d5   :  { %v2012_v59 = vpop.f32.mrb[4].mxu1 }
 0x1d6   :  { %v2216_v14 = vadd.f32 %v2165_v56, %v2012_v59  ;;  %v2014_v16 = vpop.f32.mrb[5].mxu1  ;;  %v2438_v56 = vunpack.c.l.s4 %v3214_v1 }
 0x1d7   :  { %v2217_v18 = vadd.f32 %v2169_v9, %v2014_v16  ;;  %v2016_v20 = vpop.f32.mrb[6].mxu1 }
 0x1d8   :  { %v2228_v21 = vmax.f32 %v2216_v14, 0.0  ;;  %v2222_v23 = vadd.f32 %v2189_v27, %v2016_v20  ;;  %v2018_v24 = vpop.f32.mrb[7].mxu1  ;;  %v2406_v27 = vrot.slane %v2405_v45, 1  ;;  %v2400_v14 = vadd.f32 %v2399_v8, %v2398_v47 }
 0x1d9   :  { %v2229_v25 = vmax.f32 %v2217_v18, 0.0  ;;  %v2223_v28 = vadd.f32 %v2193_v11, %v2018_v24 }
 0x1da   :  { %v2304_v31 = vmul.f32 %v2253_v15, %v2228_v21  ;;  %v2234_v32 = vmax.f32 %v2222_v23, 0.0  ;;  %v2439_v15 = vunpack.c.0.s8 %v2438_v56  ;;  %v2407_v17 = vadd.f32 %v2406_v27, %v2405_v45 }
 0x1db   :  { %v2305_v34 = vmul.f32 %v2257_v19, %v2229_v25  ;;  %v2235_v10 = vmax.f32 %v2223_v28, 0.0 }
 0x1dc   :  { %v2310_v35 = vmul.f32 %v2277_v22, %v2234_v32  ;;  %v2316_v62 = vmul.f32 %v2304_v31, %v2304_v31  ;;  %v2442_v21 = vsub.s32 %v2439_v15, %v4196_v43  ;;  %v2409_v31 = vrot.slane %v3601_v7, 4 }
 0x1dd   :  { %v2311_v36 = vmul.f32 %v2281_v29, %v2235_v10  ;;  %v2317_v40 = vmul.f32 %v2305_v34, %v2305_v34 }
 0x1de   :  { %v2322_v38 = vmul.f32 %v2310_v35, %v2310_v35  ;;  %v2443_v25 = vrot.slane %v2435_v55, %v2442_v21 }
 0x1df   :  { %v2323_v41 = vmul.f32 %v2311_v36, %v2311_v36 }
 0x1e0   :  { %v2340_v42 = vadd.f32 %v2322_v38, %v2316_v62 }
 0x1e1   :  { %v2347_v44 = vadd.f32 %v2323_v41, %v2317_v40 }
 0x1e2   :  { %v2341_v49 = vrot.slane %v2340_v42, 4 }
 0x1e3   :  { %v2348_v13 = vrot.slane %v2347_v44, 4 }
 0x1e4   :  { %v2342_v51 = vadd.f32 %v2341_v49, %v2340_v42 }
 0x1e5   :  { %v2349_v6 = vadd.f32 %v2348_v13, %v2347_v44 }
 0x1e6   :  { %v2343_v9 = vrot.slane %v2342_v51, 2 }
 0x1e7   :  { %v2350_v59 = vrot.slane %v2349_v6, 2 }
 0x1e8   :  { %v2344_v11 = vadd.f32 %v2343_v9, %v2342_v51 }
 0x1e9   :  { %v2351_v12 = vadd.f32 %v2350_v59, %v2349_v6 }
 0x1ea   :  { %v2345_v16 = vrot.slane %v2344_v11, 1 }
 0x1eb   :  { %v2352_v18 = vrot.slane %v2351_v12, 1 }
 0x1ec   :  { %v2346_v19 = vadd.f32 %v2345_v16, %v2344_v11 }
 0x1ed   :  { %v2353_v20 = vadd.f32 %v2352_v18, %v2351_v12 }
 0x1ee   :  { %v2425_v23 = vsel %vm2422_vm0, %v2346_v19, %v2400_v14 }
 0x1ef   :  { %v2426_v22 = vsel %vm2422_vm0, %v2353_v20, %v2407_v17 }
 0x1f0   :  { %v2436_v24 = vcombine.low %v2425_v23, %v2426_v22 }
 0x1f2   :  { %v2450_v28 = vrot.slane %v2436_v24, %v2442_v21 }
 0x1f4   :  { %v2451_v29 = vcombine.low %v2443_v25, %v2450_v28 }
 0x1f6   :  { %2462 = vst [vmem:[%s4324_s4] sm:$0xff] %v2451_v29 }
 0x216   :  { %v2141_v30 = vpop.f32.mrb[4].mxu0 }
 0x217   :  { %v2218_v43 = vadd.f32 %v2173_v60, %v2141_v30  ;;  %v2143_v32 = vpop.f32.mrb[5].mxu0  ;;  %v2410_v60 = vadd.f32 %v2409_v31, %v3601_v7 }
 0x218   :  { %v2219_v52 = vadd.f32 %v2177_v61, %v2143_v32  ;;  %v2145_v53 = vpop.f32.mrb[6].mxu0  ;;  %v2417_v61 = vadd.f32 %v2416_v33, %v3596_v5 }
 0x219   :  { %v2230_v55 = vmax.f32 %v2218_v43, 0.0  ;;  %v2224_v34 = vadd.f32 %v2197_v63, %v2145_v53  ;;  %v2147_v10 = vpop.f32.mrb[7].mxu0  ;;  %v2411_v48 = vrot.slane %v2410_v60, 2 }
 0x21a   :  { %v2231_v35 = vmax.f32 %v2219_v52, 0.0  ;;  %v2225_v36 = vadd.f32 %v2201_v0, %v2147_v10 }
 0x21b   :  { %v2306_v37 = vmul.f32 %v2261_v2, %v2230_v55  ;;  %v2236_v46 = vmax.f32 %v2224_v34, 0.0  ;;  %v2418_v2 = vrot.slane %v2417_v61, 2  ;;  %v2412_v44 = vadd.f32 %v2411_v48, %v2410_v60 }
 0x21c   :  { %v2307_v62 = vmul.f32 %v2265_v3, %v2231_v35  ;;  %v2237_v63 = vmax.f32 %v2225_v36, 0.0 }
 0x21d   :  { %v2312_v38 = vmul.f32 %v2285_v26, %v2236_v46  ;;  %v2318_v0 = vmul.f32 %v2306_v37, %v2306_v37  ;;  %v2419_v3 = vadd.f32 %v2418_v2, %v2417_v61  ;;  %v2413_v57 = vrot.slane %v2412_v44, 1 }
 0x21e   :  { %v2313_v7 = vmul.f32 %v2289_v4, %v2237_v63  ;;  %v2319_v40 = vmul.f32 %v2307_v62, %v2307_v62 }
 0x21f   :  { %v2324_v39 = vmul.f32 %v2312_v38, %v2312_v38  ;;  %v2420_v13 = vrot.slane %v2419_v3, 1  ;;  %v2414_v4 = vadd.f32 %v2413_v57, %v2412_v44 }
 0x220   :  { %v2325_v41 = vmul.f32 %v2313_v7, %v2313_v7 }
 0x221   :  { %v2354_v5 = vadd.f32 %v2324_v39, %v2318_v0  ;;  %v2421_v8 = vadd.f32 %v2420_v13, %v2419_v3 }
 0x222   :  { %v2361_v42 = vadd.f32 %v2325_v41, %v2319_v40 }
 0x223   :  { %v2355_v50 = vrot.slane %v2354_v5, 4 }
 0x224   :  { %v2362_v47 = vrot.slane %v2361_v42, 4 }
 0x225   :  { %v2356_v49 = vadd.f32 %v2355_v50, %v2354_v5 }
 0x226   :  { %v2363_v45 = vadd.f32 %v2362_v47, %v2361_v42 }
 0x227   :  { %v2357_v26 = vrot.slane %v2356_v49, 2 }
 0x228   :  { %v2364_v51 = vrot.slane %v2363_v45, 2 }
 0x229   :  { %v2358_v54 = vadd.f32 %v2357_v26, %v2356_v49 }
 0x22a   :  { %v2365_v58 = vadd.f32 %v2364_v51, %v2363_v45 }
 0x22b   :  { %v2359_v6 = vrot.slane %v2358_v54, 1 }
 0x22c   :  { %v2366_v1 = vrot.slane %v2365_v58, 1 }
 0x22d   :  { %v2360_v56 = vadd.f32 %v2359_v6, %v2358_v54 }
 0x22e   :  { %v2367_v9 = vadd.f32 %v2366_v1, %v2365_v58 }
 0x22f   :  { %v2427_v27 = vsel %vm2422_vm0, %v2360_v56, %v2414_v4 }
 0x230   :  { %v2428_v59 = vsel %vm2422_vm0, %v2367_v9, %v2421_v8 }
 0x231   :  { %v2452_v11 = vcombine.low %v2427_v27, %v2428_v59 }
 0x233   :  { %2756 = vst.sshfl [vmem:[%s4324_s4 + $0x8] sm:$0x33 pattern:$0x76325410] %v2452_v11 }

</bundles_post_ra>
